<compile_context>
chip_gen: v7x
topology: tpu7x:2x2x1
jax: 0.10.0
libtpu: 0.0.40
codegen_flags: <defaults>
</compile_context>

<pallas_src>
import jax
import jax.numpy as jnp
from jax.experimental import pallas as pl
from jax.experimental.pallas import tpu as pltpu

_HI = jax.lax.Precision.HIGHEST
_HEAD_PAD = 128          # lane-dense padded head width (nclass + 1 + 3 <= 128)


def _pick_band_rows(H, Wp, C, max_acc_bytes=4 << 20):
    """Largest divisor of H whose f32 accumulator (rows*Wp, 3C) stays small,
    preferring >= 2 bands per image so megacore / pipelining has work."""
    cap = max(1, max_acc_bytes // (Wp * 3 * C * 4))
    if H >= 16:
        cap = min(cap, H // 2)
    best = 1
    for d in range(1, H + 1):
        if H % d == 0 and d <= cap:
            best = d
    return best


# ----------------------------------------------------------------------------
# Parameter construction (deterministic, mirrors the module's __init__ shapes).
# BN (running stats, identity at init) is folded into the conv weights/biases;
# matmul weights are pre-cast to bf16 for the kernel, f32 copies kept for the
# pure-JAX reference.
# ----------------------------------------------------------------------------
def make_params(key, inp1, inp2, inp3, out_channels, nclass, eps=1e-5):
    cin = inp1 + inp2 + inp3
    mid = cin // 3
    C = out_channels
    ks = jax.random.split(key, 12)

    def xavier(k, shape, fan_in, fan_out):
        std = (2.0 / (fan_in + fan_out)) ** 0.5
        return std * jax.random.normal(k, shape, jnp.float32)

    def bn_identity(cn):
        return (jnp.ones((cn,), jnp.float32), jnp.zeros((cn,), jnp.float32),
                jnp.zeros((cn,), jnp.float32), jnp.ones((cn,), jnp.float32))

    def fold(w, bias, cn):
        gamma, beta, mean, var = bn_identity(cn)
        a = gamma / jnp.sqrt(var + eps)
        wf = w * a                                        # scale output channels
        b = bias if bias is not None else jnp.zeros((cn,), jnp.float32)
        c = a * (b - mean) + beta
        return wf, c.reshape(1, -1)

    # self.conv : 1x1 (cin -> mid) + BN + ReLU
    w1 = xavier(ks[0], (cin, mid), cin, mid)
    b1 = 0.01 * jax.random.normal(ks[1], (mid,), jnp.float32)
    w1f, c1 = fold(w1, b1, mid)
    # self.conv_1 : 1x1 (mid -> C) + BN + ReLU
    w2 = xavier(ks[2], (mid, C), mid, C)
    b2 = 0.01 * jax.random.normal(ks[3], (C,), jnp.float32)
    w2f, c2 = fold(w2, b2, C)

    # three blocks (3x3 conv no-bias + BN + ReLU + Dropout(id) + 1x1 head), fused
    head_sizes = (nclass, 1, 3)
    assert sum(head_sizes) <= _HEAD_PAD
    w3_list, c3_list, wh_list, bh_list = [], [], [], []
    for bi, nout in enumerate(head_sizes):
        k3, kh = ks[4 + 2 * bi], ks[5 + 2 * bi]
        w3 = xavier(k3, (3, 3, C, C), C * 9, C * 9)
        w3f, c3 = fold(w3, None, C)
        wh = xavier(kh, (C, nout), C, nout)
        bh = 0.01 * jax.random.normal(jax.random.fold_in(kh, 7), (nout,), jnp.float32)
        w3_list.append(w3f.reshape(9, C, C))
        c3_list.append(c3)
        wh_list.append(wh)
        bh_list.append(bh)

    w3cat = jnp.concatenate(w3_list, axis=-1)             # (9, C, 3C)
    c3cat = jnp.concatenate(c3_list, axis=-1)             # (1, 3C)
    # fold the 3 dx taps of each dy onto the contraction axis: (3, 3C, 3C)
    w3fold = w3cat.reshape(3, 3 * C, 3 * C)

    whcat = jnp.zeros((3 * C, _HEAD_PAD), jnp.float32)    # block-diagonal head
    bhcat = jnp.zeros((1, _HEAD_PAD), jnp.float32)
    off = 0
    for bi, nout in enumerate(head_sizes):
        whcat = whcat.at[bi * C:(bi + 1) * C, off:off + nout].set(wh_list[bi])
        bhcat = bhcat.at[0, off:off + nout].set(bh_list[bi])
        off += nout

    bf16 = jnp.bfloat16
    return dict(
        w1=w1f.astype(bf16), c1=c1, w2=w2f.astype(bf16), c2=c2,
        w3fold=w3fold.astype(bf16), c3=c3cat,
        wh=whcat.astype(bf16), bh=bhcat,
        # f32 unfused copies, used only by the pure-JAX reference
        ref=dict(w1f=w1f, c1=c1, w2f=w2f, c2=c2,
                 w3=w3_list, c3=c3_list, wh=wh_list, bh=bh_list),
    )


# ----------------------------------------------------------------------------
# Fully fused forward kernel, one grid step per (image, row band).
# ----------------------------------------------------------------------------
def cs_layer_nyu_forward(params, f_1, f_2, f_3, *, nclass):
    bf16 = jnp.bfloat16
    x = jnp.concatenate([f_1, f_2, f_3], axis=1)            # (N, cin, H, W)
    N, cin, H, W = x.shape
    xr = jnp.transpose(x, (0, 2, 3, 1)).astype(bf16)         # (N, H, W, cin) bf16

    mid = params["w1"].shape[1]
    C = params["w2"].shape[1]
    C3 = 3 * C
    NP = params["wh"].shape[1]

    assert W % 8 == 0, "kernel assumes the image width is a multiple of 8"
    Wp = W + 8                       # padded flat-row width (sublane aligned)
    TH = _pick_band_rows(H, Wp, C)   # image rows per band
    nb = H // TH
    L = TH * Wp                      # conv/head rows per band (incl. junk cols)
    LS = (TH + 2) * Wp               # im2col slab rows per band

    x_rows = xr.reshape(N, H * W, cin)
    # per-band fea halo source rows: band b needs image rows b*TH-1 and (b+1)*TH
    zrow = jnp.zeros((N, 1, W, cin), bf16)
    if nb > 1:
        tops = jnp.concatenate([zrow, xr[:, TH - 1:H - 1:TH]], axis=1)   # (N, nb, W, cin)
        bots = jnp.concatenate([xr[:, TH:H:TH], zrow], axis=1)           # (N, nb, W, cin)
    else:
        tops, bots = zrow, zrow
    x_halo = jnp.concatenate([tops[:, :, None], bots[:, :, None]], axis=2)
    x_halo = x_halo.reshape(N, nb, 2 * W, cin)

    def kernel(x_ref, xh_ref, w1_ref, c1_ref, w2_ref, c2_ref, w3_ref, c3_ref,
               wh_ref, bh_ref, fea_ref, heads_ref, scat_ref, acc_ref):
        b = pl.program_id(1)
        nb_g = pl.num_programs(1)

        def mm(a, w):
            return jnp.dot(a, w, preferred_element_type=jnp.float32)

        # ---- stage 1: fused 1x1 convs (bf16 operands, f32 bias + ReLU) ------
        w1 = w1_ref[...]
        w2 = w2_ref[...]
        h1 = jnp.maximum(mm(x_ref[...], w1) + c1_ref[...], 0.0)
        fea = jnp.maximum(mm(h1.astype(bf16), w2) + c2_ref[...], 0.0)   # (TH*W, C) f32
        fea_ref[...] = fea
        # halo rows (recomputed from the neighbouring x rows; zero at borders)
        h1h = jnp.maximum(mm(xh_ref[...], w1) + c1_ref[...], 0.0)
        feah = jnp.maximum(mm(h1h.astype(bf16), w2) + c2_ref[...], 0.0)  # (2W, C)
        top_ok = jnp.where(b > 0, 1.0, 0.0)
        bot_ok = jnp.where(b < nb_g - 1, 1.0, 0.0)

        # ---- stage 2: stream fea (+halo, + zero tails) into the slab's middle
        #      column block at 8-aligned flat-row offsets ----------------------
        fea16 = fea.astype(bf16)
        ztail = jnp.zeros((Wp - W, C), bf16)
        scat_ref[0:W, C:2 * C] = (feah[0:W] * top_ok).astype(bf16)
        scat_ref[W:Wp, C:2 * C] = ztail
        for y in range(TH):
            base = (y + 1) * Wp
            scat_ref[base:base + W, C:2 * C] = fea16[y * W:(y + 1) * W]
            scat_ref[base + W:base + Wp, C:2 * C] = ztail
        base = (TH + 1) * Wp
        scat_ref[base:base + W, C:2 * C] = (feah[W:2 * W] * bot_ok).astype(bf16)
        scat_ref[base + W:base + Wp, C:2 * C] = ztail

        # ---- stage 3: im2col over dx: the dx=0 / dx=2 taps are +-1-row shifted
        #      copies of the middle block (the only misaligned copies per band) -
        zline = jnp.zeros((1, C), bf16)
        scat_ref[0:1, 0:C] = zline
        scat_ref[1:LS, 0:C] = scat_ref[0:LS - 1, C:2 * C]
        scat_ref[0:LS - 1, 2 * C:3 * C] = scat_ref[1:LS, C:2 * C]
        scat_ref[LS - 1:LS, 2 * C:3 * C] = zline

        # ---- stage 4: fused 3x3 conv of all three blocks: 3 dots, K = 3C -----
        acc_ref[...] = mm(scat_ref[0:L, :], w3_ref[0])
        acc_ref[...] += mm(scat_ref[Wp:Wp + L, :], w3_ref[1])
        acc_ref[...] += mm(scat_ref[2 * Wp:2 * Wp + L, :], w3_ref[2])
        # bias + ReLU in f32, restage as the bf16 head operand (reuses the slab)
        scat_ref[0:L, :] = jnp.maximum(acc_ref[...] + c3_ref[...], 0.0).astype(bf16)

        # ---- stage 5: block-diagonal 1x1 heads, lane-dense 128-wide output;
        #      drop the padded junk columns before the HBM write ---------------
        hv = mm(scat_ref[0:L, :], wh_ref[...]) + bh_ref[...]             # (L, 128) f32
        for y in range(TH):
            heads_ref[y * W:(y + 1) * W, :] = hv[y * Wp:y * Wp + W, :]

    # VMEM budget (double-buffered ins/outs + scratch) and cost hint
    vmem_need = (
        2 * (TH * W * cin * 2) + 2 * (2 * W * cin * 2)
        + 2 * ((cin * mid + mid * C + 3 * C3 * C3 + C3 * NP) * 2
               + (mid + C + C3 + NP) * 4)
        + 2 * (TH * W * C * 4) + 2 * (TH * W * NP * 4)
        + LS * C3 * 2 + L * C3 * 4)
    vmem_limit = min(max(2 * vmem_need + (8 << 20), 32 << 20), 100 << 20)

    flops = 2 * N * ((H * W + 2 * W * nb) * (cin * mid + mid * C)
                     + H * Wp * (3 * C3 * C3) + H * Wp * (C3 * NP))
    bytes_accessed = (N * H * W * cin * 2 + N * nb * 2 * W * cin * 2
                      + (cin * mid + mid * C + 3 * C3 * C3 + C3 * NP) * 2
                      + N * H * W * (C + NP) * 4)

    fea_flat, heads_flat = pl.pallas_call(
        kernel,
        out_shape=(jax.ShapeDtypeStruct((N, H * W, C), jnp.float32),
                   jax.ShapeDtypeStruct((N, H * W, NP), jnp.float32)),
        grid_spec=pltpu.PrefetchScalarGridSpec(
            num_scalar_prefetch=0,
            grid=(N, nb),
            in_specs=[
                pl.BlockSpec((None, TH * W, cin), lambda n, b: (n, b, 0)),
                pl.BlockSpec((None, None, 2 * W, cin), lambda n, b: (n, b, 0, 0)),
                pl.BlockSpec((cin, mid), lambda n, b: (0, 0)),
                pl.BlockSpec((1, mid), lambda n, b: (0, 0)),
                pl.BlockSpec((mid, C), lambda n, b: (0, 0)),
                pl.BlockSpec((1, C), lambda n, b: (0, 0)),
                pl.BlockSpec((3, C3, C3), lambda n, b: (0, 0, 0)),
                pl.BlockSpec((1, C3), lambda n, b: (0, 0)),
                pl.BlockSpec((C3, NP), lambda n, b: (0, 0)),
                pl.BlockSpec((1, NP), lambda n, b: (0, 0)),
            ],
            out_specs=[
                pl.BlockSpec((None, TH * W, C), lambda n, b: (n, b, 0)),
                pl.BlockSpec((None, TH * W, NP), lambda n, b: (n, b, 0)),
            ],
            scratch_shapes=[
                pltpu.VMEM((LS, C3), jnp.bfloat16),    # fea im2col slab (dx taps)
                pltpu.VMEM((L, C3), jnp.float32),      # 3x3 f32 accumulator
            ],
        ),
        compiler_params=pltpu.CompilerParams(
            dimension_semantics=("parallel", "parallel"),
            vmem_limit_bytes=vmem_limit),
        cost_estimate=pl.CostEstimate(flops=flops, transcendentals=0,
                                      bytes_accessed=bytes_accessed),
    )(x_rows, x_halo, params["w1"], params["c1"], params["w2"], params["c2"],
      params["w3fold"], params["c3"], params["wh"], params["bh"])

    fea = fea_flat.reshape(N, H, W, C)
    heads = heads_flat.reshape(N, H, W, NP)
    sizes = (nclass, 1, 3)
    offs = (0, nclass, nclass + 1)
    to_nchw = lambda t: jnp.transpose(t, (0, 3, 1, 2))
    x_out = to_nchw(heads[..., offs[0]:offs[0] + sizes[0]])
    x_1 = to_nchw(heads[..., offs[1]:offs[1] + sizes[1]])
    x_2 = to_nchw(heads[..., offs[2]:offs[2] + sizes[2]])
    return [x_out, x_1, x_2, to_nchw(fea)]


# ----------------------------------------------------------------------------
# Pure-JAX f32 reference (same math, unfused) for verification.
# ----------------------------------------------------------------------------
def _ref_forward(params, f_1, f_2, f_3):
    r = params["ref"]
    x = jnp.concatenate([f_1, f_2, f_3], axis=1)
    x = jnp.transpose(x, (0, 2, 3, 1))
    N, H, W, _ = x.shape
    h1 = jnp.maximum(jnp.einsum("nhwc,cd->nhwd", x, r["w1f"], precision=_HI)
                     + r["c1"][0], 0.0)
    fea = jnp.maximum(jnp.einsum("nhwc,cd->nhwd", h1, r["w2f"], precision=_HI)
                      + r["c2"][0], 0.0)
    fp = jnp.pad(fea, ((0, 0), (1, 1), (1, 1), (0, 0)))
    outs = []
    for w3, c3, wh, bh in zip(r["w3"], r["c3"], r["wh"], r["bh"]):
        acc = 0.0
        for k in range(9):
            dy, dx = divmod(k, 3)
            acc = acc + jnp.einsum("nhwc,cd->nhwd",
                                   fp[:, dy:dy + H, dx:dx + W, :], w3[k],
                                   precision=_HI)
        hh = jnp.maximum(acc + c3[0], 0.0)
        outs.append(jnp.einsum("nhwc,cd->nhwd", hh, wh, precision=_HI) + bh)
    to_nchw = lambda t: jnp.transpose(t, (0, 3, 1, 2))
    return [to_nchw(outs[0]), to_nchw(outs[1]), to_nchw(outs[2]), to_nchw(fea)]


if __name__ == "__main__":
    key = jax.random.PRNGKey(0)
    N, H, W = 2, 16, 16
    inp1 = inp2 = inp3 = 8          # -> cin = 24, mid_channels = 8
    out_channels = 64
    nclass = 5

    k_p, k1, k2, k3 = jax.random.split(key, 4)
    params = make_params(k_p, inp1, inp2, inp3, out_channels, nclass)

    f_1 = jax.random.normal(k1, (N, inp1, H, W), dtype=jnp.float32)
    f_2 = jax.random.normal(k2, (N, inp2, H, W), dtype=jnp.float32)
    f_3 = jax.random.normal(k3, (N, inp3, H, W), dtype=jnp.float32)

    fwd = jax.jit(cs_layer_nyu_forward, static_argnames=("nclass",))
    outs = jax.block_until_ready(fwd(params, f_1, f_2, f_3, nclass=nclass))

    refs = _ref_forward(params, f_1, f_2, f_3)
    for o, r in zip(outs, refs):
        assert o.shape == r.shape and o.dtype == r.dtype, (o.shape, r.shape)
        # bf16 matmul operands -> compare with a scale-aware tolerance
        err = float(jnp.max(jnp.abs(o - r) / (jnp.abs(r) + 1.0)))
        assert err < 0.1, err

    print("KERNEL_OK")
</pallas_src>

<mosaic_0001>
module attributes {stable_mosaic.version = 11 : i64} {
  func.func @kernel(%arg0: i32, %arg1: i32, %arg2: memref<1x128x24xbf16, #tpu.memory_space<vmem>>, %arg3: memref<1x1x32x24xbf16, #tpu.memory_space<vmem>>, %arg4: memref<24x8xbf16, #tpu.memory_space<vmem>>, %arg5: memref<1x8xf32, #tpu.memory_space<vmem>>, %arg6: memref<8x64xbf16, #tpu.memory_space<vmem>>, %arg7: memref<1x64xf32, #tpu.memory_space<vmem>>, %arg8: memref<3x192x192xbf16, #tpu.memory_space<vmem>>, %arg9: memref<1x192xf32, #tpu.memory_space<vmem>>, %arg10: memref<192x128xbf16, #tpu.memory_space<vmem>>, %arg11: memref<1x128xf32, #tpu.memory_space<vmem>>, %arg12: memref<1x128x64xf32, #tpu.memory_space<vmem>>, %arg13: memref<1x128x128xf32, #tpu.memory_space<vmem>>, %arg14: memref<240x192xbf16, #tpu.memory_space<vmem>>, %arg15: memref<192x192xf32, #tpu.memory_space<vmem>>) attributes {dimension_semantics = [#tpu.dimension_semantics<parallel>, #tpu.dimension_semantics<parallel>], iteration_bounds = array<i64: 2, 2>, scalar_prefetch = 0 : i64, scratch_operands = 2 : i64, tpu.core_type = #tpu.core_type<tc>, window_params = [{transform_indices = @transform_0, window_bounds = array<i64: 1, 128, 24>}, {transform_indices = @transform_1, window_bounds = array<i64: 1, 1, 32, 24>}, {pipeline_mode = #tpu.pipeline_mode<synchronous>, transform_indices = @transform_2, window_bounds = array<i64: 24, 8>}, {pipeline_mode = #tpu.pipeline_mode<synchronous>, transform_indices = @transform_3, window_bounds = array<i64: 1, 8>}, {pipeline_mode = #tpu.pipeline_mode<synchronous>, transform_indices = @transform_4, window_bounds = array<i64: 8, 64>}, {pipeline_mode = #tpu.pipeline_mode<synchronous>, transform_indices = @transform_5, window_bounds = array<i64: 1, 64>}, {pipeline_mode = #tpu.pipeline_mode<synchronous>, transform_indices = @transform_6, window_bounds = array<i64: 3, 192, 192>}, {pipeline_mode = #tpu.pipeline_mode<synchronous>, transform_indices = @transform_7, window_bounds = array<i64: 1, 192>}, {pipeline_mode = #tpu.pipeline_mode<synchronous>, transform_indices = @transform_8, window_bounds = array<i64: 192, 128>}, {pipeline_mode = #tpu.pipeline_mode<synchronous>, transform_indices = @transform_9, window_bounds = array<i64: 1, 128>}, {transform_indices = @transform_10, window_bounds = array<i64: 1, 128, 64>}, {transform_indices = @transform_11, window_bounds = array<i64: 1, 128, 128>}]} {
    %c0 = arith.constant 0 : index
    %c0_0 = arith.constant 0 : index
    %0 = vector.load %arg4[%c0, %c0_0] : memref<24x8xbf16, #tpu.memory_space<vmem>>, vector<24x8xbf16>
    %c0_1 = arith.constant 0 : index
    %c0_2 = arith.constant 0 : index
    %1 = vector.load %arg6[%c0_1, %c0_2] : memref<8x64xbf16, #tpu.memory_space<vmem>>, vector<8x64xbf16>
    %c0_3 = arith.constant 0 : index
    %c0_4 = arith.constant 0 : index
    %c0_5 = arith.constant 0 : index
    %2 = vector.load %arg2[%c0_3, %c0_4, %c0_5] : memref<1x128x24xbf16, #tpu.memory_space<vmem>>, vector<1x128x24xbf16>
    %3 = vector.shape_cast %2 : vector<1x128x24xbf16> to vector<128x24xbf16>
    %cst = arith.constant dense<0.000000e+00> : vector<128x8xf32>
    %4 = tpu.matmul %3, %0, %cst {dimension_numbers = #tpu.dot_dimension_numbers<[1], [0], [0], [1], [0, 0, 1, 1], [], []>} : vector<128x24xbf16>, vector<24x8xbf16>, vector<128x8xf32> -> vector<128x8xf32>
    %c0_6 = arith.constant 0 : index
    %c0_7 = arith.constant 0 : index
    %5 = vector.load %arg5[%c0_6, %c0_7] : memref<1x8xf32, #tpu.memory_space<vmem>>, vector<1x8xf32>
    %6 = vector.broadcast %5 : vector<1x8xf32> to vector<128x8xf32>
    %7 = arith.addf %4, %6 : vector<128x8xf32>
    %cst_8 = arith.constant 0.000000e+00 : f32
    %8 = vector.broadcast %cst_8 : f32 to vector<128x8xf32>
    %9 = arith.maximumf %7, %8 : vector<128x8xf32>
    %10 = arith.truncf %9 : vector<128x8xf32> to vector<128x8xbf16>
    %cst_9 = arith.constant dense<0.000000e+00> : vector<128x64xf32>
    %11 = tpu.matmul %10, %1, %cst_9 {dimension_numbers = #tpu.dot_dimension_numbers<[1], [0], [0], [1], [0, 0, 1, 1], [], []>} : vector<128x8xbf16>, vector<8x64xbf16>, vector<128x64xf32> -> vector<128x64xf32>
    %c0_10 = arith.constant 0 : index
    %c0_11 = arith.constant 0 : index
    %12 = vector.load %arg7[%c0_10, %c0_11] : memref<1x64xf32, #tpu.memory_space<vmem>>, vector<1x64xf32>
    %13 = vector.broadcast %12 : vector<1x64xf32> to vector<128x64xf32>
    %14 = arith.addf %11, %13 : vector<128x64xf32>
    %cst_12 = arith.constant 0.000000e+00 : f32
    %15 = vector.broadcast %cst_12 : f32 to vector<128x64xf32>
    %16 = arith.maximumf %14, %15 : vector<128x64xf32>
    %c0_13 = arith.constant 0 : index
    %c0_14 = arith.constant 0 : index
    %c0_15 = arith.constant 0 : index
    %17 = vector.load %arg12[%c0_13, %c0_14, %c0_15] : memref<1x128x64xf32, #tpu.memory_space<vmem>>, vector<1x128x64xf32>
    %18 = vector.shape_cast %17 : vector<1x128x64xf32> to vector<128x64xf32>
    %19 = vector.shape_cast %16 : vector<128x64xf32> to vector<1x128x64xf32>
    tpu.vector_store %arg12[%c0_13, %c0_14, %c0_15], %19 {strides = array<i32>} : memref<1x128x64xf32, #tpu.memory_space<vmem>>, vector<1x128x64xf32>,
    %c0_16 = arith.constant 0 : index
    %c0_17 = arith.constant 0 : index
    %c0_18 = arith.constant 0 : index
    %c0_19 = arith.constant 0 : index
    %20 = vector.load %arg3[%c0_16, %c0_17, %c0_18, %c0_19] : memref<1x1x32x24xbf16, #tpu.memory_space<vmem>>, vector<1x1x32x24xbf16>
    %21 = vector.shape_cast %20 : vector<1x1x32x24xbf16> to vector<32x24xbf16>
    %cst_20 = arith.constant dense<0.000000e+00> : vector<32x8xf32>
    %22 = tpu.matmul %21, %0, %cst_20 {dimension_numbers = #tpu.dot_dimension_numbers<[1], [0], [0], [1], [0, 0, 1, 1], [], []>} : vector<32x24xbf16>, vector<24x8xbf16>, vector<32x8xf32> -> vector<32x8xf32>
    %c0_21 = arith.constant 0 : index
    %c0_22 = arith.constant 0 : index
    %23 = vector.load %arg5[%c0_21, %c0_22] : memref<1x8xf32, #tpu.memory_space<vmem>>, vector<1x8xf32>
    %24 = vector.broadcast %23 : vector<1x8xf32> to vector<32x8xf32>
    %25 = arith.addf %22, %24 : vector<32x8xf32>
    %cst_23 = arith.constant 0.000000e+00 : f32
    %26 = vector.broadcast %cst_23 : f32 to vector<32x8xf32>
    %27 = arith.maximumf %25, %26 : vector<32x8xf32>
    %28 = arith.truncf %27 : vector<32x8xf32> to vector<32x8xbf16>
    %cst_24 = arith.constant dense<0.000000e+00> : vector<32x64xf32>
    %29 = tpu.matmul %28, %1, %cst_24 {dimension_numbers = #tpu.dot_dimension_numbers<[1], [0], [0], [1], [0, 0, 1, 1], [], []>} : vector<32x8xbf16>, vector<8x64xbf16>, vector<32x64xf32> -> vector<32x64xf32>
    %c0_25 = arith.constant 0 : index
    %c0_26 = arith.constant 0 : index
    %30 = vector.load %arg7[%c0_25, %c0_26] : memref<1x64xf32, #tpu.memory_space<vmem>>, vector<1x64xf32>
    %31 = vector.broadcast %30 : vector<1x64xf32> to vector<32x64xf32>
    %32 = arith.addf %29, %31 : vector<32x64xf32>
    %cst_27 = arith.constant 0.000000e+00 : f32
    %33 = vector.broadcast %cst_27 : f32 to vector<32x64xf32>
    %34 = arith.maximumf %32, %33 : vector<32x64xf32>
    %c0_i32 = arith.constant 0 : i32
    %35 = arith.cmpi sgt, %arg1, %c0_i32 : i32
    %cst_28 = arith.constant 1.000000e+00 : f32
    %cst_29 = arith.constant 0.000000e+00 : f32
    %36 = arith.select %35, %cst_28, %cst_29 : f32
    %c1_i32 = arith.constant 1 : i32
    %37 = arith.cmpi slt, %arg1, %c1_i32 : i32
    %cst_30 = arith.constant 1.000000e+00 : f32
    %cst_31 = arith.constant 0.000000e+00 : f32
    %38 = arith.select %37, %cst_30, %cst_31 : f32
    %39 = arith.truncf %16 : vector<128x64xf32> to vector<128x64xbf16>
    %cst_32 = arith.constant 0.000000e+00 : bf16
    %40 = vector.broadcast %cst_32 : bf16 to vector<8x64xbf16>
    %41 = vector.extract_strided_slice %34 {offsets = [0, 0], sizes = [16, 64], strides = [1, 1]} : vector<32x64xf32> to vector<16x64xf32>
    %42 = vector.broadcast %36 : f32 to vector<16x64xf32>
    %43 = arith.mulf %41, %42 : vector<16x64xf32>
    %44 = arith.truncf %43 : vector<16x64xf32> to vector<16x64xbf16>
    %c0_33 = arith.constant 0 : index
    %c64 = arith.constant 64 : index
    %45 = vector.load %arg14[%c0_33, %c64] : memref<240x192xbf16, #tpu.memory_space<vmem>>, vector<16x64xbf16>
    tpu.vector_store %arg14[%c0_33, %c64], %44 {strides = array<i32>} : memref<240x192xbf16, #tpu.memory_space<vmem>>, vector<16x64xbf16>,
    %c16 = arith.constant 16 : index
    %c64_34 = arith.constant 64 : index
    %46 = vector.load %arg14[%c16, %c64_34] : memref<240x192xbf16, #tpu.memory_space<vmem>>, vector<8x64xbf16>
    tpu.vector_store %arg14[%c16, %c64_34], %40 {strides = array<i32>} : memref<240x192xbf16, #tpu.memory_space<vmem>>, vector<8x64xbf16>,
    %47 = vector.extract_strided_slice %39 {offsets = [0, 0], sizes = [16, 64], strides = [1, 1]} : vector<128x64xbf16> to vector<16x64xbf16>
    %c24 = arith.constant 24 : index
    %c64_35 = arith.constant 64 : index
    %48 = vector.load %arg14[%c24, %c64_35] : memref<240x192xbf16, #tpu.memory_space<vmem>>, vector<16x64xbf16>
    tpu.vector_store %arg14[%c24, %c64_35], %47 {strides = array<i32>} : memref<240x192xbf16, #tpu.memory_space<vmem>>, vector<16x64xbf16>,
    %c40 = arith.constant 40 : index
    %c64_36 = arith.constant 64 : index
    %49 = vector.load %arg14[%c40, %c64_36] : memref<240x192xbf16, #tpu.memory_space<vmem>>, vector<8x64xbf16>
    tpu.vector_store %arg14[%c40, %c64_36], %40 {strides = array<i32>} : memref<240x192xbf16, #tpu.memory_space<vmem>>, vector<8x64xbf16>,
    %50 = vector.extract_strided_slice %39 {offsets = [16, 0], sizes = [16, 64], strides = [1, 1]} : vector<128x64xbf16> to vector<16x64xbf16>
    %c48 = arith.constant 48 : index
    %c64_37 = arith.constant 64 : index
    %51 = vector.load %arg14[%c48, %c64_37] : memref<240x192xbf16, #tpu.memory_space<vmem>>, vector<16x64xbf16>
    tpu.vector_store %arg14[%c48, %c64_37], %50 {strides = array<i32>} : memref<240x192xbf16, #tpu.memory_space<vmem>>, vector<16x64xbf16>,
    %c64_38 = arith.constant 64 : index
    %c64_39 = arith.constant 64 : index
    %52 = vector.load %arg14[%c64_38, %c64_39] : memref<240x192xbf16, #tpu.memory_space<vmem>>, vector<8x64xbf16>
    tpu.vector_store %arg14[%c64_38, %c64_39], %40 {strides = array<i32>} : memref<240x192xbf16, #tpu.memory_space<vmem>>, vector<8x64xbf16>,
    %53 = vector.extract_strided_slice %39 {offsets = [32, 0], sizes = [16, 64], strides = [1, 1]} : vector<128x64xbf16> to vector<16x64xbf16>
    %c72 = arith.constant 72 : index
    %c64_40 = arith.constant 64 : index
    %54 = vector.load %arg14[%c72, %c64_40] : memref<240x192xbf16, #tpu.memory_space<vmem>>, vector<16x64xbf16>
    tpu.vector_store %arg14[%c72, %c64_40], %53 {strides = array<i32>} : memref<240x192xbf16, #tpu.memory_space<vmem>>, vector<16x64xbf16>,
    %c88 = arith.constant 88 : index
    %c64_41 = arith.constant 64 : index
    %55 = vector.load %arg14[%c88, %c64_41] : memref<240x192xbf16, #tpu.memory_space<vmem>>, vector<8x64xbf16>
    tpu.vector_store %arg14[%c88, %c64_41], %40 {strides = array<i32>} : memref<240x192xbf16, #tpu.memory_space<vmem>>, vector<8x64xbf16>,
    %56 = vector.extract_strided_slice %39 {offsets = [48, 0], sizes = [16, 64], strides = [1, 1]} : vector<128x64xbf16> to vector<16x64xbf16>
    %c96 = arith.constant 96 : index
    %c64_42 = arith.constant 64 : index
    %57 = vector.load %arg14[%c96, %c64_42] : memref<240x192xbf16, #tpu.memory_space<vmem>>, vector<16x64xbf16>
    tpu.vector_store %arg14[%c96, %c64_42], %56 {strides = array<i32>} : memref<240x192xbf16, #tpu.memory_space<vmem>>, vector<16x64xbf16>,
    %c112 = arith.constant 112 : index
    %c64_43 = arith.constant 64 : index
    %58 = vector.load %arg14[%c112, %c64_43] : memref<240x192xbf16, #tpu.memory_space<vmem>>, vector<8x64xbf16>
    tpu.vector_store %arg14[%c112, %c64_43], %40 {strides = array<i32>} : memref<240x192xbf16, #tpu.memory_space<vmem>>, vector<8x64xbf16>,
    %59 = vector.extract_strided_slice %39 {offsets = [64, 0], sizes = [16, 64], strides = [1, 1]} : vector<128x64xbf16> to vector<16x64xbf16>
    %c120 = arith.constant 120 : index
    %c64_44 = arith.constant 64 : index
    %60 = vector.load %arg14[%c120, %c64_44] : memref<240x192xbf16, #tpu.memory_space<vmem>>, vector<16x64xbf16>
    tpu.vector_store %arg14[%c120, %c64_44], %59 {strides = array<i32>} : memref<240x192xbf16, #tpu.memory_space<vmem>>, vector<16x64xbf16>,
    %c136 = arith.constant 136 : index
    %c64_45 = arith.constant 64 : index
    %61 = vector.load %arg14[%c136, %c64_45] : memref<240x192xbf16, #tpu.memory_space<vmem>>, vector<8x64xbf16>
    tpu.vector_store %arg14[%c136, %c64_45], %40 {strides = array<i32>} : memref<240x192xbf16, #tpu.memory_space<vmem>>, vector<8x64xbf16>,
    %62 = vector.extract_strided_slice %39 {offsets = [80, 0], sizes = [16, 64], strides = [1, 1]} : vector<128x64xbf16> to vector<16x64xbf16>
    %c144 = arith.constant 144 : index
    %c64_46 = arith.constant 64 : index
    %63 = vector.load %arg14[%c144, %c64_46] : memref<240x192xbf16, #tpu.memory_space<vmem>>, vector<16x64xbf16>
    tpu.vector_store %arg14[%c144, %c64_46], %62 {strides = array<i32>} : memref<240x192xbf16, #tpu.memory_space<vmem>>, vector<16x64xbf16>,
    %c160 = arith.constant 160 : index
    %c64_47 = arith.constant 64 : index
    %64 = vector.load %arg14[%c160, %c64_47] : memref<240x192xbf16, #tpu.memory_space<vmem>>, vector<8x64xbf16>
    tpu.vector_store %arg14[%c160, %c64_47], %40 {strides = array<i32>} : memref<240x192xbf16, #tpu.memory_space<vmem>>, vector<8x64xbf16>,
    %65 = vector.extract_strided_slice %39 {offsets = [96, 0], sizes = [16, 64], strides = [1, 1]} : vector<128x64xbf16> to vector<16x64xbf16>
    %c168 = arith.constant 168 : index
    %c64_48 = arith.constant 64 : index
    %66 = vector.load %arg14[%c168, %c64_48] : memref<240x192xbf16, #tpu.memory_space<vmem>>, vector<16x64xbf16>
    tpu.vector_store %arg14[%c168, %c64_48], %65 {strides = array<i32>} : memref<240x192xbf16, #tpu.memory_space<vmem>>, vector<16x64xbf16>,
    %c184 = arith.constant 184 : index
    %c64_49 = arith.constant 64 : index
    %67 = vector.load %arg14[%c184, %c64_49] : memref<240x192xbf16, #tpu.memory_space<vmem>>, vector<8x64xbf16>
    tpu.vector_store %arg14[%c184, %c64_49], %40 {strides = array<i32>} : memref<240x192xbf16, #tpu.memory_space<vmem>>, vector<8x64xbf16>,
    %68 = vector.extract_strided_slice %39 {offsets = [112, 0], sizes = [16, 64], strides = [1, 1]} : vector<128x64xbf16> to vector<16x64xbf16>
    %c192 = arith.constant 192 : index
    %c64_50 = arith.constant 64 : index
    %69 = vector.load %arg14[%c192, %c64_50] : memref<240x192xbf16, #tpu.memory_space<vmem>>, vector<16x64xbf16>
    tpu.vector_store %arg14[%c192, %c64_50], %68 {strides = array<i32>} : memref<240x192xbf16, #tpu.memory_space<vmem>>, vector<16x64xbf16>,
    %c208 = arith.constant 208 : index
    %c64_51 = arith.constant 64 : index
    %70 = vector.load %arg14[%c208, %c64_51] : memref<240x192xbf16, #tpu.memory_space<vmem>>, vector<8x64xbf16>
    tpu.vector_store %arg14[%c208, %c64_51], %40 {strides = array<i32>} : memref<240x192xbf16, #tpu.memory_space<vmem>>, vector<8x64xbf16>,
    %71 = vector.extract_strided_slice %34 {offsets = [16, 0], sizes = [16, 64], strides = [1, 1]} : vector<32x64xf32> to vector<16x64xf32>
    %72 = vector.broadcast %38 : f32 to vector<16x64xf32>
    %73 = arith.mulf %71, %72 : vector<16x64xf32>
    %74 = arith.truncf %73 : vector<16x64xf32> to vector<16x64xbf16>
    %c216 = arith.constant 216 : index
    %c64_52 = arith.constant 64 : index
    %75 = vector.load %arg14[%c216, %c64_52] : memref<240x192xbf16, #tpu.memory_space<vmem>>, vector<16x64xbf16>
    tpu.vector_store %arg14[%c216, %c64_52], %74 {strides = array<i32>} : memref<240x192xbf16, #tpu.memory_space<vmem>>, vector<16x64xbf16>,
    %c232 = arith.constant 232 : index
    %c64_53 = arith.constant 64 : index
    %76 = vector.load %arg14[%c232, %c64_53] : memref<240x192xbf16, #tpu.memory_space<vmem>>, vector<8x64xbf16>
    tpu.vector_store %arg14[%c232, %c64_53], %40 {strides = array<i32>} : memref<240x192xbf16, #tpu.memory_space<vmem>>, vector<8x64xbf16>,
    %cst_54 = arith.constant 0.000000e+00 : bf16
    %77 = vector.broadcast %cst_54 : bf16 to vector<1x64xbf16>
    %c0_55 = arith.constant 0 : index
    %c0_56 = arith.constant 0 : index
    %78 = vector.load %arg14[%c0_55, %c0_56] : memref<240x192xbf16, #tpu.memory_space<vmem>>, vector<1x64xbf16>
    tpu.vector_store %arg14[%c0_55, %c0_56], %77 {strides = array<i32>} : memref<240x192xbf16, #tpu.memory_space<vmem>>, vector<1x64xbf16>,
    %c0_57 = arith.constant 0 : index
    %c64_58 = arith.constant 64 : index
    %79 = vector.load %arg14[%c0_57, %c64_58] : memref<240x192xbf16, #tpu.memory_space<vmem>>, vector<239x64xbf16>
    %c1 = arith.constant 1 : index
    %c0_59 = arith.constant 0 : index
    %80 = vector.load %arg14[%c1, %c0_59] : memref<240x192xbf16, #tpu.memory_space<vmem>>, vector<239x64xbf16>
    tpu.vector_store %arg14[%c1, %c0_59], %79 {strides = array<i32>} : memref<240x192xbf16, #tpu.memory_space<vmem>>, vector<239x64xbf16>,
    %c1_60 = arith.constant 1 : index
    %c64_61 = arith.constant 64 : index
    %81 = vector.load %arg14[%c1_60, %c64_61] : memref<240x192xbf16, #tpu.memory_space<vmem>>, vector<239x64xbf16>
    %c0_62 = arith.constant 0 : index
    %c128 = arith.constant 128 : index
    %82 = vector.load %arg14[%c0_62, %c128] : memref<240x192xbf16, #tpu.memory_space<vmem>>, vector<239x64xbf16>
    tpu.vector_store %arg14[%c0_62, %c128], %81 {strides = array<i32>} : memref<240x192xbf16, #tpu.memory_space<vmem>>, vector<239x64xbf16>,
    %c239 = arith.constant 239 : index
    %c128_63 = arith.constant 128 : index
    %83 = vector.load %arg14[%c239, %c128_63] : memref<240x192xbf16, #tpu.memory_space<vmem>>, vector<1x64xbf16>
    tpu.vector_store %arg14[%c239, %c128_63], %77 {strides = array<i32>} : memref<240x192xbf16, #tpu.memory_space<vmem>>, vector<1x64xbf16>,
    %c0_64 = arith.constant 0 : index
    %c0_65 = arith.constant 0 : index
    %84 = vector.load %arg14[%c0_64, %c0_65] : memref<240x192xbf16, #tpu.memory_space<vmem>>, vector<192x192xbf16>
    %c0_66 = arith.constant 0 : index
    %c0_67 = arith.constant 0 : index
    %c0_68 = arith.constant 0 : index
    %85 = vector.load %arg8[%c0_66, %c0_67, %c0_68] : memref<3x192x192xbf16, #tpu.memory_space<vmem>>, vector<1x192x192xbf16>
    %86 = vector.shape_cast %85 : vector<1x192x192xbf16> to vector<192x192xbf16>
    %cst_69 = arith.constant dense<0.000000e+00> : vector<192x192xf32>
    %87 = tpu.matmul %84, %86, %cst_69 {dimension_numbers = #tpu.dot_dimension_numbers<[1], [0], [0], [1], [0, 0, 1, 1], [], []>} : vector<192x192xbf16>, vector<192x192xbf16>, vector<192x192xf32> -> vector<192x192xf32>
    %c0_70 = arith.constant 0 : index
    %c0_71 = arith.constant 0 : index
    %88 = vector.load %arg15[%c0_70, %c0_71] : memref<192x192xf32, #tpu.memory_space<vmem>>, vector<192x192xf32>
    tpu.vector_store %arg15[%c0_70, %c0_71], %87 {strides = array<i32>} : memref<192x192xf32, #tpu.memory_space<vmem>>, vector<192x192xf32>,
    %c0_72 = arith.constant 0 : index
    %c0_73 = arith.constant 0 : index
    %89 = vector.load %arg15[%c0_72, %c0_73] : memref<192x192xf32, #tpu.memory_space<vmem>>, vector<192x192xf32>
    %c24_74 = arith.constant 24 : index
    %c0_75 = arith.constant 0 : index
    %90 = vector.load %arg14[%c24_74, %c0_75] : memref<240x192xbf16, #tpu.memory_space<vmem>>, vector<192x192xbf16>
    %c1_76 = arith.constant 1 : index
    %c0_77 = arith.constant 0 : index
    %c0_78 = arith.constant 0 : index
    %91 = vector.load %arg8[%c1_76, %c0_77, %c0_78] : memref<3x192x192xbf16, #tpu.memory_space<vmem>>, vector<1x192x192xbf16>
    %92 = vector.shape_cast %91 : vector<1x192x192xbf16> to vector<192x192xbf16>
    %cst_79 = arith.constant dense<0.000000e+00> : vector<192x192xf32>
    %93 = tpu.matmul %90, %92, %cst_79 {dimension_numbers = #tpu.dot_dimension_numbers<[1], [0], [0], [1], [0, 0, 1, 1], [], []>} : vector<192x192xbf16>, vector<192x192xbf16>, vector<192x192xf32> -> vector<192x192xf32>
    %94 = arith.addf %89, %93 : vector<192x192xf32>
    %c0_80 = arith.constant 0 : index
    %c0_81 = arith.constant 0 : index
    %95 = vector.load %arg15[%c0_80, %c0_81] : memref<192x192xf32, #tpu.memory_space<vmem>>, vector<192x192xf32>
    tpu.vector_store %arg15[%c0_80, %c0_81], %94 {strides = array<i32>} : memref<192x192xf32, #tpu.memory_space<vmem>>, vector<192x192xf32>,
    %c0_82 = arith.constant 0 : index
    %c0_83 = arith.constant 0 : index
    %96 = vector.load %arg15[%c0_82, %c0_83] : memref<192x192xf32, #tpu.memory_space<vmem>>, vector<192x192xf32>
    %c48_84 = arith.constant 48 : index
    %c0_85 = arith.constant 0 : index
    %97 = vector.load %arg14[%c48_84, %c0_85] : memref<240x192xbf16, #tpu.memory_space<vmem>>, vector<192x192xbf16>
    %c2 = arith.constant 2 : index
    %c0_86 = arith.constant 0 : index
    %c0_87 = arith.constant 0 : index
    %98 = vector.load %arg8[%c2, %c0_86, %c0_87] : memref<3x192x192xbf16, #tpu.memory_space<vmem>>, vector<1x192x192xbf16>
    %99 = vector.shape_cast %98 : vector<1x192x192xbf16> to vector<192x192xbf16>
    %cst_88 = arith.constant dense<0.000000e+00> : vector<192x192xf32>
    %100 = tpu.matmul %97, %99, %cst_88 {dimension_numbers = #tpu.dot_dimension_numbers<[1], [0], [0], [1], [0, 0, 1, 1], [], []>} : vector<192x192xbf16>, vector<192x192xbf16>, vector<192x192xf32> -> vector<192x192xf32>
    %101 = arith.addf %96, %100 : vector<192x192xf32>
    %c0_89 = arith.constant 0 : index
    %c0_90 = arith.constant 0 : index
    %102 = vector.load %arg15[%c0_89, %c0_90] : memref<192x192xf32, #tpu.memory_space<vmem>>, vector<192x192xf32>
    tpu.vector_store %arg15[%c0_89, %c0_90], %101 {strides = array<i32>} : memref<192x192xf32, #tpu.memory_space<vmem>>, vector<192x192xf32>,
    %c0_91 = arith.constant 0 : index
    %c0_92 = arith.constant 0 : index
    %103 = vector.load %arg15[%c0_91, %c0_92] : memref<192x192xf32, #tpu.memory_space<vmem>>, vector<192x192xf32>
    %c0_93 = arith.constant 0 : index
    %c0_94 = arith.constant 0 : index
    %104 = vector.load %arg9[%c0_93, %c0_94] : memref<1x192xf32, #tpu.memory_space<vmem>>, vector<1x192xf32>
    %105 = vector.broadcast %104 : vector<1x192xf32> to vector<192x192xf32>
    %106 = arith.addf %103, %105 : vector<192x192xf32>
    %cst_95 = arith.constant 0.000000e+00 : f32
    %107 = vector.broadcast %cst_95 : f32 to vector<192x192xf32>
    %108 = arith.maximumf %106, %107 : vector<192x192xf32>
    %109 = arith.truncf %108 : vector<192x192xf32> to vector<192x192xbf16>
    %c0_96 = arith.constant 0 : index
    %c0_97 = arith.constant 0 : index
    %110 = vector.load %arg14[%c0_96, %c0_97] : memref<240x192xbf16, #tpu.memory_space<vmem>>, vector<192x192xbf16>
    tpu.vector_store %arg14[%c0_96, %c0_97], %109 {strides = array<i32>} : memref<240x192xbf16, #tpu.memory_space<vmem>>, vector<192x192xbf16>,
    %c0_98 = arith.constant 0 : index
    %c0_99 = arith.constant 0 : index
    %111 = vector.load %arg14[%c0_98, %c0_99] : memref<240x192xbf16, #tpu.memory_space<vmem>>, vector<192x192xbf16>
    %c0_100 = arith.constant 0 : index
    %c0_101 = arith.constant 0 : index
    %112 = vector.load %arg10[%c0_100, %c0_101] : memref<192x128xbf16, #tpu.memory_space<vmem>>, vector<192x128xbf16>
    %cst_102 = arith.constant dense<0.000000e+00> : vector<192x128xf32>
    %113 = tpu.matmul %111, %112, %cst_102 {dimension_numbers = #tpu.dot_dimension_numbers<[1], [0], [0], [1], [0, 0, 1, 1], [], []>} : vector<192x192xbf16>, vector<192x128xbf16>, vector<192x128xf32> -> vector<192x128xf32>
    %c0_103 = arith.constant 0 : index
    %c0_104 = arith.constant 0 : index
    %114 = vector.load %arg11[%c0_103, %c0_104] : memref<1x128xf32, #tpu.memory_space<vmem>>, vector<1x128xf32>
    %115 = vector.broadcast %114 : vector<1x128xf32> to vector<192x128xf32>
    %116 = arith.addf %113, %115 : vector<192x128xf32>
    %117 = vector.extract_strided_slice %116 {offsets = [0, 0], sizes = [16, 128], strides = [1, 1]} : vector<192x128xf32> to vector<16x128xf32>
    %c0_105 = arith.constant 0 : index
    %c0_106 = arith.constant 0 : index
    %c0_107 = arith.constant 0 : index
    %118 = vector.load %arg13[%c0_105, %c0_106, %c0_107] : memref<1x128x128xf32, #tpu.memory_space<vmem>>, vector<1x16x128xf32>
    %119 = vector.shape_cast %118 : vector<1x16x128xf32> to vector<16x128xf32>
    %120 = vector.shape_cast %117 : vector<16x128xf32> to vector<1x16x128xf32>
    tpu.vector_store %arg13[%c0_105, %c0_106, %c0_107], %120 {strides = array<i32>} : memref<1x128x128xf32, #tpu.memory_space<vmem>>, vector<1x16x128xf32>,
    %121 = vector.extract_strided_slice %116 {offsets = [24, 0], sizes = [16, 128], strides = [1, 1]} : vector<192x128xf32> to vector<16x128xf32>
    %c0_108 = arith.constant 0 : index
    %c16_109 = arith.constant 16 : index
    %c0_110 = arith.constant 0 : index
    %122 = vector.load %arg13[%c0_108, %c16_109, %c0_110] : memref<1x128x128xf32, #tpu.memory_space<vmem>>, vector<1x16x128xf32>
    %123 = vector.shape_cast %122 : vector<1x16x128xf32> to vector<16x128xf32>
    %124 = vector.shape_cast %121 : vector<16x128xf32> to vector<1x16x128xf32>
    tpu.vector_store %arg13[%c0_108, %c16_109, %c0_110], %124 {strides = array<i32>} : memref<1x128x128xf32, #tpu.memory_space<vmem>>, vector<1x16x128xf32>,
    %125 = vector.extract_strided_slice %116 {offsets = [48, 0], sizes = [16, 128], strides = [1, 1]} : vector<192x128xf32> to vector<16x128xf32>
    %c0_111 = arith.constant 0 : index
    %c32 = arith.constant 32 : index
    %c0_112 = arith.constant 0 : index
    %126 = vector.load %arg13[%c0_111, %c32, %c0_112] : memref<1x128x128xf32, #tpu.memory_space<vmem>>, vector<1x16x128xf32>
    %127 = vector.shape_cast %126 : vector<1x16x128xf32> to vector<16x128xf32>
    %128 = vector.shape_cast %125 : vector<16x128xf32> to vector<1x16x128xf32>
    tpu.vector_store %arg13[%c0_111, %c32, %c0_112], %128 {strides = array<i32>} : memref<1x128x128xf32, #tpu.memory_space<vmem>>, vector<1x16x128xf32>,
    %129 = vector.extract_strided_slice %116 {offsets = [72, 0], sizes = [16, 128], strides = [1, 1]} : vector<192x128xf32> to vector<16x128xf32>
    %c0_113 = arith.constant 0 : index
    %c48_114 = arith.constant 48 : index
    %c0_115 = arith.constant 0 : index
    %130 = vector.load %arg13[%c0_113, %c48_114, %c0_115] : memref<1x128x128xf32, #tpu.memory_space<vmem>>, vector<1x16x128xf32>
    %131 = vector.shape_cast %130 : vector<1x16x128xf32> to vector<16x128xf32>
    %132 = vector.shape_cast %129 : vector<16x128xf32> to vector<1x16x128xf32>
    tpu.vector_store %arg13[%c0_113, %c48_114, %c0_115], %132 {strides = array<i32>} : memref<1x128x128xf32, #tpu.memory_space<vmem>>, vector<1x16x128xf32>,
    %133 = vector.extract_strided_slice %116 {offsets = [96, 0], sizes = [16, 128], strides = [1, 1]} : vector<192x128xf32> to vector<16x128xf32>
    %c0_116 = arith.constant 0 : index
    %c64_117 = arith.constant 64 : index
    %c0_118 = arith.constant 0 : index
    %134 = vector.load %arg13[%c0_116, %c64_117, %c0_118] : memref<1x128x128xf32, #tpu.memory_space<vmem>>, vector<1x16x128xf32>
    %135 = vector.shape_cast %134 : vector<1x16x128xf32> to vector<16x128xf32>
    %136 = vector.shape_cast %133 : vector<16x128xf32> to vector<1x16x128xf32>
    tpu.vector_store %arg13[%c0_116, %c64_117, %c0_118], %136 {strides = array<i32>} : memref<1x128x128xf32, #tpu.memory_space<vmem>>, vector<1x16x128xf32>,
    %137 = vector.extract_strided_slice %116 {offsets = [120, 0], sizes = [16, 128], strides = [1, 1]} : vector<192x128xf32> to vector<16x128xf32>
    %c0_119 = arith.constant 0 : index
    %c80 = arith.constant 80 : index
    %c0_120 = arith.constant 0 : index
    %138 = vector.load %arg13[%c0_119, %c80, %c0_120] : memref<1x128x128xf32, #tpu.memory_space<vmem>>, vector<1x16x128xf32>
    %139 = vector.shape_cast %138 : vector<1x16x128xf32> to vector<16x128xf32>
    %140 = vector.shape_cast %137 : vector<16x128xf32> to vector<1x16x128xf32>
    tpu.vector_store %arg13[%c0_119, %c80, %c0_120], %140 {strides = array<i32>} : memref<1x128x128xf32, #tpu.memory_space<vmem>>, vector<1x16x128xf32>,
    %141 = vector.extract_strided_slice %116 {offsets = [144, 0], sizes = [16, 128], strides = [1, 1]} : vector<192x128xf32> to vector<16x128xf32>
    %c0_121 = arith.constant 0 : index
    %c96_122 = arith.constant 96 : index
    %c0_123 = arith.constant 0 : index
    %142 = vector.load %arg13[%c0_121, %c96_122, %c0_123] : memref<1x128x128xf32, #tpu.memory_space<vmem>>, vector<1x16x128xf32>
    %143 = vector.shape_cast %142 : vector<1x16x128xf32> to vector<16x128xf32>
    %144 = vector.shape_cast %141 : vector<16x128xf32> to vector<1x16x128xf32>
    tpu.vector_store %arg13[%c0_121, %c96_122, %c0_123], %144 {strides = array<i32>} : memref<1x128x128xf32, #tpu.memory_space<vmem>>, vector<1x16x128xf32>,
    %145 = vector.extract_strided_slice %116 {offsets = [168, 0], sizes = [16, 128], strides = [1, 1]} : vector<192x128xf32> to vector<16x128xf32>
    %c0_124 = arith.constant 0 : index
    %c112_125 = arith.constant 112 : index
    %c0_126 = arith.constant 0 : index
    %146 = vector.load %arg13[%c0_124, %c112_125, %c0_126] : memref<1x128x128xf32, #tpu.memory_space<vmem>>, vector<1x16x128xf32>
    %147 = vector.shape_cast %146 : vector<1x16x128xf32> to vector<16x128xf32>
    %148 = vector.shape_cast %145 : vector<16x128xf32> to vector<1x16x128xf32>
    tpu.vector_store %arg13[%c0_124, %c112_125, %c0_126], %148 {strides = array<i32>} : memref<1x128x128xf32, #tpu.memory_space<vmem>>, vector<1x16x128xf32>,
    return
  }
  func.func @transform_0(%arg0: i32, %arg1: i32) -> (i32, i32, i32) {
    %c0_i32 = arith.constant 0 : i32
    %c0_i32_0 = arith.constant 0 : i32
    return %arg0, %arg1, %c0_i32 : i32, i32, i32
  }
  func.func @transform_1(%arg0: i32, %arg1: i32) -> (i32, i32, i32, i32) {
    %c0_i32 = arith.constant 0 : i32
    %c0_i32_0 = arith.constant 0 : i32
    %c0_i32_1 = arith.constant 0 : i32
    return %arg0, %arg1, %c0_i32, %c0_i32_0 : i32, i32, i32, i32
  }
  func.func @transform_2(%arg0: i32, %arg1: i32) -> (i32, i32) {
    %c0_i32 = arith.constant 0 : i32
    %c0_i32_0 = arith.constant 0 : i32
    %c0_i32_1 = arith.constant 0 : i32
    return %c0_i32, %c0_i32_0 : i32, i32
  }
  func.func @transform_3(%arg0: i32, %arg1: i32) -> (i32, i32) {
    %c0_i32 = arith.constant 0 : i32
    %c0_i32_0 = arith.constant 0 : i32
    %c0_i32_1 = arith.constant 0 : i32
    return %c0_i32, %c0_i32_0 : i32, i32
  }
  func.func @transform_4(%arg0: i32, %arg1: i32) -> (i32, i32) {
    %c0_i32 = arith.constant 0 : i32
    %c0_i32_0 = arith.constant 0 : i32
    %c0_i32_1 = arith.constant 0 : i32
    return %c0_i32, %c0_i32_0 : i32, i32
  }
  func.func @transform_5(%arg0: i32, %arg1: i32) -> (i32, i32) {
    %c0_i32 = arith.constant 0 : i32
    %c0_i32_0 = arith.constant 0 : i32
    %c0_i32_1 = arith.constant 0 : i32
    return %c0_i32, %c0_i32_0 : i32, i32
  }
  func.func @transform_6(%arg0: i32, %arg1: i32) -> (i32, i32, i32) {
    %c0_i32 = arith.constant 0 : i32
    %c0_i32_0 = arith.constant 0 : i32
    %c0_i32_1 = arith.constant 0 : i32
    %c0_i32_2 = arith.constant 0 : i32
    return %c0_i32, %c0_i32_0, %c0_i32_1 : i32, i32, i32
  }
  func.func @transform_7(%arg0: i32, %arg1: i32) -> (i32, i32) {
    %c0_i32 = arith.constant 0 : i32
    %c0_i32_0 = arith.constant 0 : i32
    %c0_i32_1 = arith.constant 0 : i32
    return %c0_i32, %c0_i32_0 : i32, i32
  }
  func.func @transform_8(%arg0: i32, %arg1: i32) -> (i32, i32) {
    %c0_i32 = arith.constant 0 : i32
    %c0_i32_0 = arith.constant 0 : i32
    %c0_i32_1 = arith.constant 0 : i32
    return %c0_i32, %c0_i32_0 : i32, i32
  }
  func.func @transform_9(%arg0: i32, %arg1: i32) -> (i32, i32) {
    %c0_i32 = arith.constant 0 : i32
    %c0_i32_0 = arith.constant 0 : i32
    %c0_i32_1 = arith.constant 0 : i32
    return %c0_i32, %c0_i32_0 : i32, i32
  }
  func.func @transform_10(%arg0: i32, %arg1: i32) -> (i32, i32, i32) {
    %c0_i32 = arith.constant 0 : i32
    %c0_i32_0 = arith.constant 0 : i32
    return %arg0, %arg1, %c0_i32 : i32, i32, i32
  }
  func.func @transform_11(%arg0: i32, %arg1: i32) -> (i32, i32, i32) {
    %c0_i32 = arith.constant 0 : i32
    %c0_i32_0 = arith.constant 0 : i32
    return %arg0, %arg1, %c0_i32 : i32, i32, i32
  }
}

</mosaic_0001>

<bundles_post_ra>
// kernel: cs_layer_nyu_forward.1
= control target key start
LH: loop header
LB: loop body
LE: loop exit
PB: predicated region body
PF: predicated region fallthrough
CT: control target
= control target key end

     0   :  { %s5634_s0 = inlined_call_operand.vmem [shape: bf16[2,256,24], index: 0, kind: input, shape index: {}]   ;;  %s5635_s1 = inlined_call_operand.vmem [shape: bf16[2,2,32,24], index: 1, kind: input, shape index: {}]   ;;  %s5636_s2 = inlined_call_operand.vmem [shape: bf16[24,8], index: 2, kind: input, shape index: {}]   ;;  %s5637_s3 = inlined_call_operand.vmem [shape: f32[1,8], index: 3, kind: input, shape index: {}]   ;;  %s5638_s4 = inlined_call_operand.vmem [shape: bf16[8,64], index: 4, kind: input, shape index: {}]   ;;  %s5639_s5 = inlined_call_operand.vmem [shape: f32[1,64], index: 5, kind: input, shape index: {}]   ;;  %s5640_s6 = inlined_call_operand.vmem [shape: bf16[3,192,192], index: 6, kind: input, shape index: {}]   ;;  %s5641_s7 = inlined_call_operand.vmem [shape: f32[1,192], index: 7, kind: input, shape index: {}]   ;;  %s5642_s8 = inlined_call_operand.vmem [shape: bf16[192,128], index: 8, kind: input, shape index: {}]   ;;  %s5643_s9 = inlined_call_operand.vmem [shape: f32[1,128], index: 9, kind: input, shape index: {}]   ;;  %s5644_s10 = inlined_call_operand.hbm [shape: f32[2,256,64], index: 10, kind: output, shape index: {0}]   ;;  %s5645_s11 = inlined_call_operand.vmem [shape: f32[2,256,128], index: 11, kind: output, shape index: {1}]  }
   0x1   :  { %5651 = sst [smem:[#allocation11_spill]] %s5634_s0 }
   0x2   :  { %5652 = sst [smem:[#allocation12_spill]] %s5636_s2 }
   0x3   :  { %5653 = sst [smem:[#allocation13_spill]] %s5638_s4 }
   0x4   :  { %17 = vsyncpa [#allocation5], 0 }
   0x5   :  { %19 = vsyncpa [#allocation5 + $0x1], 0  ;;  %s4376_s17 = smov 0   ;;  %s4378_s18 = smov 0  }
   0x6   :  { %s4380_s19 = smov 0   ;;  %s4382_s20 = smov 0  }
   0x7   :  { %s4384_s21 = smov 0   ;;  %s4386_s22 = smov 0  }
   0x8   :  { %s4388_s23 = smov 0   ;;  %s4390_s24 = smov 0  }
   0x9 LB: > { %5654 = sst [smem:[#allocation7_spill]] %s4301_s22  ;;  %s3688_s25 = sadd.s32 4294967295, %s4309_s24   ;;  %s4309_s24 = sphi %s4390_s24, %s25_s24   ;;  %s4305_s23 = sphi %s4388_s23, %s5671_s23   ;;  %s4301_s22 = sphi %s4386_s22, %s5670_s22   ;;  %s4297_s21 = sphi %s4384_s21, %s5669_s21   ;;  %s4293_s20 = sphi %s4382_s20, %s5668_s20   ;;  %s4289_s19 = sphi %s4380_s19, %s5674_s19   ;;  %s4285_s18 = sphi %s4378_s18, %s5673_s18   ;;  %s4281_s17 = sphi %s4376_s17, %s5672_s17  }
   0xa   : > { %5655 = sst [smem:[#allocation8_spill]] %s4305_s23  ;;  %s3689_s26 = sadd.s32 4294967294, %s4309_s24  }
   0xb   : > { %s34_s27 = sadd.s32 1, %s4301_s22  ;;  %s37_s28 = sadd.s32 1, %s4305_s23 }
   0xc   : > { %p35_p0 = scmp.ge.s32.totalorder %s34_s27, 2  ;;  %p280_p1 = scmp.ne.s32.totalorder %s4289_s19, %s4285_s18 }
   0xd   : > { %p281_p2 = scmp.eq.s32.totalorder %s3688_s25, 3  ;;  %p286_p5 = scmp.ne.s32.totalorder %s4285_s18, %s4281_s17 }
   0xe   : > { %s5676_s27 = smov (%p35_p0, %s34_s27), 0  ;;  %s5678_s28 = smov (!%p35_p0, %s37_s28), %s4305_s23 }
   0xf   : > { %5656 = sst [smem:[#allocation9_spill]] %s5676_s27  ;;  %s266_s29 = ssub.s32 %s4301_s22, %s5676_s27 }
  0x10   : > { %p4427_p3 = por %p281_p2, %p280_p1  ;;  %p39_p4 = scmp.ge.s32.totalorder %s5678_s28, 2 }
  0x11   : > { %p287_p6 = scmp.eq.s32.totalorder %s3689_s26, 3  ;;  %p3692_p7 = scmp.ge.s32.totalorder %s4309_s24, 1 }
  0x12   : > { %s5680_s28 = smov (%p39_p4, %s5678_s28), 0  ;;  %p382_p9 = scmp.lt.s32.totalorder %s4309_s24, 5 }
  0x13   : > { %5658 = sst [smem:[#allocation10_spill]] %s5680_s28  ;;  %p4436_p8 = por %p287_p6, %p286_p5 }
  0x14   : > { %s265_s13 = ssub.s32 %s4305_s23, %s5680_s28  ;;  %s270_s14 = sadd.s32 1, %s4289_s19 }
  0x15   : > { %s267_s15 = sor.u32 %s266_s29, %s265_s13  ;;  %p383_p10 = pnand %p3692_p7, %p382_p9 }
  0x16   : > { %p268_p11 = scmp.eq.s32.totalorder %s267_s15, 0  ;;  %s5660_s2 = sld [smem:[#allocation12_spill]] (!%p383_p10)  ;;  %vm576_vm0 = vcmask (!%p383_p10), 1043456   ;;  %vm551_vm1 = vcmask (!%p383_p10), 195584   ;;  %v4510_v13 = vld [vmem:[%s5637_s3] ss:$0 sm:$0xff] (!%p383_p10) }
  0x17   : > { %386 = sbr.rel (%p383_p10) target bundleno = 1877 (0x755), region = 60  ;;  %s4458_s29 = sshll.u32 (!%p383_p10), %s4293_s20, 4  ;;  %vm708_vm2 = vcmask (!%p383_p10), 64512   ;;  %vm849_vm3 = vcmask (!%p383_p10), 523264   ;;  %vm1036_vm4 = vcmask (!%p383_p10), 1043968   ;;  %vm1043_vm5 = vcmask (!%p383_p10), 1048068  }
  0x18   : > { %s4445_s16 = scalar_select %p268_p11, %s4289_s19, %s270_s14  }
  0x19   : > { %p445_p12 = scmp.lt.s32.totalorder (!%p383_p10), %s4297_s21, 1  ;;  %p447_p13 = scmp.lt.s32.totalorder (!%p383_p10), %s4458_s29, 31  ;;  %vm1034_vm6 = vcmask (!%p383_p10), 1048064   ;;  %vm1107_vm7 = vcmask (!%p383_p10), 516096   ;;  %vm1108_vm8 = vsmask.f32 (!%p383_p10), 256 }
  0x1a   : > { %s5661_s0 = sld [smem:[#allocation11_spill]] (!%p383_p10)  ;;  %s5662_s4 = sld [smem:[#allocation13_spill]] (!%p383_p10)  ;;  %vm1109_vm9 = vmand (!%p383_p10), %vm1107_vm7, %vm1108_vm8  ;;  %vm1293_vm10 = vsmask.f32 (!%p383_p10), 7938  ;;  %vm1326_vm12 = vsmask.f32 (!%p383_p10), 7424 }
  0x1b   : > { %p456_p0 = scmp.lt.s32.totalorder (!%p383_p10), %s4293_s20, 1  ;;  %p1014_p1 = scmp.gt.s32.totalorder (!%p383_p10), %s4293_s20, 0  ;;  %vm1294_vm11 = vmand (!%p383_p10), %vm849_vm3, %vm1293_vm10  ;;  %vm1509_vm14 = vcmask (!%p383_p10), 523271   ;;  %vm1510_vm15 = vsmask.f32 (!%p383_p10), 7966 }
  0x1c   : > { %v4450_v0 = vld [vmem:[%s5660_s2] sm:$0xff] (!%p383_p10)   ;;  %v4455_v1 = vld [vmem:[%s5660_s2 + $0x8] ss:$0 sps:$4 sm:$0xff] (!%p383_p10)   ;;  %vm5285_vm13 = vmand (!%p383_p10), %vm849_vm3, %vm1326_vm12 }
  0x1d   : > { %3952 = vmatprep.subr.bf16.mxu0 (!%p383_p10), %v4450_v0  ;;  %v4471_v2 = vsel (!%p383_p10), %vm576_vm0, %v4455_v1, 0 }
  0x1e   : > { %3953 = vmatpush3.bf16.msra.mxu0 %v4450_v0  ;;  %s4465_s27 = scalar_select %p445_p12, %s4297_s21, 1 }
  0x1f   : > { %4004 = vmatprep.subr.msk.bf16.mxu0 %vm576_vm0, %v4455_v1  ;;  %s448_s22 = scalar_select %p447_p13, %s4458_s29, 31 }
  0x20   : > { %s3695_s13 = sshll.u32 %s4465_s27, 5  ;;  %v478_v11 = vld [vmem:[%s5662_s4] sm:$0xf] }
  0x21   : > { %s4475_s14 = sadd.s32 %s3695_s13, %s448_s22  ;;  %4005 = vmatprep.subr.msk.bf16.mxu1 %vm576_vm0, %v478_v11  ;;  %v734_v12 = vsel %vm576_vm0, %v478_v11, 0 }
  0x22   : > { %3955 = vmatpush3.bf16.msra.mxu0 %v4471_v2  ;;  %s3696_s15 = sshll.u32 %s4475_s14, 2  ;;  %3973 = vmatpush3.bf16.msra.mxu1 %v734_v12 }
  0x23   : > { %s452_s2 = scalar_lea.vmem %s5661_s0, %s3696_s15  ;;  %4007 = vmatprep.subr.msk.bf16.mxu0 %vm576_vm0, %v478_v11  ;;  %3990 = vmatprep.subr.bf16.mxu1 %v4450_v0 }
  0x24   : > { %v4085_v3 = vld [vmem:[%s452_s2] sm:$0xff]   ;;  %v4086_v4 = vld [vmem:[%s452_s2 + $0x8] sm:$0xff]   ;;  %v4087_v5 = vld [vmem:[%s452_s2 + $0x10] sm:$0xff]   ;;  %s457_s15 = scalar_select %p456_p0, %s4293_s20, 1 }
  0x25   : > { %3956 = vmatprep.mubr.msk.bf16.mxu0 %vm551_vm1, %v4085_v3  ;;  %v4088_v6 = vld [vmem:[%s452_s2 + $0x18] sm:$0xff]   ;;  %v4089_v7 = vld [vmem:[%s452_s2 + $0x20] sm:$0xff]   ;;  %v4090_v8 = vld [vmem:[%s452_s2 + $0x28] sm:$0xff]  }
  0x26   : > { %3957 = vmatmul.mubr.msk.bf16.vlgmr.msra.gmra.mrb[0].mxu0 %vm551_vm1, %v4086_v4  ;;  %v4091_v9 = vld [vmem:[%s452_s2 + $0x30] sm:$0xff]   ;;  %v4092_v10 = vld [vmem:[%s452_s2 + $0x38] sm:$0xff]   ;;  %s3698_s2 = sshll.u32 %s4465_s27, 3  ;;  %s3697_s25 = sshll.u32 %s457_s15, 2 }
  0x27   : > { %3960 = vmatprep.mubr.msk.bf16.mxu0 %vm551_vm1, %v4087_v5  ;;  %3999 = vmatpush3.bf16.msra.mxu0 %v734_v12  ;;  %s460_s26 = sadd.s32 %s3698_s2, %s3697_s25  ;;  %s4312_s15 = smov 64  }
  0x28   : > { %s3699_s0 = sshll.u32 %s460_s26, 2 }
  0x29   : > { %s4505_s13 = scalar_lea.vmem %s5635_s1, %s3699_s0  ;;  %s5650_s0 = sand.u32 1, %s4285_s18  }
  0x2a   : > { %s3693_s28 = sshll.u32 %s5650_s0, 7 }
  0x2b   : > { %s4556_s27 = scalar_lea.vmem [#allocation4], %s3693_s28 }
  0x2c   : > { %s1017_s2 = scalar_select %p456_p0, 1.0, 0.0 }
  0x2d   : > { %s1015_s25 = scalar_select %p1014_p1, 1.0, 0.0 }
  0x2e   : > { %3961 = vmatmul.mubr.msk.bf16.gmra.mrb[4].mxu0 %vm551_vm1, %v4088_v6  ;;  %v4093_v6 = vld [vmem:[%s4505_s13] sm:$0xff]  }
  0x2f   : > { %3964 = vmatprep.mubr.msk.bf16.mxu0 %vm551_vm1, %v4089_v7  ;;  %v4094_v7 = vld [vmem:[%s4505_s13 + $0x8] sm:$0xff]  }
  0x36   : > { %3965 = vmatmul.mubr.msk.bf16.gmra.mrb[8].mxu0 %vm551_vm1, %v4090_v8  ;;  %v4548_v8 = vld [vmem:[%s5639_s5] ss:$0 sm:$0xff] }
  0x37   : > { %3968 = vmatprep.mubr.msk.bf16.mxu0 %vm551_vm1, %v4091_v9 }
  0x3e   : > { %3969 = vmatmul.mubr.msk.bf16.gmra.mrb[12].mxu0 %vm551_vm1, %v4092_v10 }
  0xf9   : > { %v3958_v14 = vpop.f32.mrb[0].mxu0 }
  0xfa   : > { %v623_v15 = vadd.f32 %v3958_v14, %v4510_v13  ;;  %v614_v16 = vpop.f32.mrb[1].mxu0 }
  0xfb   : > { %v615_v17 = vadd.f32 %v4510_v13, %v614_v16  ;;  %v3959_v18 = vpop.f32.mrb[2].mxu0 }
  0xfc   : > { %v626_v19 = vadd.f32 %v3959_v18, %v4510_v13  ;;  %v617_v20 = vpop.f32.mrb[3].mxu0  ;;  %v679_v22 = vmax.f32 %v623_v15, 0.0 }
  0xfd   : > { %v618_v21 = vadd.f32 %v4510_v13, %v617_v20  ;;  %v677_v24 = vmax.f32 %v615_v17, 0.0 }
  0xfe   : > { %v680_v23 = vmax.f32 %v626_v19, 0.0 }
  0xff   : > { %v678_v25 = vmax.f32 %v618_v21, 0.0 }
 0x100   : > { %v694_v26 = vpack.c.bf16 %v680_v23, %v679_v22  ;;  %v4311_v23 = vmov 0  }
 0x101   : > { %v3962_v27 = vpop.f32.mrb[4].mxu0  ;;  %v693_v28 = vpack.c.bf16 %v678_v25, %v677_v24  ;;  %1037 = vst.msk [vmem:[#allocation2 + $0x10] sm:$0xf] %vm1036_vm4, %v4311_v23  ;;  %1052 = vst.msk [vmem:[#allocation2 + $0x40] sm:$0xf] %vm1036_vm4, %v4311_v23 }
 0x102   : > { %v639_v29 = vadd.f32 %v3962_v27, %v4510_v13  ;;  %v630_v30 = vpop.f32.mrb[5].mxu0  ;;  %1046 = vst.msk [vmem:[#allocation2 + $0x20] sm:$0xf0] %vm1043_vm5, %v4311_v23  ;;  %1060 = vst.msk [vmem:[#allocation2 + $0x50] sm:$0xf0] %vm1043_vm5, %v4311_v23 }
 0x103   : > { %v631_v31 = vadd.f32 %v4510_v13, %v630_v30  ;;  %v3963_v32 = vpop.f32.mrb[6].mxu0  ;;  %3974 = vmatprep.mubr.msk.bf16.mxu1 %vm708_vm2, %v693_v28  ;;  %1066 = vst.msk [vmem:[#allocation2 + $0x70] sm:$0xf] %vm1036_vm4, %v4311_v23  ;;  %1080 = vst.msk [vmem:[#allocation2 + $0xa0] sm:$0xf] %vm1036_vm4, %v4311_v23 }
 0x104   : > { %v642_v33 = vadd.f32 %v3963_v32, %v4510_v13  ;;  %v633_v34 = vpop.f32.mrb[7].mxu0  ;;  %3975 = vmatmul.mubr.msk.bf16.vlgmr.msra.gmra.mrb[0].mxu1 %vm708_vm2, %v694_v26  ;;  %v683_v36 = vmax.f32 %v639_v29, 0.0  ;;  %1074 = vst.msk [vmem:[#allocation2 + $0x80] sm:$0xf0] %vm1043_vm5, %v4311_v23  ;;  %1088 = vst.msk [vmem:[#allocation2 + $0xb0] sm:$0xf0] %vm1043_vm5, %v4311_v23 }
 0x105   : > { %v634_v35 = vadd.f32 %v4510_v13, %v633_v34  ;;  %3991 = vmatpush3.bf16.msra.mxu1 %v4450_v0  ;;  %v681_v38 = vmax.f32 %v631_v31, 0.0  ;;  %1094 = vst.msk [vmem:[#allocation2 + $0xd0] sm:$0xf] %vm1036_vm4, %v4311_v23 }
 0x106   : > { %v684_v37 = vmax.f32 %v642_v33, 0.0  ;;  %4006 = vmatprep.subr.msk.bf16.mxu1 %vm576_vm0, %v4455_v1  ;;  %1106 = vst.msk [vmem:[#allocation2 + $0xe0] sm:$0xf0] %vm1043_vm5, %v4311_v23 }
 0x107   : > { %v682_v39 = vmax.f32 %v634_v35, 0.0 }
 0x108   : > { %v696_v40 = vpack.c.bf16 %v684_v37, %v683_v36 }
 0x109   : > { %v695_v41 = vpack.c.bf16 %v682_v39, %v681_v38  ;;  %v3966_v42 = vpop.f32.mrb[8].mxu0  ;;  %3993 = vmatpush3.bf16.msra.mxu1 %v4471_v2 }
 0x10a   : > { %v655_v43 = vadd.f32 %v3966_v42, %v4510_v13  ;;  %v646_v44 = vpop.f32.mrb[9].mxu0 }
 0x10b   : > { %v647_v45 = vadd.f32 %v4510_v13, %v646_v44  ;;  %v3967_v46 = vpop.f32.mrb[10].mxu0  ;;  %3978 = vmatprep.mubr.msk.bf16.mxu1 %vm708_vm2, %v695_v41 }
 0x10c   : > { %v658_v47 = vadd.f32 %v3967_v46, %v4510_v13  ;;  %v649_v48 = vpop.f32.mrb[11].mxu0  ;;  %3979 = vmatmul.mubr.msk.bf16.gmra.mrb[4].mxu1 %vm708_vm2, %v696_v40  ;;  %v687_v50 = vmax.f32 %v655_v43, 0.0 }
 0x10d   : > { %v650_v49 = vadd.f32 %v4510_v13, %v649_v48  ;;  %v685_v52 = vmax.f32 %v647_v45, 0.0 }
 0x10e   : > { %v688_v51 = vmax.f32 %v658_v47, 0.0 }
 0x10f   : > { %v686_v53 = vmax.f32 %v650_v49, 0.0 }
 0x110   : > { %v698_v54 = vpack.c.bf16 %v688_v51, %v687_v50 }
 0x111   : > { %v697_v55 = vpack.c.bf16 %v686_v53, %v685_v52  ;;  %v3970_v56 = vpop.f32.mrb[12].mxu0 }
 0x112   : > { %v671_v57 = vadd.f32 %v3970_v56, %v4510_v13  ;;  %v662_v58 = vpop.f32.mrb[13].mxu0 }
 0x113   : > { %v663_v59 = vadd.f32 %v4510_v13, %v662_v58  ;;  %v3971_v60 = vpop.f32.mrb[14].mxu0  ;;  %3982 = vmatprep.mubr.msk.bf16.mxu1 %vm708_vm2, %v697_v55 }
 0x114   : > { %v674_v61 = vadd.f32 %v3971_v60, %v4510_v13  ;;  %v665_v62 = vpop.f32.mrb[15].mxu0  ;;  %3983 = vmatmul.mubr.msk.bf16.gmra.mrb[8].mxu1 %vm708_vm2, %v698_v54  ;;  %v691_v0 = vmax.f32 %v671_v57, 0.0 }
 0x115   : > { %v666_v63 = vadd.f32 %v4510_v13, %v665_v62  ;;  %v689_v2 = vmax.f32 %v663_v59, 0.0 }
 0x116   : > { %v692_v1 = vmax.f32 %v674_v61, 0.0 }
 0x117   : > { %v690_v3 = vmax.f32 %v666_v63, 0.0 }
 0x118   : > { %v700_v4 = vpack.c.bf16 %v692_v1, %v691_v0 }
 0x119   : > { %v699_v5 = vpack.c.bf16 %v690_v3, %v689_v2 }
 0x11b   : > { %3986 = vmatprep.mubr.msk.bf16.mxu1 %vm708_vm2, %v699_v5 }
 0x11c   : > { %3987 = vmatmul.mubr.msk.bf16.gmra.mrb[12].mxu1 %vm708_vm2, %v700_v4 }
 0x11d   : > { %3994 = vmatprep.mubr.msk.bf16.mxu1 %vm551_vm1, %v4093_v6 }
 0x124   : > { %3995 = vmatmul.mubr.msk.bf16.vlgmr.msra.gmra.mrb[16].mxu1 %vm551_vm1, %v4094_v7  ;;  %vm5302_vm1 = vmand %vm1509_vm14, %vm1510_vm15 }
 0x1d7   : > { %v3976_v9 = vpop.f32.mrb[0].mxu1 }
 0x1d8   : > { %v779_v10 = vadd.f32 %v3976_v9, %v4548_v8  ;;  %v770_v11 = vpop.f32.mrb[1].mxu1 }
 0x1d9   : > { %v771_v12 = vadd.f32 %v4548_v8, %v770_v11  ;;  %v3977_v14 = vpop.f32.mrb[2].mxu1 }
 0x1da   : > { %v835_v15 = vmax.f32 %v779_v10, 0.0  ;;  %v782_v16 = vadd.f32 %v3977_v14, %v4548_v8  ;;  %v773_v17 = vpop.f32.mrb[3].mxu1 }
 0x1db   : > { %v833_v18 = vmax.f32 %v771_v12, 0.0  ;;  %v774_v19 = vadd.f32 %v4548_v8, %v773_v17 }
 0x1dc   : > { %852 = vst.msk [vmem:[%s4556_s27 + $0x10] sm:$0xff] %vm849_vm3, %v835_v15  ;;  %v836_v20 = vmax.f32 %v782_v16, 0.0 }
 0x1dd   : > { %850 = vst.msk [vmem:[%s4556_s27] sm:$0xff] %vm849_vm3, %v833_v18  ;;  %v834_v21 = vmax.f32 %v774_v19, 0.0 }
 0x1de   : > { %853 = vst.msk [vmem:[%s4556_s27 + $0x18] sm:$0xff] %vm849_vm3, %v836_v20  ;;  %v1019_v22 = vpack.c.bf16 %v836_v20, %v835_v15 }
 0x1df   : > { %851 = vst.msk [vmem:[%s4556_s27 + $0x8] sm:$0xff] %vm849_vm3, %v834_v21  ;;  %v4586_v24 = vpack.c.bf16 %v834_v21, %v833_v18  ;;  %v3980_v25 = vpop.f32.mrb[4].mxu1 }
 0x1e0   : > { %v795_v26 = vadd.f32 %v3980_v25, %v4548_v8  ;;  %1048 = vrot.lane.b32.xlu1 %v1019_v22, %s4312_s15  ;;  %v786_v27 = vpop.f32.mrb[5].mxu1 }
 0x1e1   : > { %v787_v28 = vadd.f32 %v4548_v8, %v786_v27  ;;  %v3981_v29 = vpop.f32.mrb[6].mxu1 }
 0x1e2   : > { %v839_v30 = vmax.f32 %v795_v26, 0.0  ;;  %v798_v31 = vadd.f32 %v3981_v29, %v4548_v8  ;;  %v789_v32 = vpop.f32.mrb[7].mxu1 }
 0x1e3   : > { %v837_v33 = vmax.f32 %v787_v28, 0.0  ;;  %v790_v34 = vadd.f32 %v4548_v8, %v789_v32 }
 0x1e4   : > { %856 = vst.msk [vmem:[%s4556_s27 + $0x30] sm:$0xff] %vm849_vm3, %v839_v30  ;;  %v840_v35 = vmax.f32 %v798_v31, 0.0 }
 0x1e5   : > { %854 = vst.msk [vmem:[%s4556_s27 + $0x20] sm:$0xff] %vm849_vm3, %v837_v33  ;;  %v838_v36 = vmax.f32 %v790_v34, 0.0 }
 0x1e6   : > { %857 = vst.msk [vmem:[%s4556_s27 + $0x38] sm:$0xff] %vm849_vm3, %v840_v35  ;;  %v4599_v37 = vpack.c.bf16 %v840_v35, %v839_v30 }
 0x1e7   : > { %855 = vst.msk [vmem:[%s4556_s27 + $0x28] sm:$0xff] %vm849_vm3, %v838_v36  ;;  %v1020_v38 = vpack.c.bf16 %v838_v36, %v837_v33  ;;  %v3984_v39 = vpop.f32.mrb[8].mxu1  ;;  %v1095_v33 = vstv %s1017_s2  ;;  %v1026_v36 = vstv %s1015_s25  ;;  %s3702_s2 = sshll.u32 %s4475_s14, 3  ;;  %s3922_s14 = sshll.u32 %s4297_s21, 5 }
 0x1e8   : > { %v811_v40 = vadd.f32 %v3984_v39, %v4548_v8  ;;  %v802_v41 = vpop.f32.mrb[9].mxu1  ;;  %s5536_s22 = scalar_lea.vmem %s5645_s11, %s3702_s2  ;;  %s3541_s13 = sadd.s32 %s3922_s14, %s4458_s29 }
 0x1e9   : > { %v1054_v42 = vrot.slane %v1020_v38, 4  ;;  %v803_v43 = vadd.f32 %v4548_v8, %v802_v41  ;;  %v3985_v44 = vpop.f32.mrb[10].mxu1  ;;  %s3923_s4 = sshll.u32 %s3541_s13, 7  ;;  %s3544_s2 = sshll.u32 %s4556_s27, 4  ;;  %s5555_s2 = int_to_ptr.vmem [resolvable:$true] %s3544_s2 }
 0x1ea   : > { %v843_v45 = vmax.f32 %v811_v40, 0.0  ;;  %v814_v46 = vadd.f32 %v3985_v44, %v4548_v8  ;;  %v805_v47 = vpop.f32.mrb[11].mxu1  ;;  %s5667_s21 = sand.u32 1, %s4285_s18   ;;  %s4215_s0 = scalar_lea.vmem %s5555_s2, 2048 }
 0x1eb   : > { %v841_v48 = vmax.f32 %v803_v43, 0.0  ;;  %v806_v49 = vadd.f32 %v4548_v8, %v805_v47  ;;  %1055 = vrot.lane.b32.xlu1 %v1054_v42, %s4312_s15  ;;  %s5559_s29 = scalar_lea.sflag [#allocation5], %s5667_s21  ;;  %p4216_p2 = scmp.ne.s32.totalorder %s5555_s2, %s4215_s0 }
 0x1ec   : > { %860 = vst.msk [vmem:[%s4556_s27 + $0x50] sm:$0xff] %vm849_vm3, %v843_v45  ;;  %v844_v50 = vmax.f32 %v814_v46, 0.0  ;;  %v1039_v46 = vrot.slane %v4586_v24, 4  ;;  %s4313_s25 = smov [#allocation4]  }
 0x1ed   : > { %858 = vst.msk [vmem:[%s4556_s27 + $0x40] sm:$0xff] %vm849_vm3, %v841_v48  ;;  %v842_v51 = vmax.f32 %v806_v49, 0.0  ;;  %p4217_p4 = pnand %p4216_p2, %p4427_p3  ;;  %s4219_s20 = sshll.u32 %s4313_s25, 4  ;;  %s4220_s20 = int_to_ptr.vmem [resolvable:$false] %s4219_s20 }
 0x1ee   : > { %861 = vst.msk [vmem:[%s4556_s27 + $0x58] sm:$0xff] %vm849_vm3, %v844_v50  ;;  %v4614_v52 = vpack.c.bf16 %v844_v50, %v843_v45  ;;  %p4222_p6 = scmp.lt.s32.totalorder %s5555_s2, %s4220_s20 }
 0x1ef   : > { %859 = vst.msk [vmem:[%s4556_s27 + $0x48] sm:$0xff] %vm849_vm3, %v842_v51  ;;  %v1022_v53 = vpack.c.bf16 %v842_v51, %v841_v48  ;;  %v3988_v54 = vpop.f32.mrb[12].mxu1  ;;  %p4218_p5 = pneg %p4217_p4 }
 0x1f0   : > { %v827_v55 = vadd.f32 %v3988_v54, %v4548_v8  ;;  %v818_v56 = vpop.f32.mrb[13].mxu1 }
 0x1f1   : > { %v1068_v57 = vrot.slane %v1022_v53, 4  ;;  %v819_v58 = vadd.f32 %v4548_v8, %v818_v56  ;;  %v3989_v59 = vpop.f32.mrb[14].mxu1 }
 0x1f2   : > { %v847_v60 = vmax.f32 %v827_v55, 0.0  ;;  %v830_v61 = vadd.f32 %v3989_v59, %v4548_v8  ;;  %v821_v62 = vpop.f32.mrb[15].mxu1 }
 0x1f3   : > { %v845_v63 = vmax.f32 %v819_v58, 0.0  ;;  %v822_v0 = vadd.f32 %v4548_v8, %v821_v62  ;;  %1069 = vrot.lane.b32.xlu1 %v1068_v57, %s4312_s15 }
 0x1f4   : > { %864 = vst.msk [vmem:[%s4556_s27 + $0x70] sm:$0xff] %vm849_vm3, %v847_v60  ;;  %v848_v1 = vmax.f32 %v830_v61, 0.0 }
 0x1f5   : > { %862 = vst.msk [vmem:[%s4556_s27 + $0x60] sm:$0xff] %vm849_vm3, %v845_v63  ;;  %v846_v2 = vmax.f32 %v822_v0, 0.0 }
 0x1f6   : > { %865 = vst.msk [vmem:[%s4556_s27 + $0x78] sm:$0xff] %vm849_vm3, %v848_v1  ;;  %v4629_v3 = vpack.c.bf16 %v848_v1, %v847_v60 }
 0x1f7   : > { %863 = vst.msk [vmem:[%s4556_s27 + $0x68] sm:$0xff] %vm849_vm3, %v846_v2  ;;  %v1024_v4 = vpack.c.bf16 %v846_v2, %v845_v63  ;;  %v3996_v5 = vpop.f32.mrb[16].mxu1  ;;  %s4221_s27 = scalar_lea.vmem %s4220_s20, 4096 }
 0x1f8   : > { %v936_v6 = vadd.f32 %v3996_v5, %v4510_v13  ;;  %v927_v7 = vpop.f32.mrb[17].mxu1  ;;  %p4223_p7 = scmp.lt.s32.totalorder %s4221_s27, %s4215_s0 }
 0x1f9   : > { %v928_v9 = vadd.f32 %v4510_v13, %v927_v7  ;;  %v3997_v10 = vpop.f32.mrb[18].mxu1 }
 0x1fa   : > { %v939_v11 = vadd.f32 %v3997_v10, %v4510_v13  ;;  %v930_v12 = vpop.f32.mrb[19].mxu1  ;;  %v944_v15 = vmax.f32 %v936_v6, 0.0  ;;  %p4224_p9 = por %p4223_p7, %p4222_p6 }
 0x1fb   : > { %v931_v14 = vadd.f32 %v4510_v13, %v930_v12  ;;  %v942_v17 = vmax.f32 %v928_v9, 0.0 }
 0x1fc   : > { %v945_v16 = vmax.f32 %v939_v11, 0.0  ;;  %p4225_p10 = pnand %p4224_p9, %p4218_p5 }
 0x1fd   : > { %v943_v18 = vmax.f32 %v931_v14, 0.0 }
 0x1fe   : > { %v947_v19 = vpack.c.bf16 %v945_v16, %v944_v15 }
 0x1ff   : > { %v946_v20 = vpack.c.bf16 %v943_v18, %v942_v17 }
 0x201   : > { %4000 = vmatprep.mubr.msk.bf16.mxu0 %vm708_vm2, %v946_v20 }
 0x202   : > { %4001 = vmatmul.mubr.msk.bf16.vlgmr.msra.gmra.mrb[16].mxu0 %vm708_vm2, %v947_v19 }
 0x252   : > { %v1049_v21 = vpop.permute.xlu1 %1048 }
 0x253   : > { %1051 = vst.msk [vmem:[#allocation2 + $0x30] sm:$0xff] %vm1034_vm6, %v1049_v21 }
 0x25a   : > { %v1116_v50 = vld [vmem:[#allocation2 + $0x30] sm:$0xff] }
 0x25b   : > { %v1152_v57 = vshrl.u32 %v1116_v50, 16  ;;  %v1155_v9 = vshll.u32 %v1116_v50, 16 }
 0x25d   : > { %v1056_v22 = vpop.permute.xlu1 %1055  ;;  %v1154_v1 = vrot.slane %v1152_v57, 7 }
 0x25e   : > { %1058 = vst.msk [vmem:[#allocation2 + $0x40] sm:$0xf0] %vm1043_vm5, %v1056_v22 }
 0x25f   : > { %1059 = vst.msk [vmem:[#allocation2 + $0x50] sm:$0xf] %vm1036_vm4, %v1056_v22  ;;  %v1157_v17 = vor.u32 %v1155_v9, %v1154_v1  ;;  %v4103_v9 = vld [vmem:[%s5640_s6 + $0x24] ss:$8 sps:$4 sm:$0xff]  }
 0x265   : > { %v1070_v13 = vpop.permute.xlu1 %1069  ;;  %v1117_v2 = vld [vmem:[#allocation2 + $0x40] sm:$0xff] }
 0x266   : > { %1072 = vst.msk [vmem:[#allocation2 + $0x70] sm:$0xf0] %vm1043_vm5, %v1070_v13  ;;  %v1118_v51 = vld [vmem:[#allocation2 + $0x50] sm:$0xff]  ;;  %v1160_v12 = vshrl.u32 %v1117_v2, 16 }
 0x267   : > { %1073 = vst.msk [vmem:[#allocation2 + $0x80] sm:$0xf] %vm1036_vm4, %v1070_v13  ;;  %v1168_v58 = vshrl.u32 %v1118_v51, 16  ;;  %v1171_v14 = vshll.u32 %v1118_v51, 16 }
 0x269   : > { %v1170_v5 = vrot.slane %v1168_v58, 7 }
 0x26b   : > { %v1173_v20 = vor.u32 %v1171_v14, %v1170_v5  ;;  %v4109_v14 = vld [vmem:[%s5640_s6 + $0x34] ss:$8 sps:$4 sm:$0xff]  }
 0x26d   : > { %v1120_v6 = vld [vmem:[#allocation2 + $0x70] sm:$0xff] }
 0x26e   : > { %v1184_v18 = vshrl.u32 %v1120_v6, 16 }
 0x2d5   : > { %v4002_v25 = vpop.f32.mrb[16].mxu0 }
 0x2d6   : > { %v1004_v26 = vadd.f32 %v4002_v25, %v4548_v8  ;;  %v995_v27 = vpop.f32.mrb[17].mxu0 }
 0x2d7   : > { %v996_v28 = vadd.f32 %v4548_v8, %v995_v27  ;;  %v4003_v29 = vpop.f32.mrb[18].mxu0 }
 0x2d8   : > { %v1012_v30 = vmax.f32 %v1004_v26, 0.0  ;;  %v1007_v31 = vadd.f32 %v4003_v29, %v4548_v8  ;;  %v998_v32 = vpop.f32.mrb[19].mxu0  ;;  %v1162_v26 = vrot.slane %v1160_v12, 7  ;;  %v1186_v29 = vrot.slane %v1184_v18, 7  ;;  %v4101_v12 = vld [vmem:[%s5640_s6 + $0x20] ss:$8 sps:$4 sm:$0xff]  }
 0x2d9   : > { %v1010_v34 = vmax.f32 %v996_v28, 0.0  ;;  %v999_v35 = vadd.f32 %v4548_v8, %v998_v32  ;;  %v1082_v8 = vrot.slane %v1024_v4, 4  ;;  %v1121_v32 = vld [vmem:[#allocation2 + $0x80] sm:$0xff] }
 0x2da   : > { %v1013_v38 = vmax.f32 %v1007_v31, 0.0  ;;  %v4651_v40 = vmul.f32 %v1095_v33, %v1012_v30  ;;  %v1174_v30 = vsel %vm1108_vm8, %v1162_v26, %v1173_v20  ;;  %v1187_v31 = vshll.u32 %v1120_v6, 16  ;;  %v4098_v6 = vld [vmem:[%s5640_s6 + $0x10] ss:$8 sps:$4 sm:$0xff]   ;;  %v4115_v18 = vld [vmem:[%s5640_s6 + $0x44] ss:$8 sps:$4 sm:$0xff]  }
 0x2db   : > { %v1011_v39 = vmax.f32 %v999_v35, 0.0  ;;  %v1027_v42 = vmul.f32 %v1026_v36, %v1010_v34  ;;  %v4130_v20 = vld [vmem:[%s5640_s6 + $0x104] ss:$8 sps:$4 sm:$0xff]  }
 0x2dc   : > { %v4653_v41 = vmul.f32 %v1095_v33, %v1013_v38  ;;  %v1163_v38 = vshll.u32 %v1117_v2, 16  ;;  %v4100_v2 = vld [vmem:[%s5640_s6 + $0x14] ss:$8 sps:$4 sm:$0xff]  }
 0x2dd   : > { %v1028_v43 = vmul.f32 %v1026_v36, %v1011_v39 }
 0x2de   : > { %v1098_v44 = vpack.c.bf16 %v4653_v41, %v4651_v40 }
 0x2df   : > { %v1029_v45 = vpack.c.bf16 %v1028_v43, %v1027_v42  ;;  %v1189_v42 = vor.u32 %v1187_v31, %v1186_v29  ;;  %v1192_v43 = vshrl.u32 %v1121_v32, 16  ;;  %v4133_v31 = vld [vmem:[%s5640_s6 + $0x74] ss:$8 sps:$4 sm:$0xff]  }
 0x2e1   : > { %1031 = vrot.lane.b32.xlu0 %v1029_v45, %s4312_s15 }
 0x2e5   : > { %1040 = vrot.lane.b32.xlu0 %v1039_v46, %s4312_s15  ;;  %v1165_v46 = vor.u32 %v1163_v38, %v1162_v26  ;;  %v4119_v26 = vld [vmem:[%s5640_s6 + $0x50] ss:$8 sps:$4 sm:$0xff]  }
 0x2e6   : > { %v4143_v38 = vld [vmem:[%s5640_s6 + $0x90] ss:$8 sps:$4 sm:$0xff]  }
 0x2e7   : > { %v1166_v51 = vsel %vm1108_vm8, %v1154_v1, %v1165_v46  ;;  %v4097_v1 = vld [vmem:[%s5640_s6 + $0x4] ss:$8 sps:$4 sm:$0xff]  }
 0x2e8   : > { %1719 = vmatprep.subr.bf16.mxu1 %v4097_v1 }
 0x2e9   : > { %1062 = vrot.lane.b32.xlu0 %v4599_v37, %s4312_s15 }
 0x2ed   : > { %1076 = vrot.lane.b32.xlu0 %v4614_v52, %s4312_s15 }
 0x2f1   : > { %1083 = vrot.lane.b32.xlu0 %v1082_v8, %s4312_s15 }
 0x353   : > { %v1032_v47 = vpop.permute.xlu0 %1031 }
 0x354   : > { %1035 = vst.msk [vmem:[#allocation2] sm:$0xff] %vm1034_vm6, %v1032_v47 }
 0x357   : > { %v1041_v48 = vpop.permute.xlu0 %1040 }
 0x358   : > { %1044 = vst.msk [vmem:[#allocation2 + $0x10] sm:$0xf0] %vm1043_vm5, %v1041_v48 }
 0x359   : > { %1045 = vst.msk [vmem:[#allocation2 + $0x20] sm:$0xf] %vm1036_vm4, %v1041_v48 }
 0x35b   : > { %v1110_v24 = vld [vmem:[#allocation2] sm:$0x1]  ;;  %v1063_v37 = vpop.permute.xlu0 %1062 }
 0x35c   : > { %v1111_v49 = vsel %vm1109_vm9, 0, %v1110_v24  ;;  %1065 = vst.msk [vmem:[#allocation2 + $0x60] sm:$0xff] %vm1034_vm6, %v1063_v37  ;;  %v1194_v37 = vrot.slane %v1192_v43, 7 }
 0x35d   : > { %1112 = vst [vmem:[#allocation2] sm:$0x1] %v1111_v49 }
 0x35f   : > { %v1077_v52 = vpop.permute.xlu0 %1076  ;;  %v1114_v53 = vld [vmem:[#allocation2 + $0x10] sm:$0xff] }
 0x360   : > { %v1115_v54 = vld [vmem:[#allocation2 + $0x20] sm:$0xff]  ;;  %1079 = vst.msk [vmem:[#allocation2 + $0x90] sm:$0xff] %vm1034_vm6, %v1077_v52  ;;  %v1136_v55 = vshrl.u32 %v1114_v53, 16  ;;  %v1139_v22 = vshll.u32 %v1114_v53, 16 }
 0x361   : > { %v1144_v56 = vshrl.u32 %v1115_v54, 16  ;;  %v1147_v60 = vshll.u32 %v1115_v54, 16 }
 0x362   : > { %v1138_v62 = vrot.slane %v1136_v55, 7 }
 0x363   : > { %v1146_v59 = vrot.slane %v1144_v56, 7  ;;  %v1084_v61 = vpop.permute.xlu0 %1083  ;;  %v1119_v15 = vld [vmem:[#allocation2 + $0x60] sm:$0xff]  ;;  %v1195_v56 = vshll.u32 %v1121_v32, 16 }
 0x364   : > { %1086 = vst.msk [vmem:[#allocation2 + $0xa0] sm:$0xf0] %vm1043_vm5, %v1084_v61  ;;  %v4673_v0 = vld [vmem:[#allocation2] sm:$0xff]  ;;  %v1176_v13 = vshrl.u32 %v1119_v15, 16  ;;  %v1141_v28 = vor.u32 %v1139_v22, %v1138_v62  ;;  %v1179_v49 = vshll.u32 %v1119_v15, 16 }
 0x365   : > { %1087 = vst.msk [vmem:[#allocation2 + $0xb0] sm:$0xf] %vm1036_vm4, %v1084_v61  ;;  %v1149_v63 = vor.u32 %v1147_v60, %v1146_v59  ;;  %v1129_v4 = vshrl.u32 %v4673_v0, 16  ;;  %v1132_v11 = vshll.u32 %v4673_v0, 16  ;;  %v1158_v21 = vsel %vm1108_vm8, %v1146_v59, %v1157_v17  ;;  %v4116_v15 = vld [vmem:[%s5640_s6 + $0xe0] ss:$8 sps:$4 sm:$0xff]  }
 0x366   : > { %v1178_v34 = vrot.slane %v1176_v13, 7  ;;  %v1197_v59 = vor.u32 %v1195_v56, %v1194_v37  ;;  %v4107_v17 = vld [vmem:[%s5640_s6 + $0x30] ss:$8 sps:$4 sm:$0xff]   ;;  %v4121_v22 = vld [vmem:[%s5640_s6 + $0x54] ss:$8 sps:$4 sm:$0xff]  }
 0x367   : > { %v1150_v7 = vsel %vm1108_vm8, %v1138_v62, %v1149_v63  ;;  %v1131_v10 = vrot.slane %v1129_v4, 7  ;;  %v1122_v16 = vld [vmem:[#allocation2 + $0x90] sm:$0xff]  ;;  %v4095_v63 = vld [vmem:[%s5640_s6] ss:$8 sps:$4 sm:$0xff]  }
 0x368   : > { %1251 = vrot.lane.b32.xlu0 %v1150_v7, %s4312_s15  ;;  %v1200_v25 = vshrl.u32 %v1122_v16, 16  ;;  %v1203_v45 = vshll.u32 %v1122_v16, 16  ;;  %v1190_v8 = vsel %vm1108_vm8, %v1178_v34, %v1189_v42  ;;  %v1181_v53 = vor.u32 %v1179_v49, %v1178_v34  ;;  %v4104_v4 = vld [vmem:[%s5640_s6 + $0xc0] ss:$8 sps:$4 sm:$0xff]   ;;  %1720 = vmatpush1.bf16.msra.mxu1 %v4095_v63  ;;  %v4112_v7 = vld [vmem:[%s5640_s6 + $0xd4] ss:$8 sps:$4 sm:$0xff]  }
 0x369   : > { %v1134_v19 = vor.u32 %v1132_v11, %v1131_v10  ;;  %v1142_v33 = vsel %vm1108_vm8, %v1131_v10, %v1141_v28  ;;  %v1198_v61 = vsel %vm1108_vm8, %v1186_v29, %v1197_v59  ;;  %1721 = vmatprep.subr.bf16.mxu1 %v4100_v2  ;;  %v4110_v10 = vld [vmem:[%s5640_s6 + $0xd0] ss:$8 sps:$4 sm:$0xff]   ;;  %v4118_v11 = vld [vmem:[%s5640_s6 + $0xe4] ss:$8 sps:$4 sm:$0xff]   ;;  %v4124_v16 = vld [vmem:[%s5640_s6 + $0xf4] ss:$8 sps:$4 sm:$0xff]  }
 0x36a   : > { %v1202_v35 = vrot.slane %v1200_v25, 7  ;;  %v4128_v13 = vld [vmem:[%s5640_s6 + $0x100] ss:$8 sps:$4 sm:$0xff]   ;;  %v4136_v25 = vld [vmem:[%s5640_s6 + $0x114] ss:$8 sps:$4 sm:$0xff]  }
 0x36b   : > { %1247 = vrot.lane.b32.xlu1 %v1134_v19, %s4312_s15  ;;  %v1123_v27 = vld [vmem:[#allocation2 + $0xa0] sm:$0xff]  ;;  %v4122_v19 = vld [vmem:[%s5640_s6 + $0xf0] ss:$8 sps:$4 sm:$0xff]  }
 0x36c   : > { %1253 = vrot.lane.b32.xlu0 %v1158_v21, %s4312_s15  ;;  %v1208_v36 = vshrl.u32 %v1123_v27, 16  ;;  %v1124_v39 = vld [vmem:[#allocation2 + $0xb0] sm:$0xff]  ;;  %v1205_v47 = vor.u32 %v1203_v45, %v1202_v35  ;;  %v1211_v50 = vshll.u32 %v1123_v27, 16  ;;  %1722 = vmatpush1.bf16.msra.mxu1 %v4098_v6  ;;  %v4113_v21 = vld [vmem:[%s5640_s6 + $0x40] ss:$8 sps:$4 sm:$0xff]  }
 0x36d   : > { %v1216_v24 = vshrl.u32 %v1124_v39, 16  ;;  %v1219_v57 = vshll.u32 %v1124_v39, 16  ;;  %1723 = vmatprep.subr.bf16.mxu1 %v4103_v9  ;;  %v4127_v27 = vld [vmem:[%s5640_s6 + $0x64] ss:$8 sps:$4 sm:$0xff]   ;;  %v4134_v28 = vld [vmem:[%s5640_s6 + $0x110] ss:$8 sps:$4 sm:$0xff]  }
 0x36e   : > { %v1210_v48 = vrot.slane %v1208_v36, 7  ;;  %v1206_v52 = vsel %vm1108_vm8, %v1194_v37, %v1205_v47  ;;  %v4142_v29 = vld [vmem:[%s5640_s6 + $0x124] ss:$8 sps:$4 sm:$0xff]   ;;  %v4140_v32 = vld [vmem:[%s5640_s6 + $0x120] ss:$8 sps:$4 sm:$0xff]  }
 0x36f   : > { %1249 = vrot.lane.b32.xlu1 %v1142_v33, %s4312_s15  ;;  %v4692_v55 = vrot.slane %v1216_v24, 7  ;;  %v4131_v33 = vld [vmem:[%s5640_s6 + $0x70] ss:$8 sps:$4 sm:$0xff]   ;;  %v4139_v34 = vld [vmem:[%s5640_s6 + $0x84] ss:$8 sps:$4 sm:$0xff]  }
 0x370   : > { %1257 = vrot.lane.b32.xlu0 %v1174_v30, %s4312_s15  ;;  %v1213_v54 = vor.u32 %v1211_v50, %v1210_v48  ;;  %1724 = vmatpush1.bf16.msra.mxu1 %v4101_v12  ;;  %v4125_v30 = vld [vmem:[%s5640_s6 + $0x60] ss:$8 sps:$4 sm:$0xff]   ;;  %v4145_v36 = vld [vmem:[%s5640_s6 + $0x94] ss:$8 sps:$4 sm:$0xff]   ;;  %v4158_v63 = vld [vmem:[%s5640_s6 + $0x150] ss:$8 sps:$4 sm:$0xff]  }
 0x371   : > { %v1221_v60 = vor.u32 %v1219_v57, %v4692_v55  ;;  %1725 = vmatprep.subr.bf16.mxu1 %v4109_v14  ;;  %v4148_v47 = vld [vmem:[%s5640_s6 + $0x134] ss:$8 sps:$4 sm:$0xff]   ;;  %v4149_v24 = vld [vmem:[%s5640_s6 + $0xa0] ss:$8 sps:$4 sm:$0xff]  }
 0x372   : > { %v1214_v58 = vsel %vm1108_vm8, %v1202_v35, %v1213_v54  ;;  %v4137_v35 = vld [vmem:[%s5640_s6 + $0x80] ss:$8 sps:$4 sm:$0xff]   ;;  %v4157_v54 = vld [vmem:[%s5640_s6 + $0xb4] ss:$8 sps:$4 sm:$0xff]  }
 0x373   : > { %1090 = vrot.lane.b32.xlu1 %v4629_v3, %s4312_s15  ;;  %v1182_v3 = vsel %vm1108_vm8, %v1170_v5, %v1181_v53  ;;  %v1222_v62 = vsel %vm1108_vm8, %v1210_v48, %v1221_v60  ;;  %v4106_v5 = vld [vmem:[%s5640_s6 + $0xc4] ss:$8 sps:$4 sm:$0xff]   ;;  %v4146_v48 = vld [vmem:[%s5640_s6 + $0x130] ss:$8 sps:$4 sm:$0xff]   ;;  %v4160_v60 = vld [vmem:[%s5640_s6 + $0x154] ss:$8 sps:$4 sm:$0xff]  }
 0x374   : > { %1261 = vrot.lane.b32.xlu0 %v1190_v8, %s4312_s15  ;;  %2264 = vmatprep.subr.bf16.mxu0 %v4106_v5  ;;  %v4155_v53 = vld [vmem:[%s5640_s6 + $0xb0] ss:$8 sps:$4 sm:$0xff]  }
 0x375   : > { %2265 = vmatpush1.bf16.msra.mxu0 %v4104_v4  ;;  %1726 = vmatpush1.bf16.msra.mxu1 %v4107_v17 }
 0x376   : > { %2266 = vmatprep.subr.bf16.mxu0 %v4112_v7  ;;  %1727 = vmatprep.subr.bf16.mxu1 %v4115_v18  ;;  %v4161_v18 = vld [vmem:[%s5640_s6 + $0x160] ss:$8 sps:$4 sm:$0xff]  }
 0x377   : > { %1255 = vrot.lane.b32.xlu1 %v1166_v51, %s4312_s15  ;;  %v4154_v51 = vld [vmem:[%s5640_s6 + $0x144] ss:$8 sps:$4 sm:$0xff]  }
 0x378   : > { %1265 = vrot.lane.b32.xlu0 %v1206_v52, %s4312_s15  ;;  %v4152_v52 = vld [vmem:[%s5640_s6 + $0x140] ss:$8 sps:$4 sm:$0xff]  }
 0x379   : > { %2267 = vmatpush1.bf16.msra.mxu0 %v4110_v10  ;;  %1728 = vmatpush1.bf16.msra.mxu1 %v4113_v21 }
 0x37a   : > { %2268 = vmatprep.subr.bf16.mxu0 %v4118_v11  ;;  %1729 = vmatprep.subr.bf16.mxu1 %v4121_v22  ;;  %v4163_v11 = vld [vmem:[%s5640_s6 + $0x164] ss:$8 sps:$4 sm:$0xff]  }
 0x37b   : > { %1259 = vrot.lane.b32.xlu1 %v1182_v3, %s4312_s15 }
 0x37c   : > { %1267 = vrot.lane.b32.xlu0 %v1214_v58, %s4312_s15 }
 0x37d   : > { %2269 = vmatpush1.bf16.msra.mxu0 %v4116_v15  ;;  %1730 = vmatpush1.bf16.msra.mxu1 %v4119_v26 }
 0x37e   : > { %2270 = vmatprep.subr.bf16.mxu0 %v4124_v16  ;;  %1731 = vmatprep.subr.bf16.mxu1 %v4127_v27 }
 0x37f   : > { %1263 = vrot.lane.b32.xlu1 %v1198_v61, %s4312_s15 }
 0x380   : > { %1269 = vrot.lane.b32.xlu0 %v1222_v62, %s4312_s15 }
 0x381   : > { %2271 = vmatpush1.bf16.msra.mxu0 %v4122_v19  ;;  %1732 = vmatpush1.bf16.msra.mxu1 %v4125_v30 }
 0x382   : > { %2272 = vmatprep.subr.bf16.mxu0 %v4130_v20  ;;  %1733 = vmatprep.subr.bf16.mxu1 %v4133_v31 }
 0x385   : > { %2273 = vmatpush1.bf16.msra.mxu0 %v4128_v13  ;;  %1734 = vmatpush1.bf16.msra.mxu1 %v4131_v33  ;;  %v4164_v33 = vld [vmem:[%s5640_s6 + $0x170] ss:$8 sps:$4 sm:$0xff]  }
 0x386   : > { %2274 = vmatprep.subr.bf16.mxu0 %v4136_v25  ;;  %1735 = vmatprep.subr.bf16.mxu1 %v4139_v34 }
 0x389   : > { %2275 = vmatpush1.bf16.msra.mxu0 %v4134_v28  ;;  %1736 = vmatpush1.bf16.msra.mxu1 %v4137_v35  ;;  %v4166_v28 = vld [vmem:[%s5640_s6 + $0x174] ss:$8 sps:$4 sm:$0xff]  }
 0x38a   : > { %2276 = vmatprep.subr.bf16.mxu0 %v4142_v29  ;;  %1737 = vmatprep.subr.bf16.mxu1 %v4145_v36 }
 0x38d   : > { %2277 = vmatpush1.bf16.msra.mxu0 %v4140_v32  ;;  %1738 = vmatpush1.bf16.msra.mxu1 %v4143_v38 }
 0x38e   : > { %2278 = vmatprep.subr.bf16.mxu0 %v4148_v47 }
 0x391   : > { %2279 = vmatpush1.bf16.msra.mxu0 %v4146_v48 }
 0x392   : > { %2280 = vmatprep.subr.bf16.mxu0 %v4154_v51 }
 0x395   : > { %2281 = vmatpush1.bf16.msra.mxu0 %v4152_v52 }
 0x396   : > { %2282 = vmatprep.subr.bf16.mxu0 %v4160_v60 }
 0x399   : > { %2283 = vmatpush1.bf16.msra.mxu0 %v4158_v63 }
 0x39a   : > { %2284 = vmatprep.subr.bf16.mxu0 %v4163_v11 }
 0x39d   : > { %2285 = vmatpush1.bf16.msra.mxu0 %v4161_v18 }
 0x39e   : > { %2286 = vmatprep.subr.bf16.mxu0 %v4166_v28 }
 0x3a1   : > { %2287 = vmatpush1.bf16.msra.mxu0 %v4164_v33  ;;  %v4172_v33 = vld [vmem:[%s5640_s6 + $0x194] ss:$8 sps:$4 sm:$0xff]  }
 0x3a2   : > { %3382 = vmatprep.subr.bf16.mxu0 %v4311_v23 }
 0x3da   : > { %v1252_v39 = vpop.permute.xlu0 %1251 }
 0x3db   : > { %1298 = vst.msk [vmem:[#allocation2 + $0x20] sm:$0xff] %vm849_vm3, %v1252_v39 }
 0x3dd   : > { %v1248_v42 = vpop.permute.xlu1 %1247 }
 0x3de   : > { %v1254_v43 = vpop.permute.xlu0 %1253  ;;  %v4811_v45 = vsel %vm1294_vm11, %v1248_v42, %v4673_v0  ;;  %v4151_v0 = vld [vmem:[%s5640_s6 + $0xa4] ss:$8 sps:$4 sm:$0xff]  }
 0x3df   : > { %1299 = vst.msk [vmem:[#allocation2 + $0x30] sm:$0xff] %vm849_vm3, %v1254_v43  ;;  %v1330_v37 = vshll.u32 %v4811_v45, 16  ;;  %1739 = vmatprep.subr.bf16.mxu1 %v4151_v0  ;;  %v1328_v61 = vshrl.u32 %v4811_v45, 16 }
 0x3e0   : > { %1740 = vmatpush1.bf16.msra.mxu1 %v4149_v24 }
 0x3e1   : > { %v1250_v46 = vpop.permute.xlu1 %1249  ;;  %v1332_v56 = vrot.slane %v1330_v37, 1  ;;  %1741 = vmatprep.subr.bf16.mxu1 %v4157_v54 }
 0x3e2   : > { %v1258_v8 = vpop.permute.xlu0 %1257  ;;  %1297 = vst.msk [vmem:[#allocation2 + $0x10] sm:$0xff] %vm849_vm3, %v1250_v46  ;;  %v4844_v59 = vld [vmem:[#allocation2 + $0x20] sm:$0xff] }
 0x3e3   : > { %1301 = vst.msk [vmem:[#allocation2 + $0x50] sm:$0xff] %vm849_vm3, %v1258_v8  ;;  %v1333_v2 = vor.u32 %v1332_v56, %v1328_v61  ;;  %v1343_v6 = vshll.u32 %v4844_v59, 16  ;;  %v1347_v25 = vshrl.u32 %v4844_v59, 16 }
 0x3e4   : > { %1742 = vmatpush1.bf16.msra.mxu1 %v4155_v53 }
 0x3e5   : > { %v1091_v49 = vpop.permute.xlu1 %1090  ;;  %v1345_v19 = vrot.slane %v1343_v6, 1 }
 0x3e6   : > { %v1262_v50 = vpop.permute.xlu0 %1261  ;;  %1093 = vst.msk [vmem:[#allocation2 + $0xc0] sm:$0xff] %vm1034_vm6, %v1091_v49  ;;  %v4856_v1 = vld [vmem:[#allocation2 + $0x30] sm:$0xff] }
 0x3e7   : > { %1303 = vst.msk [vmem:[#allocation2 + $0x70] sm:$0xff] %vm849_vm3, %v1262_v50  ;;  %v1351_v16 = vshll.u32 %v4856_v1, 16  ;;  %v1349_v36 = vor.u32 %v1347_v25, %v1345_v19  ;;  %v1355_v38 = vshrl.u32 %v4856_v1, 16  ;;  %v1100_v50 = vrot.slane %v1098_v44, 4  ;;  %v4169_v25 = vld [vmem:[%s5640_s6 + $0x184] ss:$8 sps:$4 sm:$0xff]  }
 0x3e8   : > { %2766 = vmatprep.subr.bf16.mxu1 %v4169_v25 }
 0x3e9   : > { %v1256_v57 = vpop.permute.xlu1 %1255  ;;  %v4842_v58 = vld [vmem:[#allocation2 + $0x10] sm:$0xff]  ;;  %v1353_v31 = vrot.slane %v1351_v16, 1 }
 0x3ea   : > { %v1266_v3 = vpop.permute.xlu0 %1265  ;;  %1300 = vst.msk [vmem:[#allocation2 + $0x40] sm:$0xff] %vm849_vm3, %v1256_v57  ;;  %v1335_v62 = vshll.u32 %v4842_v58, 16  ;;  %v1339_v5 = vshrl.u32 %v4842_v58, 16  ;;  %v4867_v17 = vld [vmem:[#allocation2 + $0x50] sm:$0xff] }
 0x3eb   : > { %1305 = vst.msk [vmem:[#allocation2 + $0x90] sm:$0xff] %vm849_vm3, %v1266_v3  ;;  %v1367_v27 = vshll.u32 %v4867_v17, 16  ;;  %v1354_v46 = vsel %vm1326_vm12, %v1349_v36, %v1353_v31  ;;  %v1357_v8 = vor.u32 %v1355_v38, %v1353_v31  ;;  %v4170_v36 = vld [vmem:[%s5640_s6 + $0x190] ss:$8 sps:$4 sm:$0xff]  }
 0x3ec   : > { %v1337_v4 = vrot.slane %v1335_v62, 1 }
 0x3ed   : > { %v1260_v7 = vpop.permute.xlu1 %1259  ;;  %v1125_v10 = vld [vmem:[#allocation2 + $0xc0] sm:$0xff]  ;;  %v1369_v43 = vrot.slane %v1367_v27, 1 }
 0x3ee   : > { %v1268_v9 = vpop.permute.xlu0 %1267  ;;  %1302 = vst.msk [vmem:[#allocation2 + $0x60] sm:$0xff] %vm849_vm3, %v1260_v7  ;;  %v1338_v12 = vsel %vm1326_vm12, %v1333_v2, %v1337_v4  ;;  %v1341_v14 = vor.u32 %v1339_v5, %v1337_v4  ;;  %v1224_v15 = vshrl.u32 %v1125_v10, 16  ;;  %v1227_v21 = vshll.u32 %v1125_v10, 16  ;;  %v4891_v34 = vld [vmem:[#allocation2 + $0x70] sm:$0xff] }
 0x3ef   : > { %1306 = vst.msk [vmem:[#allocation2 + $0xa0] sm:$0xff] %vm849_vm3, %v1268_v9  ;;  %1446 = vrot.lane.b32.xlu1 %v1338_v12, %s4312_s15  ;;  %v1383_v48 = vshll.u32 %v4891_v34, 16  ;;  %v1387_v60 = vshrl.u32 %v4891_v34, 16 }
 0x3f0   : > { %v4873_v20 = vrot.slane %v1224_v15, 7  ;;  %v1346_v29 = vsel %vm1326_vm12, %v1341_v14, %v1345_v19 }
 0x3f1   : > { %v1264_v22 = vpop.permute.xlu1 %1263  ;;  %v4876_v26 = vld [vmem:[#allocation2 + $0x40] sm:$0xff]  ;;  %v1385_v56 = vrot.slane %v1383_v48, 1 }
 0x3f2   : > { %v1270_v13 = vpop.permute.xlu0 %1269  ;;  %1304 = vst.msk [vmem:[#allocation2 + $0x80] sm:$0xff] %vm849_vm3, %v1264_v22  ;;  %v1229_v30 = vor.u32 %v1227_v21, %v4873_v20  ;;  %v1359_v32 = vshll.u32 %v4876_v26, 16  ;;  %v4905_v24 = vld [vmem:[#allocation2 + $0x90] sm:$0xff]  ;;  %v1363_v49 = vshrl.u32 %v4876_v26, 16 }
 0x3f3   : > { %1307 = vst.msk [vmem:[#allocation2 + $0xb0] sm:$0xff] %vm849_vm3, %v1270_v13  ;;  %1448 = vrot.lane.b32.xlu1 %v1346_v29, %s4312_s15  ;;  %v1399_v3 = vshll.u32 %v4905_v24, 16  ;;  %v1389_v63 = vor.u32 %v1387_v60, %v1385_v56  ;;  %v1403_v7 = vshrl.u32 %v4905_v24, 16 }
 0x3f4   : > { %v1230_v35 = vsel %vm1108_vm8, %v4692_v55, %v1229_v30  ;;  %v1361_v39 = vrot.slane %v1359_v32, 1  ;;  %v1371_v55 = vshrl.u32 %v4867_v17, 16  ;;  %v4167_v30 = vld [vmem:[%s5640_s6 + $0x180] ss:$8 sps:$4 sm:$0xff]  }
 0x3f5   : > { %1271 = vrot.lane.b32.xlu0 %v1230_v35, %s4312_s15  ;;  %v4897_v42 = vld [vmem:[#allocation2 + $0x60] sm:$0xff]  ;;  %v1401_v4 = vrot.slane %v1399_v3, 1  ;;  %v4178_v3 = vld [vmem:[%s5640_s6 + $0x1b4] ss:$8 sps:$4 sm:$0xff]  }
 0x3f6   : > { %v1375_v47 = vshll.u32 %v4897_v42, 16  ;;  %v1362_v0 = vsel %vm1326_vm12, %v1357_v8, %v1361_v39  ;;  %v1373_v51 = vor.u32 %v1371_v55, %v1369_v43  ;;  %v4915_v53 = vld [vmem:[#allocation2 + $0xa0] sm:$0xff]  ;;  %v1365_v54 = vor.u32 %v1363_v49, %v1361_v39 }
 0x3f7   : > { %1450 = vrot.lane.b32.xlu1 %v1354_v46, %s4312_s15  ;;  %v1379_v40 = vshrl.u32 %v4897_v42, 16  ;;  %v1407_v41 = vshll.u32 %v4915_v53, 16  ;;  %v1405_v12 = vor.u32 %v1403_v7, %v1401_v4  ;;  %v1411_v19 = vshrl.u32 %v4915_v53, 16  ;;  %v4181_v7 = vld [vmem:[%s5640_s6 + $0x1c4] ss:$8 sps:$4 sm:$0xff]  }
 0x3f8   : > { %v1377_v37 = vrot.slane %v1375_v47, 1  ;;  %v1370_v44 = vsel %vm1326_vm12, %v1365_v54, %v1369_v43  ;;  %v4175_v43 = vld [vmem:[%s5640_s6 + $0x1a4] ss:$8 sps:$4 sm:$0xff]  }
 0x3f9   : > { %1452 = vrot.lane.b32.xlu0 %v1362_v0, %s4312_s15  ;;  %v4913_v52 = vld [vmem:[#allocation2 + $0x80] sm:$0xff]  ;;  %v1409_v9 = vrot.slane %v1407_v41, 1 }
 0x3fa   : > { %v1391_v57 = vshll.u32 %v4913_v52, 16  ;;  %v1378_v61 = vsel %vm1326_vm12, %v1373_v51, %v1377_v37  ;;  %v1381_v2 = vor.u32 %v1379_v40, %v1377_v37  ;;  %v4927_v5 = vld [vmem:[#allocation2 + $0xb0] sm:$0xff]  ;;  %v1395_v10 = vshrl.u32 %v4913_v52, 16  ;;  %v4173_v0 = vld [vmem:[%s5640_s6 + $0x1a0] ss:$8 sps:$4 sm:$0xff]  }
 0x3fb   : > { %1101 = vrot.lane.b32.xlu1 %v1100_v50, %s4312_s15  ;;  %v1415_v15 = vshll.u32 %v4927_v5, 16  ;;  %v1410_v16 = vsel %vm1326_vm12, %v1405_v12, %v1409_v9  ;;  %v1413_v22 = vor.u32 %v1411_v19, %v1409_v9  ;;  %v1419_v48 = vshrl.u32 %v4927_v5, 16 }
 0x3fc   : > { %v1393_v62 = vrot.slane %v1391_v57, 1  ;;  %v1386_v11 = vsel %vm1326_vm12, %v1381_v2, %v1385_v56 }
 0x3fd   : > { %1456 = vrot.lane.b32.xlu0 %v1378_v61, %s4312_s15  ;;  %v1417_v21 = vrot.slane %v1415_v15, 1  ;;  %v2047_v61 = vrot.slane %v4844_v59, 4 }
 0x3fe   : > { %v1394_v6 = vsel %vm1326_vm12, %v1389_v63, %v1393_v62  ;;  %v1397_v14 = vor.u32 %v1395_v10, %v1393_v62 }
 0x3ff   : > { %1454 = vrot.lane.b32.xlu1 %v1370_v44, %s4312_s15  ;;  %v1418_v13 = vsel %vm1326_vm12, %v1413_v22, %v1417_v21  ;;  %v1421_v56 = vor.u32 %v1419_v48, %v1417_v21  ;;  %v2052_v21 = vrot.slane %v4856_v1, 4  ;;  %v4188_v48 = vld [vmem:[%s5640_s6 + $0x1f0] ss:$8 sps:$4 sm:$0xff]  }
 0x400   : > { %v1402_v18 = vsel %vm1326_vm12, %v1397_v14, %v1401_v4 }
 0x401   : > { %1460 = vrot.lane.b32.xlu0 %v1394_v6, %s4312_s15 }
 0x403   : > { %1458 = vrot.lane.b32.xlu1 %v1386_v11, %s4312_s15 }
 0x405   : > { %1464 = vrot.lane.b32.xlu0 %v1410_v16, %s4312_s15 }
 0x407   : > { %1462 = vrot.lane.b32.xlu1 %v1402_v18, %s4312_s15 }
 0x40b   : > { %1466 = vrot.lane.b32.xlu1 %v1418_v13, %s4312_s15 }
 0x461   : > { %v1447_v27 = vpop.permute.xlu1 %1446 }
 0x462   : > { %1491 = vst.msk [vmem:[#allocation2 + $0x8] sm:$0xff] %vm849_vm3, %v1447_v27 }
 0x465   : > { %v1449_v28 = vpop.permute.xlu1 %1448 }
 0x466   : > { %1492 = vst.msk [vmem:[#allocation2 + $0x18] sm:$0xff] %vm849_vm3, %v1449_v28  ;;  %v4179_v28 = vld [vmem:[%s5640_s6 + $0x1c0] ss:$8 sps:$4 sm:$0xff]  }
 0x467   : > { %v1272_v29 = vpop.permute.xlu0 %1271 }
 0x468   : > { %1308 = vst.msk [vmem:[#allocation2 + $0xc0] sm:$0xff] %vm849_vm3, %v1272_v29  ;;  %v4184_v29 = vld [vmem:[%s5640_s6 + $0x1d4] ss:$8 sps:$4 sm:$0xff]  }
 0x469   : > { %v1451_v31 = vpop.permute.xlu1 %1450  ;;  %v1516_v32 = vld [vmem:[#allocation2 + $0x8] sm:$0xff] }
 0x46a   : > { %1493 = vst.msk [vmem:[#allocation2 + $0x28] sm:$0xff] %vm849_vm3, %v1451_v31  ;;  %3763 = vmatprep.mubr.msk.bf16.mxu1 %vm849_vm3, %v1516_v32 }
 0x46b   : > { %1752 = vmatmul.mubr.bf16.vlgmr.msra.gmra.mrb[20].mxu1 %v4811_v45  ;;  %v1453_v35 = vpop.permute.xlu0 %1452  ;;  %v1968_v45 = vld [vmem:[#allocation2 + $0x10] sm:$0xf0] }
 0x46c   : > { %1494 = vst.msk [vmem:[#allocation2 + $0x38] sm:$0xff] %vm849_vm3, %v1453_v35  ;;  %2767 = vmatpush1.bf16.msra.mxu1 %v4167_v30  ;;  %v2046_v50 = vrot.slane %v1968_v45, 4  ;;  %v4182_v35 = vld [vmem:[%s5640_s6 + $0x1d0] ss:$8 sps:$4 sm:$0xff]  }
 0x46d   : > { %v1102_v38 = vpop.permute.xlu1 %1101  ;;  %v1518_v39 = vld [vmem:[#allocation2 + $0x18] sm:$0xff]  ;;  %2768 = vmatprep.subr.bf16.mxu1 %v4172_v33  ;;  %v2053_v33 = vsel %vm576_vm0, %v2047_v61, %v2052_v21 }
 0x46e   : > { %1104 = vst.msk [vmem:[#allocation2 + $0xd0] sm:$0xf0] %vm1043_vm5, %v1102_v38  ;;  %3764 = vmatprep.mubr.msk.bf16.mxu1 %vm849_vm3, %v1518_v39  ;;  %v1969_v8 = vld [vmem:[#allocation2 + $0x18] sm:$0xf0]  ;;  %v2048_v2 = vsel %vm576_vm0, %v2046_v50, %v2047_v61  ;;  %v4185_v39 = vld [vmem:[%s5640_s6 + $0x1e0] ss:$8 sps:$4 sm:$0xff]  }
 0x46f   : > { %1105 = vst.msk [vmem:[#allocation2 + $0xe0] sm:$0xf] %vm1036_vm4, %v1102_v38  ;;  %v1457_v46 = vpop.permute.xlu0 %1456  ;;  %v4968_v47 = vld [vmem:[#allocation2 + $0xc0] sm:$0xff]  ;;  %v2049_v51 = vrot.slane %v1969_v8, 4  ;;  %v2060_v50 = vrot.slane %v4867_v17, 4  ;;  %v2064_v61 = vrot.slane %v4897_v42, 4 }
 0x470   : > { %1496 = vst.msk [vmem:[#allocation2 + $0x58] sm:$0xff] %vm849_vm3, %v1457_v46  ;;  %v1423_v55 = vshll.u32 %v4968_v47, 16  ;;  %2769 = vmatpush1.bf16.msra.mxu1 %v4170_v36  ;;  %v2056_v36 = vrot.slane %v4876_v26, 4 }
 0x471   : > { %v1455_v37 = vpop.permute.xlu1 %1454  ;;  %v1520_v49 = vld [vmem:[#allocation2 + $0x28] sm:$0xff]  ;;  %2770 = vmatprep.subr.bf16.mxu1 %v4175_v43  ;;  %v4190_v43 = vld [vmem:[%s5640_s6 + $0x1f4] ss:$8 sps:$4 sm:$0xff]  }
 0x472   : > { %1495 = vst.msk [vmem:[#allocation2 + $0x48] sm:$0xff] %vm849_vm3, %v1455_v37  ;;  %v2050_v54 = vrot.slane %v1520_v49, 4  ;;  %v4977_v57 = vrot.slane %v1423_v55, 1  ;;  %v2057_v46 = vsel %vm576_vm0, %v2052_v21, %v2056_v36 }
 0x473   : > { %1762 = vmatmul.mubr.bf16.gmra.mrb[24].mxu1 %v4842_v58  ;;  %v1461_v60 = vpop.permute.xlu0 %1460  ;;  %v4984_v62 = vld [vmem:[#allocation2 + $0x38] sm:$0xff] }
 0x474   : > { %1498 = vst.msk [vmem:[#allocation2 + $0x78] sm:$0xff] %vm849_vm3, %v1461_v60  ;;  %3765 = vmatprep.mubr.msk.bf16.mxu1 %vm849_vm3, %v1520_v49  ;;  %v2051_v40 = vsel %vm576_vm0, %v2049_v51, %v2050_v54  ;;  %v1426_v41 = vsel %vm1326_vm12, %v1421_v56, %v4977_v57  ;;  %v2054_v44 = vrot.slane %v4984_v62, 4  ;;  %2771 = vmatpush1.bf16.msra.mxu1 %v4173_v0  ;;  %v4176_v58 = vld [vmem:[%s5640_s6 + $0x1b0] ss:$8 sps:$4 sm:$0xff]   ;;  %v4193_v0 = vld [vmem:[%s5640_s6 + $0x204] ss:$8 sps:$4 sm:$0xff]  }
 0x475   : > { %3823 = vmatprep.mubr.msk.bf16.mxu0 %vm849_vm3, %v2051_v40  ;;  %v1459_v63 = vpop.permute.xlu1 %1458  ;;  %1468 = vrot.lane.b32.xlu0 %v1426_v41, %s4312_s15  ;;  %v1126_v4 = vld [vmem:[#allocation2 + $0xd0] sm:$0xff]  ;;  %v4191_v49 = vld [vmem:[%s5640_s6 + $0x200] ss:$8 sps:$4 sm:$0xff]   ;;  %v4199_v60 = vld [vmem:[%s5640_s6 + $0x224] ss:$8 sps:$4 sm:$0xff]  }
 0x476   : > { %v1127_v6 = vld [vmem:[#allocation2 + $0xe0] sm:$0xff]  ;;  %1497 = vst.msk [vmem:[#allocation2 + $0x68] sm:$0xff] %vm849_vm3, %v1459_v63  ;;  %2297 = vmatmul.mubr.bf16.vlgmr.msra.gmra.mrb[20].mxu0 %v2048_v2  ;;  %v2055_v9 = vsel %vm576_vm0, %v2050_v54, %v2054_v44  ;;  %v1232_v10 = vshrl.u32 %v1126_v4, 16  ;;  %2772 = vmatprep.subr.bf16.mxu1 %v4178_v3  ;;  %v1235_v15 = vshll.u32 %v1126_v4, 16  ;;  %v4196_v51 = vld [vmem:[%s5640_s6 + $0x214] ss:$8 sps:$4 sm:$0xff]   ;;  %v2061_v54 = vsel %vm576_vm0, %v2056_v36, %v2060_v50 }
 0x477   : > { %v1240_v11 = vshrl.u32 %v1127_v6, 16  ;;  %3824 = vmatprep.mubr.msk.bf16.mxu0 %vm849_vm3, %v2055_v9  ;;  %v1465_v12 = vpop.permute.xlu0 %1464  ;;  %v1243_v18 = vshll.u32 %v1127_v6, 16  ;;  %v5035_v38 = vld [vmem:[#allocation2 + $0x58] sm:$0xff]  ;;  %v4197_v41 = vld [vmem:[%s5640_s6 + $0x220] ss:$8 sps:$4 sm:$0xff]   ;;  %v2065_v63 = vsel %vm576_vm0, %v2060_v50, %v2064_v61  ;;  %v2068_v9 = vrot.slane %v4891_v34, 4 }
 0x478   : > { %1500 = vst.msk [vmem:[#allocation2 + $0x98] sm:$0xff] %vm849_vm3, %v1465_v12  ;;  %v1234_v14 = vrot.slane %v1232_v10, 7  ;;  %2773 = vmatpush1.bf16.msra.mxu1 %v4176_v58  ;;  %v2062_v45 = vrot.slane %v5035_v38, 4  ;;  %v4194_v3 = vld [vmem:[%s5640_s6 + $0x210] ss:$8 sps:$4 sm:$0xff]   ;;  %v2072_v12 = vrot.slane %v4913_v52, 4 }
 0x479   : > { %v1242_v16 = vrot.slane %v1240_v11, 7  ;;  %v1463_v19 = vpop.permute.xlu1 %1462  ;;  %v5006_v22 = vld [vmem:[#allocation2 + $0x48] sm:$0xff]  ;;  %2774 = vmatprep.subr.bf16.mxu1 %v4181_v7  ;;  %v4200_v4 = vld [vmem:[%s5640_s6 + $0x230] ss:$8 sps:$4 sm:$0xff]   ;;  %v2069_v10 = vsel %vm576_vm0, %v2064_v61, %v2068_v9 }
 0x47a   : > { %1499 = vst.msk [vmem:[#allocation2 + $0x88] sm:$0xff] %vm849_vm3, %v1463_v19  ;;  %v1237_v13 = vor.u32 %v1235_v15, %v1234_v14  ;;  %v2058_v27 = vrot.slane %v5006_v22, 4 }
 0x47b   : > { %v1245_v25 = vor.u32 %v1243_v18, %v1242_v16  ;;  %1772 = vmatmul.mubr.bf16.gmra.mrb[28].mxu1 %v4844_v59  ;;  %v5079_v40 = vld [vmem:[#allocation2 + $0x78] sm:$0xff]  ;;  %v2073_v16 = vsel %vm576_vm0, %v2068_v9, %v2072_v12 }
 0x47c   : > { %3766 = vmatprep.mubr.msk.bf16.mxu1 %vm849_vm3, %v4984_v62  ;;  %v1238_v30 = vsel %vm1108_vm8, %v4873_v20, %v1237_v13  ;;  %v2059_v59 = vsel %vm576_vm0, %v2054_v44, %v2058_v27  ;;  %2775 = vmatpush1.bf16.msra.mxu1 %v4179_v28  ;;  %v4187_v20 = vld [vmem:[%s5640_s6 + $0x1e4] ss:$8 sps:$4 sm:$0xff]   ;;  %v2063_v8 = vsel %vm576_vm0, %v2058_v27, %v2062_v45  ;;  %v4202_v44 = vld [vmem:[%s5640_s6 + $0x234] ss:$8 sps:$4 sm:$0xff]   ;;  %v2070_v58 = vrot.slane %v5079_v40, 4 }
 0x47d   : > { %v1246_v31 = vsel %vm1108_vm8, %v1234_v14, %v1245_v25  ;;  %1273 = vrot.lane.b32.xlu1 %v1238_v30, %s4312_s15  ;;  %v1467_v32 = vpop.permute.xlu1 %1466  ;;  %2776 = vmatprep.subr.bf16.mxu1 %v4184_v29  ;;  %v5053_v55 = vld [vmem:[#allocation2 + $0x68] sm:$0xff]  ;;  %v2076_v13 = vrot.slane %v4905_v24, 4  ;;  %v2080_v28 = vrot.slane %v4915_v53, 4 }
 0x47e   : > { %1275 = vrot.lane.b32.xlu0 %v1246_v31, %s4312_s15  ;;  %1501 = vst.msk [vmem:[#allocation2 + $0xa8] sm:$0xff] %vm849_vm3, %v1467_v32  ;;  %2307 = vmatmul.mubr.bf16.gmra.mrb[24].mxu0 %v2053_v33  ;;  %v2066_v37 = vrot.slane %v5053_v55, 4 }
 0x47f   : > { %3825 = vmatprep.mubr.msk.bf16.mxu0 %vm849_vm3, %v2059_v59  ;;  %v5108_v14 = vld [vmem:[#allocation2 + $0x98] sm:$0xff]  ;;  %v2077_v25 = vsel %vm576_vm0, %v2072_v12, %v2076_v13  ;;  %v2081_v29 = vsel %vm576_vm0, %v2076_v13, %v2080_v28  ;;  %v2084_v59 = vrot.slane %v4927_v5, 4 }
 0x480   : > { %2777 = vmatpush1.bf16.msra.mxu1 %v4182_v35  ;;  %v2067_v56 = vsel %vm576_vm0, %v2062_v45, %v2066_v37  ;;  %v2071_v2 = vsel %vm576_vm0, %v2066_v37, %v2070_v58  ;;  %v2078_v15 = vrot.slane %v5108_v14, 4  ;;  %v1427_v45 = vshrl.u32 %v4968_v47, 16 }
 0x481   : > { %2778 = vmatprep.subr.bf16.mxu1 %v4187_v20  ;;  %v5097_v6 = vld [vmem:[#allocation2 + $0x88] sm:$0xff]  ;;  %v2085_v36 = vsel %vm576_vm0, %v2080_v28, %v2084_v59  ;;  %v4209_v28 = vld [vmem:[%s5642_s8 + $0x30] sm:$0xff]  }
 0x482   : > { %v2074_v7 = vrot.slane %v5097_v6, 4 }
 0x483   : > { %1782 = vmatmul.mubr.bf16.gmra.mrb[32].mxu1 %v4856_v1 }
 0x484   : > { %3767 = vmatprep.mubr.msk.bf16.mxu1 %vm849_vm3, %v5006_v22  ;;  %2779 = vmatpush1.bf16.msra.mxu1 %v4185_v39  ;;  %v2075_v11 = vsel %vm576_vm0, %v2070_v58, %v2074_v7  ;;  %v2079_v18 = vsel %vm576_vm0, %v2074_v7, %v2078_v15 }
 0x485   : > { %2780 = vmatprep.subr.bf16.mxu1 %v4190_v43  ;;  %v5117_v19 = vld [vmem:[#allocation2 + $0xa8] sm:$0xff] }
 0x486   : > { %2317 = vmatmul.mubr.bf16.gmra.mrb[28].mxu0 %v2057_v46  ;;  %v2082_v21 = vrot.slane %v5117_v19, 4 }
 0x487   : > { %3826 = vmatprep.mubr.msk.bf16.mxu0 %vm849_vm3, %v2063_v8  ;;  %v1429_v8 = vor.u32 %v1427_v45, %v4977_v57  ;;  %v4203_v57 = vld [vmem:[%s5642_s8] sm:$0xff]  }
 0x488   : > { %2781 = vmatpush1.bf16.msra.mxu1 %v4188_v48  ;;  %v2083_v27 = vsel %vm576_vm0, %v2078_v15, %v2082_v21  ;;  %3383 = vmatpush1.bf16.msra.mxu0 %v4203_v57 }
 0x489   : > { %2782 = vmatprep.subr.bf16.mxu1 %v4193_v0  ;;  %3384 = vmatprep.subr.bf16.mxu0 %v4311_v23 }
 0x48b   : > { %1792 = vmatmul.mubr.bf16.gmra.mrb[36].mxu1 %v4876_v26 }
 0x48c   : > { %3768 = vmatprep.mubr.msk.bf16.mxu1 %vm849_vm3, %v5035_v38  ;;  %2783 = vmatpush1.bf16.msra.mxu1 %v4191_v49 }
 0x48d   : > { %2784 = vmatprep.subr.bf16.mxu1 %v4196_v51 }
 0x48e   : > { %2327 = vmatmul.mubr.bf16.gmra.mrb[32].mxu0 %v2061_v54 }
 0x48f   : > { %3827 = vmatprep.mubr.msk.bf16.mxu0 %vm849_vm3, %v2067_v56 }
 0x490   : > { %2785 = vmatpush1.bf16.msra.mxu1 %v4194_v3 }
 0x491   : > { %2786 = vmatprep.subr.bf16.mxu1 %v4199_v60 }
 0x493   : > { %1802 = vmatmul.mubr.bf16.gmra.mrb[40].mxu1 %v4867_v17 }
 0x494   : > { %3769 = vmatprep.mubr.msk.bf16.mxu1 %vm849_vm3, %v5053_v55  ;;  %2787 = vmatpush1.bf16.msra.mxu1 %v4197_v41 }
 0x495   : > { %2788 = vmatprep.subr.bf16.mxu1 %v4202_v44 }
 0x496   : > { %2337 = vmatmul.mubr.bf16.gmra.mrb[36].mxu0 %v2065_v63 }
 0x497   : > { %3828 = vmatprep.mubr.msk.bf16.mxu0 %vm849_vm3, %v2071_v2 }
 0x498   : > { %2789 = vmatpush1.bf16.msra.mxu1 %v4200_v4  ;;  %v4207_v4 = vld [vmem:[%s5642_s8 + $0x20] sm:$0xff]  }
 0x49b   : > { %1812 = vmatmul.mubr.bf16.gmra.mrb[44].mxu1 %v4897_v42 }
 0x49c   : > { %3770 = vmatprep.mubr.msk.bf16.mxu1 %vm849_vm3, %v5079_v40 }
 0x49e   : > { %2347 = vmatmul.mubr.bf16.gmra.mrb[40].mxu0 %v2069_v10 }
 0x49f   : > { %3829 = vmatprep.mubr.msk.bf16.mxu0 %vm849_vm3, %v2075_v11  ;;  %v4208_v11 = vld [vmem:[%s5642_s8 + $0x28] sm:$0xff]  }
 0x4a3   : > { %1822 = vmatmul.mubr.bf16.gmra.mrb[48].mxu1 %v4891_v34 }
 0x4a4   : > { %3771 = vmatprep.mubr.msk.bf16.mxu1 %vm849_vm3, %v5097_v6 }
 0x4a6   : > { %2357 = vmatmul.mubr.bf16.gmra.mrb[44].mxu0 %v2073_v16 }
 0x4a7   : > { %3830 = vmatprep.mubr.msk.bf16.mxu0 %vm849_vm3, %v2079_v18 }
 0x4ab   : > { %1832 = vmatmul.mubr.bf16.gmra.mrb[52].mxu1 %v4913_v52 }
 0x4ac   : > { %3772 = vmatprep.mubr.msk.bf16.mxu1 %vm849_vm3, %v5108_v14 }
 0x4ae   : > { %2367 = vmatmul.mubr.bf16.gmra.mrb[48].mxu0 %v2077_v25 }
 0x4af   : > { %3831 = vmatprep.mubr.msk.bf16.mxu0 %vm849_vm3, %v2083_v27 }
 0x4b3   : > { %1842 = vmatmul.mubr.bf16.gmra.mrb[56].mxu1 %v4905_v24 }
 0x4b4   : > { %3773 = vmatprep.mubr.msk.bf16.mxu1 %vm849_vm3, %v5117_v19 }
 0x4b6   : > { %2377 = vmatmul.mubr.bf16.gmra.mrb[52].mxu0 %v2081_v29 }
 0x4bb   : > { %1852 = vmatmul.mubr.bf16.gmra.mrb[60].mxu1 %v4915_v53 }
 0x4e7   : > { %v1469_v30 = vpop.permute.xlu0 %1468 }
 0x4e8   : > { %1502 = vst.msk [vmem:[#allocation2 + $0xb8] sm:$0xff] %vm849_vm3, %v1469_v30 }
 0x4ef   : > { %v1274_v31 = vpop.permute.xlu1 %1273  ;;  %v5134_v33 = vld [vmem:[#allocation2 + $0xb8] sm:$0xff] }
 0x4f0   : > { %v1276_v32 = vpop.permute.xlu0 %1275  ;;  %1309 = vst.msk [vmem:[#allocation2 + $0xd0] sm:$0xff] %vm849_vm3, %v1274_v31  ;;  %3774 = vmatprep.mubr.msk.bf16.mxu1 %vm849_vm3, %v5134_v33  ;;  %v2086_v35 = vrot.slane %v5134_v33, 4 }
 0x4f1   : > { %1310 = vst.msk [vmem:[#allocation2 + $0xe0] sm:$0xff] %vm849_vm3, %v1276_v32  ;;  %1862 = vmatmul.mubr.bf16.gmra.mrb[64].mxu1 %v4927_v5 }
 0x4f2   : > { %3883 = vmatprep.mubr.msk.bf16.mxu1 %vm849_vm3, %v4984_v62  ;;  %v2087_v20 = vsel %vm576_vm0, %v2082_v21, %v2086_v35 }
 0x4f3   : > { %3832 = vmatprep.mubr.msk.bf16.mxu0 %vm849_vm3, %v2087_v20  ;;  %v4210_v20 = vld [vmem:[%s5642_s8 + $0x38] sm:$0xff]  }
 0x4f4   : > { %2387 = vmatmul.mubr.bf16.gmra.mrb[56].mxu0 %v2085_v36 }
 0x4f7   : > { %v5152_v39 = vld [vmem:[#allocation2 + $0xd0] sm:$0xff] }
 0x4f8   : > { %v5154_v43 = vld [vmem:[#allocation2 + $0xe0] sm:$0xff]  ;;  %v1431_v46 = vshll.u32 %v5152_v39, 16  ;;  %v1435_v0 = vshrl.u32 %v5152_v39, 16 }
 0x4f9   : > { %v1439_v62 = vshll.u32 %v5154_v43, 16  ;;  %2799 = vmatmul.mubr.bf16.vlgmr.msra.gmra.mrb[68].mxu1 %v4856_v1  ;;  %v1443_v51 = vshrl.u32 %v5154_v43, 16 }
 0x4fa   : > { %3884 = vmatprep.mubr.msk.bf16.mxu1 %vm849_vm3, %v5006_v22  ;;  %v1433_v48 = vrot.slane %v1431_v46, 1 }
 0x4fb   : > { %v1441_v37 = vrot.slane %v1439_v62, 1 }
 0x4fc   : > { %v1434_v49 = vsel %vm1326_vm12, %v1429_v8, %v1433_v48  ;;  %v1437_v50 = vor.u32 %v1435_v0, %v1433_v48 }
 0x4fd   : > { %1470 = vrot.lane.b32.xlu1 %v1434_v49, %s4312_s15  ;;  %v1445_v1 = vor.u32 %v1443_v51, %v1441_v37  ;;  %v4211_v51 = vld [vmem:[%s5642_s8 + $0x40] sm:$0xff]  }
 0x4fe   : > { %v1442_v54 = vsel %vm1326_vm12, %v1437_v50, %v1441_v37 }
 0x4ff   : > { %1472 = vrot.lane.b32.xlu0 %v1442_v54, %s4312_s15 }
 0x501   : > { %2809 = vmatmul.mubr.bf16.gmra.mrb[72].mxu1 %v4876_v26  ;;  %1474 = vrot.lane.b32.xlu1 %v1445_v1, %s4312_s15  ;;  %v4204_v26 = vld [vmem:[%s5642_s8 + $0x8] sm:$0xff]   ;;  %s5551_s15 = scalar_lea.hbm %s5644_s10, %s3923_s4 }
 0x502   : > { %3885 = vmatprep.mubr.msk.bf16.mxu1 %vm849_vm3, %v5035_v38  ;;  %3385 = vmatpush1.bf16.msra.mxu0 %v4204_v26 }
 0x503   : > { %3386 = vmatprep.subr.bf16.mxu0 %v4311_v23 }
 0x509   : > { %2819 = vmatmul.mubr.bf16.gmra.mrb[76].mxu1 %v4867_v17  ;;  %v4205_v17 = vld [vmem:[%s5642_s8 + $0x10] sm:$0xff]  }
 0x50a   : > { %3886 = vmatprep.mubr.msk.bf16.mxu1 %vm849_vm3, %v5053_v55  ;;  %3387 = vmatpush1.bf16.msra.mxu0 %v4205_v17  ;;  %v4212_v17 = vld [vmem:[%s5642_s8 + $0x48] sm:$0xff]  }
 0x50b   : > { %3388 = vmatprep.subr.bf16.mxu0 %v4311_v23 }
 0x511   : > { %2829 = vmatmul.mubr.bf16.gmra.mrb[80].mxu1 %v4897_v42 }
 0x512   : > { %3887 = vmatprep.mubr.msk.bf16.mxu1 %vm849_vm3, %v5079_v40 }
 0x519   : > { %2839 = vmatmul.mubr.bf16.gmra.mrb[84].mxu1 %v4891_v34 }
 0x51a   : > { %3888 = vmatprep.mubr.msk.bf16.mxu1 %vm849_vm3, %v5097_v6 }
 0x521   : > { %2849 = vmatmul.mubr.bf16.gmra.mrb[88].mxu1 %v4913_v52 }
 0x522   : > { %3889 = vmatprep.mubr.msk.bf16.mxu1 %vm849_vm3, %v5108_v14 }
 0x529   : > { %2859 = vmatmul.mubr.bf16.gmra.mrb[92].mxu1 %v4905_v24  ;;  %v4206_v24 = vld [vmem:[%s5642_s8 + $0x18] sm:$0xff]  }
 0x52a   : > { %3890 = vmatprep.mubr.msk.bf16.mxu1 %vm849_vm3, %v5117_v19  ;;  %3389 = vmatpush1.bf16.msra.mxu0 %v4206_v24 }
 0x52b   : > { %3390 = vmatprep.subr.bf16.mxu0 %v4311_v23 }
 0x52e   : > { %3391 = vmatpush1.bf16.msra.mxu0 %v4207_v4 }
 0x52f   : > { %3392 = vmatprep.subr.bf16.mxu0 %v4311_v23 }
 0x531   : > { %2869 = vmatmul.mubr.bf16.gmra.mrb[96].mxu1 %v4915_v53 }
 0x532   : > { %3891 = vmatprep.mubr.msk.bf16.mxu1 %vm849_vm3, %v5134_v33  ;;  %3393 = vmatpush1.bf16.msra.mxu0 %v4208_v11  ;;  %v1992_v33 = vld [vmem:[#allocation2 + $0xd0] sm:$0xf] }
 0x533   : > { %3394 = vmatprep.subr.bf16.mxu0 %v4311_v23 }
 0x536   : > { %3395 = vmatpush1.bf16.msra.mxu0 %v4209_v28 }
 0x537   : > { %3396 = vmatprep.subr.bf16.mxu0 %v4311_v23 }
 0x539   : > { %2879 = vmatmul.mubr.bf16.gmra.mrb[100].mxu1 %v4927_v5 }
 0x53a   : > { %3397 = vmatpush1.bf16.msra.mxu0 %v4210_v20 }
 0x53b   : > { %3398 = vmatprep.subr.bf16.mxu0 %v4311_v23 }
 0x53e   : > { %v1753_v34 = vpop.f32.mrb[20].mxu1  ;;  %3399 = vmatpush1.bf16.msra.mxu0 %v4211_v51 }
 0x53f   : > { %v1755_v42 = vpop.f32.mrb[21].mxu1  ;;  %3400 = vmatprep.subr.bf16.mxu0 %v4311_v23 }
 0x540   : > { %1873 = vst.msk [vmem:[#allocation3 + $0x8] sm:$0xff] %vm849_vm3, %v1755_v42  ;;  %v1757_v52 = vpop.f32.mrb[22].mxu1 }
 0x541   : > { %v1759_v22 = vpop.f32.mrb[23].mxu1 }
 0x542   : > { %1875 = vst.msk [vmem:[#allocation3 + $0x18] sm:$0xff] %vm849_vm3, %v1759_v22  ;;  %3401 = vmatpush1.bf16.msra.mxu0 %v4212_v17  ;;  %v2088_v17 = vrot.slane %v4968_v47, 4 }
 0x543   : > { %3402 = vmatprep.subr.bf16.mxu0 %v4311_v23 }
 0x546   : > { %v1763_v38 = vpop.f32.mrb[24].mxu1 }
 0x547   : > { %v1765_v55 = vpop.f32.mrb[25].mxu1  ;;  %v1921_v61 = vld [vmem:[#allocation3 + $0x8] sm:$0xff] }
 0x548   : > { %1877 = vst.msk [vmem:[#allocation3 + $0x28] sm:$0xff] %vm849_vm3, %v1765_v55  ;;  %v1767_v53 = vpop.f32.mrb[26].mxu1 }
 0x549   : > { %v1769_v56 = vpop.f32.mrb[27].mxu1  ;;  %v2298_v3 = vpop.f32.mrb[20].mxu0  ;;  %v1923_v63 = vld [vmem:[#allocation3 + $0x18] sm:$0xff] }
 0x54a   : > { %1879 = vst.msk [vmem:[#allocation3 + $0x38] sm:$0xff] %vm849_vm3, %v1769_v56  ;;  %v5212_v60 = vadd.f32 %v2298_v3, %v1753_v34  ;;  %v2300_v40 = vpop.f32.mrb[21].mxu0 }
 0x54b   : > { %v2418_v41 = vadd.f32 %v2300_v40, %v1921_v61  ;;  %v2302_v44 = vpop.f32.mrb[22].mxu0  ;;  %v4213_v61 = vld [vmem:[%s5642_s8 + $0x50] sm:$0xff]  }
 0x54c   : > { %v5214_v58 = vadd.f32 %v2302_v44, %v1757_v52  ;;  %v2304_v2 = vpop.f32.mrb[23].mxu0  ;;  %3403 = vmatpush1.bf16.msra.mxu0 %v4213_v61 }
 0x54d   : > { %2466 = vst.msk [vmem:[#allocation3 + $0x8] sm:$0xff] %vm849_vm3, %v2418_v41  ;;  %v2420_v6 = vadd.f32 %v2304_v2, %v1923_v63  ;;  %3404 = vmatprep.subr.bf16.mxu0 %v4311_v23  ;;  %v4214_v2 = vld [vmem:[%s5642_s8 + $0x58] sm:$0xff]  }
 0x54e   : > { %v1773_v7 = vpop.f32.mrb[28].mxu1 }
 0x54f   : > { %2468 = vst.msk [vmem:[#allocation3 + $0x18] sm:$0xff] %vm849_vm3, %v2420_v6  ;;  %v1775_v9 = vpop.f32.mrb[29].mxu1  ;;  %v1925_v16 = vld [vmem:[#allocation3 + $0x28] sm:$0xff] }
 0x550   : > { %1881 = vst.msk [vmem:[#allocation3 + $0x48] sm:$0xff] %vm849_vm3, %v1775_v9  ;;  %v1777_v10 = vpop.f32.mrb[30].mxu1  ;;  %3405 = vmatpush1.bf16.msra.mxu0 %v4214_v2 }
 0x551   : > { %v1779_v12 = vpop.f32.mrb[31].mxu1  ;;  %v2308_v14 = vpop.f32.mrb[24].mxu0  ;;  %v1927_v25 = vld [vmem:[#allocation3 + $0x38] sm:$0xff] }
 0x552   : > { %1883 = vst.msk [vmem:[#allocation3 + $0x58] sm:$0xff] %vm849_vm3, %v1779_v12  ;;  %v5227_v15 = vadd.f32 %v2308_v14, %v1763_v38  ;;  %v2310_v18 = vpop.f32.mrb[25].mxu0 }
 0x553   : > { %v2422_v19 = vadd.f32 %v2310_v18, %v1925_v16  ;;  %v2312_v21 = vpop.f32.mrb[26].mxu0 }
 0x554   : > { %v5230_v13 = vadd.f32 %v2312_v21, %v1767_v53  ;;  %v2314_v27 = vpop.f32.mrb[27].mxu0 }
 0x555   : > { %2470 = vst.msk [vmem:[#allocation3 + $0x28] sm:$0xff] %vm849_vm3, %v2422_v19  ;;  %v2424_v29 = vadd.f32 %v2314_v27, %v1927_v25 }
 0x556   : > { %v1783_v30 = vpop.f32.mrb[32].mxu1 }
 0x557   : > { %2472 = vst.msk [vmem:[#allocation3 + $0x38] sm:$0xff] %vm849_vm3, %v2424_v29  ;;  %v1785_v31 = vpop.f32.mrb[33].mxu1  ;;  %v1929_v62 = vld [vmem:[#allocation3 + $0x48] sm:$0xff] }
 0x558   : > { %1885 = vst.msk [vmem:[#allocation3 + $0x68] sm:$0xff] %vm849_vm3, %v1785_v31  ;;  %v1787_v32 = vpop.f32.mrb[34].mxu1  ;;  %v1506_v31 = vld [vmem:[#allocation2 + $0xe8] sm:$0xff] }
 0x559   : > { %v1789_v36 = vpop.f32.mrb[35].mxu1  ;;  %v2318_v45 = vpop.f32.mrb[28].mxu0  ;;  %v1931_v49 = vld [vmem:[#allocation3 + $0x58] sm:$0xff] }
 0x55a   : > { %1887 = vst.msk [vmem:[#allocation3 + $0x78] sm:$0xff] %vm849_vm3, %v1789_v36  ;;  %v5243_v46 = vadd.f32 %v2318_v45, %v1773_v7  ;;  %v2320_v8 = vpop.f32.mrb[29].mxu0 }
 0x55b   : > { %v2426_v48 = vadd.f32 %v2320_v8, %v1929_v62  ;;  %v2322_v0 = vpop.f32.mrb[30].mxu0 }
 0x55c   : > { %v5246_v37 = vadd.f32 %v2322_v0, %v1777_v10  ;;  %v2324_v50 = vpop.f32.mrb[31].mxu0 }
 0x55d   : > { %2474 = vst.msk [vmem:[#allocation3 + $0x48] sm:$0xff] %vm849_vm3, %v2426_v48  ;;  %v2428_v54 = vadd.f32 %v2324_v50, %v1931_v49 }
 0x55e   : > { %v1793_v1 = vpop.f32.mrb[36].mxu1 }
 0x55f   : > { %2476 = vst.msk [vmem:[#allocation3 + $0x58] sm:$0xff] %vm849_vm3, %v2428_v54  ;;  %v1795_v57 = vpop.f32.mrb[37].mxu1  ;;  %v1933_v22 = vld [vmem:[#allocation3 + $0x68] sm:$0xff] }
 0x560   : > { %1889 = vst.msk [vmem:[#allocation3 + $0x88] sm:$0xff] %vm849_vm3, %v1795_v57  ;;  %v1797_v26 = vpop.f32.mrb[38].mxu1 }
 0x561   : > { %v1799_v34 = vpop.f32.mrb[39].mxu1  ;;  %v2328_v42 = vpop.f32.mrb[32].mxu0  ;;  %v1935_v56 = vld [vmem:[#allocation3 + $0x78] sm:$0xff] }
 0x562   : > { %1891 = vst.msk [vmem:[#allocation3 + $0x98] sm:$0xff] %vm849_vm3, %v1799_v34  ;;  %v5259_v52 = vadd.f32 %v2328_v42, %v1783_v30  ;;  %v2330_v38 = vpop.f32.mrb[33].mxu0 }
 0x563   : > { %v2430_v24 = vadd.f32 %v2330_v38, %v1933_v22  ;;  %v2332_v55 = vpop.f32.mrb[34].mxu0 }
 0x564   : > { %v5262_v53 = vadd.f32 %v2332_v55, %v1787_v32  ;;  %v2334_v3 = vpop.f32.mrb[35].mxu0 }
 0x565   : > { %2478 = vst.msk [vmem:[#allocation3 + $0x68] sm:$0xff] %vm849_vm3, %v2430_v24  ;;  %v2432_v40 = vadd.f32 %v2334_v3, %v1935_v56 }
 0x566   : > { %v1803_v41 = vpop.f32.mrb[40].mxu1 }
 0x567   : > { %2480 = vst.msk [vmem:[#allocation3 + $0x78] sm:$0xff] %vm849_vm3, %v2432_v40  ;;  %v1805_v44 = vpop.f32.mrb[41].mxu1  ;;  %v1937_v9 = vld [vmem:[#allocation3 + $0x88] sm:$0xff] }
 0x568   : > { %1893 = vst.msk [vmem:[#allocation3 + $0xa8] sm:$0xff] %vm849_vm3, %v1805_v44  ;;  %v1807_v63 = vpop.f32.mrb[42].mxu1 }
 0x569   : > { %v1809_v4 = vpop.f32.mrb[43].mxu1  ;;  %v2338_v6 = vpop.f32.mrb[36].mxu0  ;;  %v1939_v23 = vld [vmem:[#allocation3 + $0x98] sm:$0xff] }
 0x56a   : > { %1895 = vst.msk [vmem:[#allocation3 + $0xb8] sm:$0xff] %vm849_vm3, %v1809_v4  ;;  %v5275_v7 = vadd.f32 %v2338_v6, %v1793_v1  ;;  %v2340_v10 = vpop.f32.mrb[37].mxu0 }
 0x56b   : > { %v2434_v11 = vadd.f32 %v2340_v10, %v1937_v9  ;;  %v2342_v12 = vpop.f32.mrb[38].mxu0 }
 0x56c   : > { %v5277_v14 = vadd.f32 %v2342_v12, %v1797_v26  ;;  %v2344_v16 = vpop.f32.mrb[39].mxu0 }
 0x56d   : > { %2482 = vst.msk [vmem:[#allocation3 + $0x88] sm:$0xff] %vm849_vm3, %v2434_v11  ;;  %v2436_v18 = vadd.f32 %v2344_v16, %v1939_v23  ;;  %v2092_v23 = vrot.slane %v1992_v33, 4  ;;  %v3063_v33 = vld [vmem:[%s5641_s7] sm:$0x3] }
 0x56e   : > { %v1813_v19 = vpop.f32.mrb[44].mxu1 }
 0x56f   : > { %2484 = vst.msk [vmem:[#allocation3 + $0x98] sm:$0xff] %vm849_vm3, %v2436_v18  ;;  %v1471_v21 = vpop.permute.xlu1 %1470  ;;  %v1815_v25 = vpop.f32.mrb[45].mxu1  ;;  %v1941_v36 = vld [vmem:[#allocation3 + $0xa8] sm:$0xff]  ;;  %v2093_v30 = vsel %vm576_vm0, %v2088_v17, %v2092_v23 }
 0x570   : > { %1503 = vst.msk [vmem:[#allocation2 + $0xc8] sm:$0xff] %vm849_vm3, %v1471_v21  ;;  %1897 = vst.msk [vmem:[#allocation3 + $0xc8] sm:$0xff] %vm849_vm3, %v1815_v25  ;;  %v1817_v27 = vpop.f32.mrb[46].mxu1 }
 0x571   : > { %v1819_v28 = vpop.f32.mrb[47].mxu1  ;;  %v2348_v29 = vpop.f32.mrb[40].mxu0  ;;  %v1943_v50 = vld [vmem:[#allocation3 + $0xb8] sm:$0xff] }
 0x572   : > { %1899 = vst.msk [vmem:[#allocation3 + $0xd8] sm:$0xff] %vm849_vm3, %v1819_v28  ;;  %v5290_v32 = vadd.f32 %v2348_v29, %v1803_v41  ;;  %v1473_v20 = vpop.permute.xlu0 %1472  ;;  %v2350_v45 = vpop.f32.mrb[41].mxu0 }
 0x573   : > { %1504 = vst.msk [vmem:[#allocation2 + $0xd8] sm:$0xff] %vm849_vm3, %v1473_v20  ;;  %v2438_v62 = vadd.f32 %v2350_v45, %v1941_v36  ;;  %v2352_v8 = vpop.f32.mrb[42].mxu0  ;;  %v1475_v48 = vpop.permute.xlu1 %1474 }
 0x574   : > { %v5293_v0 = vadd.f32 %v2352_v8, %v1807_v63  ;;  %v1507_v49 = vsel %vm5285_vm13, %v1475_v48, %v1506_v31  ;;  %v2354_v51 = vpop.f32.mrb[43].mxu0 }
 0x575   : > { %2486 = vst.msk [vmem:[#allocation3 + $0xa8] sm:$0xff] %vm849_vm3, %v2438_v62  ;;  %1508 = vst [vmem:[#allocation2 + $0xe8] sm:$0xff] %v1507_v49  ;;  %v2440_v54 = vadd.f32 %v2354_v51, %v1943_v50 }
 0x576   : > { %v1823_v1 = vpop.f32.mrb[48].mxu1 }
 0x577   : > { %2488 = vst.msk [vmem:[#allocation3 + $0xb8] sm:$0xff] %vm849_vm3, %v2440_v54  ;;  %v1825_v57 = vpop.f32.mrb[49].mxu1  ;;  %v2580_v26 = vld [vmem:[#allocation2 + $0xc8] sm:$0xff]  ;;  %v1945_v56 = vld [vmem:[#allocation3 + $0xc8] sm:$0xff] }
 0x578   : > { %1901 = vst.msk [vmem:[#allocation3 + $0xe8] sm:$0xff] %vm849_vm3, %v1825_v57  ;;  %v1827_v34 = vpop.f32.mrb[50].mxu1  ;;  %3892 = vmatprep.mubr.msk.bf16.mxu1 %vm849_vm3, %v2580_v26  ;;  %v2090_v42 = vrot.slane %v2580_v26, 4 }
 0x579   : > { %v1829_v38 = vpop.f32.mrb[51].mxu1  ;;  %v2358_v24 = vpop.f32.mrb[44].mxu0  ;;  %2889 = vmatmul.mubr.bf16.gmra.mrb[104].mxu1 %v4968_v47  ;;  %v2089_v47 = vsel %vm576_vm0, %v2084_v59, %v2088_v17  ;;  %v1947_v9 = vld [vmem:[#allocation3 + $0xd8] sm:$0xff] }
 0x57a   : > { %1903 = vst.msk [vmem:[#allocation3 + $0xf8] sm:$0xff] %vm849_vm3, %v1829_v38  ;;  %v5308_v55 = vadd.f32 %v2358_v24, %v1813_v19  ;;  %v2360_v3 = vpop.f32.mrb[45].mxu0  ;;  %v2582_v61 = vld [vmem:[#allocation2 + $0xd8] sm:$0xff]  ;;  %v2091_v40 = vsel %vm576_vm0, %v2086_v35, %v2090_v42 }
 0x57b   : > { %v1993_v41 = vld [vmem:[#allocation2 + $0xd8] sm:$0xf]  ;;  %v2442_v44 = vadd.f32 %v2360_v3, %v1945_v56  ;;  %3893 = vmatprep.mubr.msk.bf16.mxu1 %vm849_vm3, %v2582_v61  ;;  %v2362_v63 = vpop.f32.mrb[46].mxu0  ;;  %3833 = vmatprep.mubr.msk.bf16.mxu0 %vm849_vm3, %v2091_v40  ;;  %v3065_v3 = vlaneseq }
 0x57c   : > { %v2094_v2 = vrot.slane %v1993_v41, 4  ;;  %v1512_v4 = vld [vmem:[#allocation2 + $0xe8] sm:$0x80]  ;;  %v5318_v6 = vadd.f32 %v2362_v63, %v1817_v27  ;;  %v2364_v10 = vpop.f32.mrb[47].mxu0  ;;  %2397 = vmatmul.mubr.bf16.gmra.mrb[60].mxu0 %v2089_v47 }
 0x57d   : > { %v1513_v35 = vsel %vm5302_vm1, 0, %v1512_v4  ;;  %2490 = vst.msk [vmem:[#allocation3 + $0xc8] sm:$0xff] %vm849_vm3, %v2442_v44  ;;  %v2444_v11 = vadd.f32 %v2364_v10, %v1947_v9  ;;  %v3066_v61 = vshrl.u32 %v3065_v3, 7 }
 0x57e   : > { %v2095_v12 = vsel %vm576_vm0, %v2090_v42, %v2094_v2  ;;  %1514 = vst [vmem:[#allocation2 + $0xe8] sm:$0x80] %v1513_v35  ;;  %v1833_v5 = vpop.f32.mrb[52].mxu1 }
 0x57f   : > { %3834 = vmatprep.mubr.msk.bf16.mxu0 %vm849_vm3, %v2095_v12  ;;  %2492 = vst.msk [vmem:[#allocation3 + $0xd8] sm:$0xff] %vm849_vm3, %v2444_v11  ;;  %v1835_v59 = vpop.f32.mrb[53].mxu1  ;;  %v1949_v25 = vld [vmem:[#allocation3 + $0xe8] sm:$0xff]  ;;  %v3067_v2 = vsub.s32 0, %v3066_v61 }
 0x580   : > { %1905 = vst.msk [vmem:[#allocation3 + $0x108] sm:$0xff] %vm849_vm3, %v1835_v59  ;;  %v1837_v16 = vpop.f32.mrb[54].mxu1 }
 0x581   : > { %v1839_v18 = vpop.f32.mrb[55].mxu1  ;;  %v2368_v19 = vpop.f32.mrb[48].mxu0  ;;  %2899 = vmatmul.mubr.bf16.gmra.mrb[108].mxu1 %v5152_v39  ;;  %v1951_v20 = vld [vmem:[#allocation3 + $0xf8] sm:$0xff] }
 0x582   : > { %1907 = vst.msk [vmem:[#allocation3 + $0x118] sm:$0xff] %vm849_vm3, %v1839_v18  ;;  %v5329_v21 = vadd.f32 %v2368_v19, %v1823_v1  ;;  %v2370_v27 = vpop.f32.mrb[49].mxu0 }
 0x583   : > { %v2446_v28 = vadd.f32 %v2370_v27, %v1949_v25  ;;  %v2372_v29 = vpop.f32.mrb[50].mxu0  ;;  %v2514_v25 = vld [vmem:[#allocation3 + $0x8] sm:$0xff] }
 0x584   : > { %v5332_v31 = vadd.f32 %v2372_v29, %v1827_v34  ;;  %v2374_v36 = vpop.f32.mrb[51].mxu0  ;;  %2407 = vmatmul.mubr.bf16.gmra.mrb[64].mxu0 %v2093_v30 }
 0x585   : > { %2494 = vst.msk [vmem:[#allocation3 + $0xe8] sm:$0xff] %vm849_vm3, %v2446_v28  ;;  %v2448_v45 = vadd.f32 %v2374_v36, %v1951_v20  ;;  %v2584_v62 = vld [vmem:[#allocation2 + $0xe8] sm:$0xff] }
 0x586   : > { %v1843_v39 = vpop.f32.mrb[56].mxu1  ;;  %3894 = vmatprep.mubr.msk.bf16.mxu1 %vm849_vm3, %v2584_v62  ;;  %v2516_v36 = vld [vmem:[#allocation3 + $0x18] sm:$0xff]  ;;  %v3071_v62 = vsub.s32 1, %v3066_v61 }
 0x587   : > { %2496 = vst.msk [vmem:[#allocation3 + $0xf8] sm:$0xff] %vm849_vm3, %v2448_v45  ;;  %v1845_v8 = vpop.f32.mrb[57].mxu1  ;;  %v1953_v54 = vld [vmem:[#allocation3 + $0x108] sm:$0xff] }
 0x588   : > { %1909 = vst.msk [vmem:[#allocation3 + $0x128] sm:$0xff] %vm849_vm3, %v1845_v8  ;;  %v1847_v48 = vpop.f32.mrb[58].mxu1 }
 0x589   : > { %v1849_v49 = vpop.f32.mrb[59].mxu1  ;;  %v2378_v50 = vpop.f32.mrb[52].mxu0  ;;  %2909 = vmatmul.mubr.bf16.gmra.mrb[112].mxu1 %v5154_v43  ;;  %v1955_v34 = vld [vmem:[#allocation3 + $0x118] sm:$0xff] }
 0x58a   : > { %1911 = vst.msk [vmem:[#allocation3 + $0x138] sm:$0xff] %vm849_vm3, %v1849_v49  ;;  %v5340_v51 = vadd.f32 %v2378_v50, %v1833_v5  ;;  %v2380_v1 = vpop.f32.mrb[53].mxu0  ;;  %v5375_v49 = vrot.slane %v3063_v33, %v3071_v62 }
 0x58b   : > { %v2450_v57 = vadd.f32 %v2380_v1, %v1953_v54  ;;  %v2382_v26 = vpop.f32.mrb[54].mxu0 }
 0x58c   : > { %v5342_v17 = vadd.f32 %v2382_v26, %v1837_v16  ;;  %v2384_v42 = vpop.f32.mrb[55].mxu0  ;;  %v5366_v16 = vrot.slane %v3063_v33, %v3067_v2 }
 0x58d   : > { %2498 = vst.msk [vmem:[#allocation3 + $0x108] sm:$0xff] %vm849_vm3, %v2450_v57  ;;  %v2452_v22 = vadd.f32 %v2384_v42, %v1955_v34 }
 0x58e   : > { %v5345_v38 = vpop.f32.mrb[60].mxu1 }
 0x58f   : > { %2500 = vst.msk [vmem:[#allocation3 + $0x118] sm:$0xff] %vm849_vm3, %v2452_v22  ;;  %v1855_v43 = vpop.f32.mrb[61].mxu1  ;;  %v1957_v9 = vld [vmem:[#allocation3 + $0x128] sm:$0xff] }
 0x590   : > { %1913 = vst.msk [vmem:[#allocation3 + $0x148] sm:$0xff] %vm849_vm3, %v1855_v43  ;;  %v5349_v24 = vpop.f32.mrb[62].mxu1 }
 0x591   : > { %v1859_v56 = vpop.f32.mrb[63].mxu1  ;;  %v1959_v5 = vld [vmem:[#allocation3 + $0x138] sm:$0xff] }
 0x592   : > { %1915 = vst.msk [vmem:[#allocation3 + $0x158] sm:$0xff] %vm849_vm3, %v1859_v56  ;;  %v2520_v56 = vld [vmem:[#allocation3 + $0x38] sm:$0xff] }
 0x5c4   : > { %v5352_v40 = vpop.f32.mrb[64].mxu1 }
 0x5c5   : > { %v1865_v41 = vpop.f32.mrb[65].mxu1 }
 0x5c6   : > { %1917 = vst.msk [vmem:[#allocation3 + $0x168] sm:$0xff] %vm849_vm3, %v1865_v41  ;;  %v5355_v44 = vpop.f32.mrb[66].mxu1 }
 0x5c7   : > { %v1869_v63 = vpop.f32.mrb[67].mxu1  ;;  %v2388_v47 = vpop.f32.mrb[56].mxu0 }
 0x5c8   : > { %1919 = vst.msk [vmem:[#allocation3 + $0x178] sm:$0xff] %vm849_vm3, %v1869_v63  ;;  %v5358_v4 = vadd.f32 %v2388_v47, %v1843_v39  ;;  %v2390_v10 = vpop.f32.mrb[57].mxu0 }
 0x5c9   : > { %v2454_v35 = vadd.f32 %v2390_v10, %v1957_v9  ;;  %v2392_v11 = vpop.f32.mrb[58].mxu0 }
 0x5ca   : > { %v5363_v12 = vadd.f32 %v2392_v11, %v1847_v48  ;;  %v2394_v59 = vpop.f32.mrb[59].mxu0 }
 0x5cb   : > { %2502 = vst.msk [vmem:[#allocation3 + $0x128] sm:$0xff] %vm849_vm3, %v2454_v35  ;;  %v2456_v23 = vadd.f32 %v2394_v59, %v1959_v5  ;;  %v2522_v5 = vld [vmem:[#allocation3 + $0x48] sm:$0xff] }
 0x5cc   : > { %v2800_v18 = vpop.f32.mrb[68].mxu1 }
 0x5cd   : > { %2504 = vst.msk [vmem:[#allocation3 + $0x138] sm:$0xff] %vm849_vm3, %v2456_v23  ;;  %v2919_v19 = vadd.f32 %v2800_v18, %v5212_v60  ;;  %v2802_v27 = vpop.f32.mrb[69].mxu1 }
 0x5ce   : > { %v2920_v28 = vadd.f32 %v2802_v27, %v2514_v25  ;;  %v2804_v29 = vpop.f32.mrb[70].mxu1 }
 0x5cf   : > { %v3075_v30 = vadd.f32 %v5366_v16, %v2919_v19  ;;  %v2921_v20 = vadd.f32 %v2804_v29, %v5214_v58  ;;  %v2806_v45 = vpop.f32.mrb[71].mxu1  ;;  %v2518_v58 = vld [vmem:[#allocation3 + $0x28] sm:$0xff]  ;;  %v2524_v29 = vld [vmem:[#allocation3 + $0x58] sm:$0xff] }
 0x5d0   : > { %2968 = vst.msk [vmem:[#allocation3 + $0x8] sm:$0xff] %vm849_vm3, %v2920_v28  ;;  %v2922_v39 = vadd.f32 %v2806_v45, %v2516_v36 }
 0x5d1   : > { %v3077_v8 = vadd.f32 %v5366_v16, %v2921_v20  ;;  %v3123_v48 = vmax.f32 %v3075_v30, 0.0 }
 0x5d2   : > { %2970 = vst.msk [vmem:[#allocation3 + $0x18] sm:$0xff] %vm849_vm3, %v2922_v39 }
 0x5d3   : > { %v3125_v60 = vmax.f32 %v3077_v8, 0.0 }
 0x5d4   : > { %v2810_v50 = vpop.f32.mrb[72].mxu1 }
 0x5d5   : > { %v5377_v54 = vpack.c.bf16 %v3125_v60, %v3123_v48  ;;  %v2923_v1 = vadd.f32 %v2810_v50, %v5227_v15  ;;  %v2812_v57 = vpop.f32.mrb[73].mxu1 }
 0x5d6   : > { %v2924_v26 = vadd.f32 %v2812_v57, %v2518_v58  ;;  %v2814_v34 = vpop.f32.mrb[74].mxu1  ;;  %v2526_v58 = vld [vmem:[#allocation3 + $0x68] sm:$0xff] }
 0x5d7   : > { %v3016_v42 = vld [vmem:[#allocation3 + $0x8] sm:$0xff]  ;;  %3195 = vst [vmem:[#allocation2] sm:$0xff] %v5377_v54  ;;  %v3079_v22 = vadd.f32 %v5366_v16, %v2923_v1  ;;  %v2925_v43 = vadd.f32 %v2814_v34, %v5230_v13  ;;  %v2816_v3 = vpop.f32.mrb[75].mxu1 }
 0x5d8   : > { %v3076_v61 = vadd.f32 %v5375_v49, %v3016_v42  ;;  %2972 = vst.msk [vmem:[#allocation3 + $0x28] sm:$0xff] %vm849_vm3, %v2924_v26  ;;  %v2926_v41 = vadd.f32 %v2816_v3, %v2520_v56  ;;  %v2528_v3 = vld [vmem:[#allocation3 + $0x78] sm:$0xff] }
 0x5d9   : > { %v3018_v63 = vld [vmem:[#allocation3 + $0x18] sm:$0xff]  ;;  %v3081_v15 = vadd.f32 %v5366_v16, %v2925_v43  ;;  %v3127_v2 = vmax.f32 %v3079_v22, 0.0 }
 0x5da   : > { %v3078_v47 = vadd.f32 %v5375_v49, %v3018_v63  ;;  %2974 = vst.msk [vmem:[#allocation3 + $0x38] sm:$0xff] %vm849_vm3, %v2926_v41  ;;  %v3124_v10 = vmax.f32 %v3076_v61, 0.0 }
 0x5db   : > { %v3129_v9 = vmax.f32 %v3081_v15, 0.0 }
 0x5dc   : > { %v3126_v33 = vmax.f32 %v3078_v47, 0.0  ;;  %v2820_v35 = vpop.f32.mrb[76].mxu1 }
 0x5dd   : > { %v5388_v13 = vpack.c.bf16 %v3129_v9, %v3127_v2  ;;  %v2927_v11 = vadd.f32 %v2820_v35, %v5243_v46  ;;  %v2822_v59 = vpop.f32.mrb[77].mxu1 }
 0x5de   : > { %v3172_v23 = vpack.c.bf16 %v3126_v33, %v3124_v10  ;;  %v2928_v18 = vadd.f32 %v2822_v59, %v2522_v5  ;;  %v2824_v19 = vpop.f32.mrb[78].mxu1  ;;  %v2530_v59 = vld [vmem:[#allocation3 + $0x88] sm:$0xff] }
 0x5df   : > { %v3020_v25 = vld [vmem:[#allocation3 + $0x28] sm:$0xff]  ;;  %3197 = vst [vmem:[#allocation2 + $0x10] sm:$0xff] %v5388_v13  ;;  %v3083_v27 = vadd.f32 %v5366_v16, %v2927_v11  ;;  %v2929_v28 = vadd.f32 %v2824_v19, %v5246_v37  ;;  %v2826_v30 = vpop.f32.mrb[79].mxu1 }
 0x5e0   : > { %3196 = vst.msk [vmem:[#allocation2 + $0x8] sm:$0xff] %vm849_vm3, %v3172_v23  ;;  %v3080_v20 = vadd.f32 %v5375_v49, %v3020_v25  ;;  %2976 = vst.msk [vmem:[#allocation3 + $0x48] sm:$0xff] %vm849_vm3, %v2928_v18  ;;  %v2930_v46 = vadd.f32 %v2826_v30, %v2524_v29  ;;  %v2532_v29 = vld [vmem:[#allocation3 + $0x98] sm:$0xff] }
 0x5e1   : > { %v3022_v36 = vld [vmem:[#allocation3 + $0x38] sm:$0xff]  ;;  %v3085_v45 = vadd.f32 %v5366_v16, %v2929_v28  ;;  %v3131_v39 = vmax.f32 %v3083_v27, 0.0 }
 0x5e2   : > { %v3082_v62 = vadd.f32 %v5375_v49, %v3022_v36  ;;  %2978 = vst.msk [vmem:[#allocation3 + $0x58] sm:$0xff] %vm849_vm3, %v2930_v46  ;;  %v3128_v48 = vmax.f32 %v3080_v20, 0.0 }
 0x5e3   : > { %v3133_v8 = vmax.f32 %v3085_v45, 0.0 }
 0x5e4   : > { %v3130_v37 = vmax.f32 %v3082_v62, 0.0  ;;  %v2830_v60 = vpop.f32.mrb[80].mxu1 }
 0x5e5   : > { %v5400_v50 = vpack.c.bf16 %v3133_v8, %v3131_v39  ;;  %v2931_v1 = vadd.f32 %v2830_v60, %v5259_v52  ;;  %v2832_v57 = vpop.f32.mrb[81].mxu1 }
 0x5e6   : > { %v3174_v26 = vpack.c.bf16 %v3130_v37, %v3128_v48  ;;  %v2932_v34 = vadd.f32 %v2832_v57, %v2526_v58  ;;  %v2834_v42 = vpop.f32.mrb[82].mxu1  ;;  %v2534_v58 = vld [vmem:[#allocation3 + $0xa8] sm:$0xff] }
 0x5e7   : > { %v3024_v22 = vld [vmem:[#allocation3 + $0x48] sm:$0xff]  ;;  %3199 = vst [vmem:[#allocation2 + $0x20] sm:$0xff] %v5400_v50  ;;  %v3087_v43 = vadd.f32 %v5366_v16, %v2931_v1  ;;  %v2933_v56 = vadd.f32 %v2834_v42, %v5262_v53  ;;  %v2836_v61 = vpop.f32.mrb[83].mxu1  ;;  %v3220_v41 = vld [vmem:[#allocation2 + $0x8] sm:$0xff] }
 0x5e8   : > { %3198 = vst.msk [vmem:[#allocation2 + $0x18] sm:$0xff] %vm849_vm3, %v3174_v26  ;;  %v3084_v63 = vadd.f32 %v5375_v49, %v3024_v22  ;;  %2980 = vst.msk [vmem:[#allocation3 + $0x68] sm:$0xff] %vm849_vm3, %v2932_v34  ;;  %v2934_v52 = vadd.f32 %v2836_v61, %v2528_v3  ;;  %3908 = vmatprep.mubr.msk.bf16.mxu0 %vm849_vm3, %v3220_v41 }
 0x5e9   : > { %v3026_v15 = vld [vmem:[#allocation3 + $0x58] sm:$0xff]  ;;  %v3089_v47 = vadd.f32 %v5366_v16, %v2933_v56  ;;  %3415 = vmatmul.mubr.bf16.vlgmr.msra.gmra.mrb[68].mxu0 %v5377_v54  ;;  %v3135_v53 = vmax.f32 %v3087_v43, 0.0 }
 0x5ea   : > { %v3086_v2 = vadd.f32 %v5375_v49, %v3026_v15  ;;  %2982 = vst.msk [vmem:[#allocation3 + $0x78] sm:$0xff] %vm849_vm3, %v2934_v52  ;;  %v3132_v10 = vmax.f32 %v3084_v63, 0.0  ;;  %v2536_v56 = vld [vmem:[#allocation3 + $0xb8] sm:$0xff] }
 0x5eb   : > { %v3137_v9 = vmax.f32 %v3089_v47, 0.0 }
 0x5ec   : > { %v3134_v33 = vmax.f32 %v3086_v2, 0.0  ;;  %v2840_v35 = vpop.f32.mrb[84].mxu1 }
 0x5ed   : > { %v5414_v11 = vpack.c.bf16 %v3137_v9, %v3135_v53  ;;  %v2935_v5 = vadd.f32 %v2840_v35, %v5275_v7  ;;  %v2842_v23 = vpop.f32.mrb[85].mxu1  ;;  %v2538_v35 = vld [vmem:[#allocation3 + $0xc8] sm:$0xff] }
 0x5ee   : > { %v3176_v18 = vpack.c.bf16 %v3134_v33, %v3132_v10  ;;  %v2936_v19 = vadd.f32 %v2842_v23, %v2530_v59  ;;  %v2844_v25 = vpop.f32.mrb[86].mxu1 }
 0x5ef   : > { %v3028_v27 = vld [vmem:[#allocation3 + $0x68] sm:$0xff]  ;;  %3201 = vst [vmem:[#allocation2 + $0x30] sm:$0xff] %v5414_v11  ;;  %v3091_v54 = vadd.f32 %v5366_v16, %v2935_v5  ;;  %v2937_v28 = vadd.f32 %v2844_v25, %v5277_v14  ;;  %v2846_v30 = vpop.f32.mrb[87].mxu1 }
 0x5f0   : > { %v3222_v20 = vld [vmem:[#allocation2 + $0x18] sm:$0xff]  ;;  %3200 = vst.msk [vmem:[#allocation2 + $0x28] sm:$0xff] %vm849_vm3, %v3176_v18  ;;  %v3088_v46 = vadd.f32 %v5375_v49, %v3028_v27  ;;  %2984 = vst.msk [vmem:[#allocation3 + $0x88] sm:$0xff] %vm849_vm3, %v2936_v19  ;;  %v2938_v7 = vadd.f32 %v2846_v30, %v2532_v29  ;;  %v2540_v27 = vld [vmem:[#allocation3 + $0xd8] sm:$0xff] }
 0x5f1   : > { %3909 = vmatprep.mubr.msk.bf16.mxu0 %vm849_vm3, %v3222_v20  ;;  %v3030_v36 = vld [vmem:[#allocation3 + $0x78] sm:$0xff]  ;;  %v3093_v45 = vadd.f32 %v5366_v16, %v2937_v28  ;;  %v3139_v14 = vmax.f32 %v3091_v54, 0.0 }
 0x5f2   : > { %3423 = vmatmul.mubr.bf16.gmra.mrb[72].mxu0 %v5388_v13  ;;  %v3090_v62 = vadd.f32 %v5375_v49, %v3030_v36  ;;  %2986 = vst.msk [vmem:[#allocation3 + $0x98] sm:$0xff] %vm849_vm3, %v2938_v7  ;;  %v3136_v8 = vmax.f32 %v3088_v46, 0.0 }
 0x5f3   : > { %v3141_v39 = vmax.f32 %v3093_v45, 0.0 }
 0x5f4   : > { %v3138_v48 = vmax.f32 %v3090_v62, 0.0  ;;  %v2850_v37 = vpop.f32.mrb[88].mxu1 }
 0x5f5   : > { %v5428_v60 = vpack.c.bf16 %v3141_v39, %v3139_v14  ;;  %v2939_v1 = vadd.f32 %v2850_v37, %v5290_v32  ;;  %v2852_v57 = vpop.f32.mrb[89].mxu1 }
 0x5f6   : > { %v3178_v26 = vpack.c.bf16 %v3138_v48, %v3136_v8  ;;  %v2940_v34 = vadd.f32 %v2852_v57, %v2534_v58  ;;  %v2854_v42 = vpop.f32.mrb[90].mxu1  ;;  %v2542_v8 = vld [vmem:[#allocation3 + $0xe8] sm:$0xff] }
 0x5f7   : > { %v3032_v22 = vld [vmem:[#allocation3 + $0x88] sm:$0xff]  ;;  %3203 = vst [vmem:[#allocation2 + $0x40] sm:$0xff] %v5428_v60  ;;  %v3095_v13 = vadd.f32 %v5366_v16, %v2939_v1  ;;  %v2941_v43 = vadd.f32 %v2854_v42, %v5293_v0  ;;  %v2856_v3 = vpop.f32.mrb[91].mxu1  ;;  %v3224_v61 = vld [vmem:[#allocation2 + $0x28] sm:$0xff] }
 0x5f8   : > { %3202 = vst.msk [vmem:[#allocation2 + $0x38] sm:$0xff] %vm849_vm3, %v3178_v26  ;;  %v3092_v41 = vadd.f32 %v5375_v49, %v3032_v22  ;;  %2988 = vst.msk [vmem:[#allocation3 + $0xa8] sm:$0xff] %vm849_vm3, %v2940_v34  ;;  %v2942_v32 = vadd.f32 %v2856_v3, %v2536_v56  ;;  %3910 = vmatprep.mubr.msk.bf16.mxu0 %vm849_vm3, %v3224_v61  ;;  %v2544_v34 = vld [vmem:[#allocation3 + $0xf8] sm:$0xff] }
 0x5f9   : > { %v3034_v63 = vld [vmem:[#allocation3 + $0x98] sm:$0xff]  ;;  %v3097_v52 = vadd.f32 %v5366_v16, %v2941_v43  ;;  %v3143_v0 = vmax.f32 %v3095_v13, 0.0 }
 0x5fa   : > { %3430 = vmatmul.mubr.bf16.gmra.mrb[76].mxu0 %v5400_v50  ;;  %v3094_v15 = vadd.f32 %v5375_v49, %v3034_v63  ;;  %2990 = vst.msk [vmem:[#allocation3 + $0xb8] sm:$0xff] %vm849_vm3, %v2942_v32  ;;  %v3140_v2 = vmax.f32 %v3092_v41, 0.0 }
 0x5fb   : > { %v3145_v47 = vmax.f32 %v3097_v52, 0.0 }
 0x5fc   : > { %v3142_v53 = vmax.f32 %v3094_v15, 0.0  ;;  %v2860_v9 = vpop.f32.mrb[92].mxu1 }
 0x5fd   : > { %v5442_v10 = vpack.c.bf16 %v3145_v47, %v3143_v0  ;;  %v2943_v33 = vadd.f32 %v2860_v9, %v5308_v55  ;;  %v2862_v5 = vpop.f32.mrb[93].mxu1  ;;  %v2546_v0 = vld [vmem:[#allocation3 + $0x108] sm:$0xff] }
 0x5fe   : > { %v3180_v59 = vpack.c.bf16 %v3142_v53, %v3140_v2  ;;  %v2944_v23 = vadd.f32 %v2862_v5, %v2538_v35  ;;  %v2864_v18 = vpop.f32.mrb[94].mxu1  ;;  %v2548_v5 = vld [vmem:[#allocation3 + $0x118] sm:$0xff] }
 0x5ff   : > { %v3036_v19 = vld [vmem:[#allocation3 + $0xa8] sm:$0xff]  ;;  %3205 = vst [vmem:[#allocation2 + $0x50] sm:$0xff] %v5442_v10  ;;  %v3099_v50 = vadd.f32 %v5366_v16, %v2943_v33  ;;  %v2945_v25 = vadd.f32 %v2864_v18, %v5318_v6  ;;  %v2866_v54 = vpop.f32.mrb[95].mxu1 }
 0x600   : > { %v3226_v28 = vld [vmem:[#allocation2 + $0x38] sm:$0xff]  ;;  %3204 = vst.msk [vmem:[#allocation2 + $0x48] sm:$0xff] %vm849_vm3, %v3180_v59  ;;  %v3096_v29 = vadd.f32 %v5375_v49, %v3036_v19  ;;  %2992 = vst.msk [vmem:[#allocation3 + $0xc8] sm:$0xff] %vm849_vm3, %v2944_v23  ;;  %v2946_v55 = vadd.f32 %v2866_v54, %v2540_v27 }
 0x601   : > { %3911 = vmatprep.mubr.msk.bf16.mxu0 %vm849_vm3, %v3226_v28  ;;  %v3038_v30 = vld [vmem:[#allocation3 + $0xb8] sm:$0xff]  ;;  %v3101_v20 = vadd.f32 %v5366_v16, %v2945_v25  ;;  %v3147_v6 = vmax.f32 %v3099_v50, 0.0 }
 0x602   : > { %3437 = vmatmul.mubr.bf16.gmra.mrb[80].mxu0 %v5414_v11  ;;  %v3098_v46 = vadd.f32 %v5375_v49, %v3038_v30  ;;  %2994 = vst.msk [vmem:[#allocation3 + $0xd8] sm:$0xff] %vm849_vm3, %v2946_v55  ;;  %v3144_v36 = vmax.f32 %v3096_v29, 0.0 }
 0x603   : > { %v3149_v7 = vmax.f32 %v3101_v20, 0.0 }
 0x604   : > { %v3146_v45 = vmax.f32 %v3098_v46, 0.0  ;;  %v2870_v62 = vpop.f32.mrb[96].mxu1 }
 0x605   : > { %v5456_v14 = vpack.c.bf16 %v3149_v7, %v3147_v6  ;;  %v2947_v39 = vadd.f32 %v2870_v62, %v5329_v21  ;;  %v2872_v48 = vpop.f32.mrb[97].mxu1 }
 0x606   : > { %v3182_v37 = vpack.c.bf16 %v3146_v45, %v3144_v36  ;;  %v2948_v1 = vadd.f32 %v2872_v48, %v2542_v8  ;;  %v2874_v58 = vpop.f32.mrb[98].mxu1 }
 0x607   : > { %v3040_v57 = vld [vmem:[#allocation3 + $0xc8] sm:$0xff]  ;;  %3207 = vst [vmem:[#allocation2 + $0x60] sm:$0xff] %v5456_v14  ;;  %v3103_v11 = vadd.f32 %v5366_v16, %v2947_v39  ;;  %v2949_v26 = vadd.f32 %v2874_v58, %v5332_v31  ;;  %v2876_v42 = vpop.f32.mrb[99].mxu1  ;;  %v3228_v22 = vld [vmem:[#allocation2 + $0x48] sm:$0xff] }
 0x608   : > { %3206 = vst.msk [vmem:[#allocation2 + $0x58] sm:$0xff] %vm849_vm3, %v3182_v37  ;;  %v3100_v13 = vadd.f32 %v5375_v49, %v3040_v57  ;;  %2996 = vst.msk [vmem:[#allocation3 + $0xe8] sm:$0xff] %vm849_vm3, %v2948_v1  ;;  %v2950_v21 = vadd.f32 %v2876_v42, %v2544_v34  ;;  %3912 = vmatprep.mubr.msk.bf16.mxu0 %vm849_vm3, %v3228_v22  ;;  %v2550_v37 = vld [vmem:[#allocation3 + $0x128] sm:$0xff]  ;;  %v2552_v34 = vld [vmem:[#allocation3 + $0x138] sm:$0xff] }
 0x609   : > { %v3042_v43 = vld [vmem:[#allocation3 + $0xd8] sm:$0xff]  ;;  %v3105_v56 = vadd.f32 %v5366_v16, %v2949_v26  ;;  %v3151_v31 = vmax.f32 %v3103_v11, 0.0 }
 0x60a   : > { %3445 = vmatmul.mubr.bf16.gmra.mrb[84].mxu0 %v5428_v60  ;;  %v3102_v3 = vadd.f32 %v5375_v49, %v3042_v43  ;;  %2998 = vst.msk [vmem:[#allocation3 + $0xf8] sm:$0xff] %vm849_vm3, %v2950_v21  ;;  %v3148_v41 = vmax.f32 %v3100_v13, 0.0  ;;  %v1961_v21 = vld [vmem:[#allocation3 + $0x148] sm:$0xff] }
 0x60b   : > { %v3153_v61 = vmax.f32 %v3105_v56, 0.0 }
 0x60c   : > { %v3150_v32 = vmax.f32 %v3102_v3, 0.0  ;;  %v2880_v63 = vpop.f32.mrb[100].mxu1 }
 0x60d   : > { %v3185_v52 = vpack.c.bf16 %v3153_v61, %v3151_v31  ;;  %v2951_v15 = vadd.f32 %v2880_v63, %v5340_v51  ;;  %v2882_v47 = vpop.f32.mrb[101].mxu1  ;;  %v1963_v61 = vld [vmem:[#allocation3 + $0x158] sm:$0xff] }
 0x60e   : > { %v3184_v2 = vpack.c.bf16 %v3150_v32, %v3148_v41  ;;  %v2952_v53 = vadd.f32 %v2882_v47, %v2546_v0  ;;  %v2884_v9 = vpop.f32.mrb[102].mxu1 }
 0x60f   : > { %v3044_v33 = vld [vmem:[#allocation3 + $0xe8] sm:$0xff]  ;;  %3209 = vst [vmem:[#allocation2 + $0x70] sm:$0xff] %v3185_v52  ;;  %v3107_v60 = vadd.f32 %v5366_v16, %v2951_v15  ;;  %v2953_v35 = vadd.f32 %v2884_v9, %v5342_v17  ;;  %v2886_v59 = vpop.f32.mrb[103].mxu1 }
 0x610   : > { %v3230_v23 = vld [vmem:[#allocation2 + $0x58] sm:$0xff]  ;;  %3208 = vst.msk [vmem:[#allocation2 + $0x68] sm:$0xff] %vm849_vm3, %v3184_v2  ;;  %v3104_v18 = vadd.f32 %v5375_v49, %v3044_v33  ;;  %3000 = vst.msk [vmem:[#allocation3 + $0x108] sm:$0xff] %vm849_vm3, %v2952_v53  ;;  %v2954_v51 = vadd.f32 %v2886_v59, %v2548_v5 }
 0x611   : > { %3913 = vmatprep.mubr.msk.bf16.mxu0 %vm849_vm3, %v3230_v23  ;;  %v3046_v19 = vld [vmem:[#allocation3 + $0xf8] sm:$0xff]  ;;  %v3109_v50 = vadd.f32 %v5366_v16, %v2953_v35  ;;  %v3155_v17 = vmax.f32 %v3107_v60, 0.0  ;;  %v1965_v5 = vld [vmem:[#allocation3 + $0x168] sm:$0xff] }
 0x612   : > { %3452 = vmatmul.mubr.bf16.gmra.mrb[88].mxu0 %v5442_v10  ;;  %v3106_v25 = vadd.f32 %v5375_v49, %v3046_v19  ;;  %3002 = vst.msk [vmem:[#allocation3 + $0x118] sm:$0xff] %vm849_vm3, %v2954_v51  ;;  %v3152_v54 = vmax.f32 %v3104_v18, 0.0 }
 0x613   : > { %v3157_v27 = vmax.f32 %v3109_v50, 0.0 }
 0x614   : > { %v3154_v28 = vmax.f32 %v3106_v25, 0.0 }
 0x615   : > { %v3187_v29 = vpack.c.bf16 %v3157_v27, %v3155_v17  ;;  %v1967_v27 = vld [vmem:[#allocation3 + $0x178] sm:$0xff] }
 0x616   : > { %v3186_v55 = vpack.c.bf16 %v3154_v28, %v3152_v54 }
 0x617   : > { %v3048_v30 = vld [vmem:[#allocation3 + $0x108] sm:$0xff]  ;;  %3211 = vst [vmem:[#allocation2 + $0x80] sm:$0xff] %v3187_v29  ;;  %v3232_v20 = vld [vmem:[#allocation2 + $0x68] sm:$0xff] }
 0x618   : > { %3210 = vst.msk [vmem:[#allocation2 + $0x78] sm:$0xff] %vm849_vm3, %v3186_v55  ;;  %v3108_v46 = vadd.f32 %v5375_v49, %v3048_v30  ;;  %3914 = vmatprep.mubr.msk.bf16.mxu0 %vm849_vm3, %v3232_v20 }
 0x619   : > { %v3050_v10 = vld [vmem:[#allocation3 + $0x118] sm:$0xff] }
 0x61a   : > { %3459 = vmatmul.mubr.bf16.gmra.mrb[92].mxu0 %v5456_v14  ;;  %v3110_v6 = vadd.f32 %v5375_v49, %v3050_v10  ;;  %v3156_v7 = vmax.f32 %v3108_v46, 0.0 }
 0x61c   : > { %v3158_v36 = vmax.f32 %v3110_v6, 0.0 }
 0x61e   : > { %v3188_v45 = vpack.c.bf16 %v3158_v36, %v3156_v7 }
 0x61f   : > { %v3234_v62 = vld [vmem:[#allocation2 + $0x78] sm:$0xff] }
 0x620   : > { %3212 = vst.msk [vmem:[#allocation2 + $0x88] sm:$0xff] %vm849_vm3, %v3188_v45  ;;  %3915 = vmatprep.mubr.msk.bf16.mxu0 %vm849_vm3, %v3234_v62 }
 0x622   : > { %3467 = vmatmul.mubr.bf16.gmra.mrb[96].mxu0 %v3185_v52 }
 0x627   : > { %v3236_v39 = vld [vmem:[#allocation2 + $0x88] sm:$0xff] }
 0x628   : > { %3916 = vmatprep.mubr.msk.bf16.mxu0 %vm849_vm3, %v3236_v39 }
 0x62a   : > { %3474 = vmatmul.mubr.bf16.gmra.mrb[100].mxu0 %v3187_v29 }
 0x64c   : > { %v2890_v8 = vpop.f32.mrb[104].mxu1 }
 0x64d   : > { %v2955_v48 = vadd.f32 %v2890_v8, %v5358_v4  ;;  %v2892_v14 = vpop.f32.mrb[105].mxu1 }
 0x64e   : > { %v2956_v1 = vadd.f32 %v2892_v14, %v2550_v37  ;;  %v2894_v58 = vpop.f32.mrb[106].mxu1 }
 0x64f   : > { %v3111_v57 = vadd.f32 %v5366_v16, %v2955_v48  ;;  %v2957_v11 = vadd.f32 %v2894_v58, %v5363_v12  ;;  %v2398_v26 = vpop.f32.mrb[60].mxu0  ;;  %v2896_v42 = vpop.f32.mrb[107].mxu1 }
 0x650   : > { %3004 = vst.msk [vmem:[#allocation3 + $0x128] sm:$0xff] %vm849_vm3, %v2956_v1  ;;  %v2457_v22 = vadd.f32 %v2398_v26, %v5345_v38  ;;  %v2958_v13 = vadd.f32 %v2896_v42, %v2552_v34  ;;  %v2400_v43 = vpop.f32.mrb[61].mxu0 }
 0x651   : > { %v3113_v4 = vadd.f32 %v5366_v16, %v2957_v11  ;;  %v2458_v56 = vadd.f32 %v2400_v43, %v1961_v21  ;;  %v2402_v3 = vpop.f32.mrb[62].mxu0  ;;  %v3159_v41 = vmax.f32 %v3111_v57, 0.0 }
 0x652   : > { %3006 = vst.msk [vmem:[#allocation3 + $0x138] sm:$0xff] %vm849_vm3, %v2958_v13  ;;  %v2459_v31 = vadd.f32 %v2402_v3, %v5349_v24  ;;  %v2404_v12 = vpop.f32.mrb[63].mxu0 }
 0x653   : > { %v3161_v32 = vmax.f32 %v3113_v4, 0.0  ;;  %2506 = vst.msk [vmem:[#allocation3 + $0x148] sm:$0xff] %vm849_vm3, %v2458_v56  ;;  %v2460_v63 = vadd.f32 %v2404_v12, %v1963_v61 }
 0x654   : > { %v2900_v52 = vpop.f32.mrb[108].mxu1 }
 0x655   : > { %v5498_v38 = vpack.c.bf16 %v3161_v32, %v3159_v41  ;;  %2508 = vst.msk [vmem:[#allocation3 + $0x158] sm:$0xff] %vm849_vm3, %v2460_v63  ;;  %v2959_v15 = vadd.f32 %v2900_v52, %v2457_v22  ;;  %v2902_v0 = vpop.f32.mrb[109].mxu1 }
 0x656   : > { %v2904_v47 = vpop.f32.mrb[110].mxu1 }
 0x657   : > { %v3052_v2 = vld [vmem:[#allocation3 + $0x128] sm:$0xff]  ;;  %3213 = vst [vmem:[#allocation2 + $0x90] sm:$0xff] %v5498_v38  ;;  %v3115_v24 = vadd.f32 %v5366_v16, %v2959_v15  ;;  %v2961_v53 = vadd.f32 %v2904_v47, %v2459_v31  ;;  %v2408_v9 = vpop.f32.mrb[64].mxu0  ;;  %v2906_v33 = vpop.f32.mrb[111].mxu1  ;;  %v5531_v15 = vld [vmem:[%s5643_s9] ss:$0 sm:$0xff] }
 0x658   : > { %v3112_v60 = vadd.f32 %v5375_v49, %v3052_v2  ;;  %v2461_v35 = vadd.f32 %v2408_v9, %v5352_v40  ;;  %v2410_v59 = vpop.f32.mrb[65].mxu0 }
 0x659   : > { %v3054_v23 = vld [vmem:[#allocation3 + $0x138] sm:$0xff]  ;;  %v3117_v18 = vadd.f32 %v5366_v16, %v2961_v53  ;;  %v2462_v51 = vadd.f32 %v2410_v59, %v1965_v5  ;;  %v2412_v19 = vpop.f32.mrb[66].mxu0  ;;  %v3163_v28 = vmax.f32 %v3115_v24, 0.0 }
 0x65a   : > { %v3114_v50 = vadd.f32 %v5375_v49, %v3054_v23  ;;  %v2554_v25 = vld [vmem:[#allocation3 + $0x148] sm:$0xff]  ;;  %v2463_v17 = vadd.f32 %v2412_v19, %v5355_v44  ;;  %v2414_v54 = vpop.f32.mrb[67].mxu0  ;;  %v3160_v30 = vmax.f32 %v3112_v60, 0.0 }
 0x65b   : > { %v2960_v29 = vadd.f32 %v2902_v0, %v2554_v25  ;;  %v3165_v55 = vmax.f32 %v3117_v18, 0.0  ;;  %2510 = vst.msk [vmem:[#allocation3 + $0x168] sm:$0xff] %vm849_vm3, %v2462_v51  ;;  %v2464_v40 = vadd.f32 %v2414_v54, %v1967_v27 }
 0x65c   : > { %v3162_v20 = vmax.f32 %v3114_v50, 0.0  ;;  %v2556_v46 = vld [vmem:[#allocation3 + $0x158] sm:$0xff]  ;;  %v2910_v10 = vpop.f32.mrb[112].mxu1 }
 0x65d   : > { %3008 = vst.msk [vmem:[#allocation3 + $0x148] sm:$0xff] %vm849_vm3, %v2960_v29  ;;  %v3191_v6 = vpack.c.bf16 %v3165_v55, %v3163_v28  ;;  %v2962_v7 = vadd.f32 %v2906_v33, %v2556_v46  ;;  %2512 = vst.msk [vmem:[#allocation3 + $0x178] sm:$0xff] %vm849_vm3, %v2464_v40  ;;  %v2963_v36 = vadd.f32 %v2910_v10, %v2461_v35  ;;  %v2912_v44 = vpop.f32.mrb[113].mxu1 }
 0x65e   : > { %v3190_v45 = vpack.c.bf16 %v3162_v20, %v3160_v30  ;;  %v2914_v62 = vpop.f32.mrb[114].mxu1 }
 0x65f   : > { %3215 = vst [vmem:[#allocation2 + $0xa0] sm:$0xff] %v3191_v6  ;;  %3010 = vst.msk [vmem:[#allocation3 + $0x158] sm:$0xff] %vm849_vm3, %v2962_v7  ;;  %v3119_v39 = vadd.f32 %v5366_v16, %v2963_v36  ;;  %v2965_v8 = vadd.f32 %v2914_v62, %v2463_v17  ;;  %v2916_v48 = vpop.f32.mrb[115].mxu1 }
 0x660   : > { %3214 = vst.msk [vmem:[#allocation2 + $0x98] sm:$0xff] %vm849_vm3, %v3190_v45 }
 0x661   : > { %v3121_v37 = vadd.f32 %v5366_v16, %v2965_v8  ;;  %v3167_v1 = vmax.f32 %v3119_v39, 0.0 }
 0x662   : > { %v2558_v14 = vld [vmem:[#allocation3 + $0x168] sm:$0xff] }
 0x663   : > { %v2964_v58 = vadd.f32 %v2912_v44, %v2558_v14  ;;  %v3169_v57 = vmax.f32 %v3121_v37, 0.0 }
 0x664   : > { %v3056_v11 = vld [vmem:[#allocation3 + $0x148] sm:$0xff]  ;;  %v2560_v26 = vld [vmem:[#allocation3 + $0x178] sm:$0xff] }
 0x665   : > { %v3116_v34 = vadd.f32 %v5375_v49, %v3056_v11  ;;  %3012 = vst.msk [vmem:[#allocation3 + $0x168] sm:$0xff] %vm849_vm3, %v2964_v58  ;;  %v3193_v42 = vpack.c.bf16 %v3169_v57, %v3167_v1  ;;  %v2966_v22 = vadd.f32 %v2916_v48, %v2560_v26 }
 0x666   : > { %v3058_v13 = vld [vmem:[#allocation3 + $0x158] sm:$0xff] }
 0x667   : > { %v3118_v21 = vadd.f32 %v5375_v49, %v3058_v13  ;;  %3217 = vst [vmem:[#allocation2 + $0xb0] sm:$0xff] %v3193_v42  ;;  %3014 = vst.msk [vmem:[#allocation3 + $0x178] sm:$0xff] %vm849_vm3, %v2966_v22  ;;  %v3238_v43 = vld [vmem:[#allocation2 + $0x98] sm:$0xff]  ;;  %v3164_v16 = vmax.f32 %v3116_v34, 0.0 }
 0x668   : > { %3917 = vmatprep.mubr.msk.bf16.mxu0 %vm849_vm3, %v3238_v43 }
 0x669   : > { %v3166_v4 = vmax.f32 %v3118_v21, 0.0  ;;  %3481 = vmatmul.mubr.bf16.gmra.mrb[104].mxu0 %v5498_v38 }
 0x66b   : > { %v3192_v56 = vpack.c.bf16 %v3166_v4, %v3164_v16 }
 0x66c   : > { %v3060_v3 = vld [vmem:[#allocation3 + $0x168] sm:$0xff] }
 0x66d   : > { %3216 = vst.msk [vmem:[#allocation2 + $0xa8] sm:$0xff] %vm849_vm3, %v3192_v56  ;;  %v3120_v31 = vadd.f32 %v5375_v49, %v3060_v3 }
 0x66e   : > { %v3062_v61 = vld [vmem:[#allocation3 + $0x178] sm:$0xff] }
 0x66f   : > { %v3122_v12 = vadd.f32 %v5375_v49, %v3062_v61  ;;  %v3168_v41 = vmax.f32 %v3120_v31, 0.0 }
 0x671   : > { %v3170_v32 = vmax.f32 %v3122_v12, 0.0 }
 0x673   : > { %v3194_v63 = vpack.c.bf16 %v3170_v32, %v3168_v41 }
 0x674   : > { %v3240_v52 = vld [vmem:[#allocation2 + $0xa8] sm:$0xff] }
 0x675   : > { %3218 = vst.msk [vmem:[#allocation2 + $0xb8] sm:$0xff] %vm849_vm3, %v3194_v63  ;;  %3918 = vmatprep.mubr.msk.bf16.mxu0 %vm849_vm3, %v3240_v52 }
 0x676   : > { %3489 = vmatmul.mubr.bf16.gmra.mrb[108].mxu0 %v3191_v6 }
 0x67c   : > { %v3242_v38 = vld [vmem:[#allocation2 + $0xb8] sm:$0xff] }
 0x67d   : > { %3919 = vmatprep.mubr.msk.bf16.mxu0 %vm849_vm3, %v3242_v38 }
 0x67e   : > { %3496 = vmatmul.mubr.bf16.gmra.mrb[112].mxu0 %v3193_v42 }
 0x6bc   : > { %v3416_v49 = vpop.f32.mrb[68].mxu0 }
 0x6bd   : > { %v3417_v0 = vadd.f32 %v5531_v15, %v3416_v49  ;;  %v3418_v47 = vpop.f32.mrb[69].mxu0 }
 0x6be   : > { %v3419_v2 = vpop.f32.mrb[70].mxu0 }
 0x6bf   : > { %3503 = vst [vmem:[%s5536_s22] sm:$0xff] %v3417_v0  ;;  %v3420_v24 = vadd.f32 %v5531_v15, %v3419_v2  ;;  %v3421_v53 = vpop.f32.mrb[71].mxu0 }
 0x6c1   : > { %3504 = vst [vmem:[%s5536_s22 + $0x8] sm:$0xff] %v3420_v24 }
 0x6c5   : > { %v3424_v9 = vpop.f32.mrb[72].mxu0 }
 0x6c6   : > { %v3425_v33 = vpop.f32.mrb[73].mxu0 }
 0x6c7   : > { %v3426_v60 = vpop.f32.mrb[74].mxu0 }
 0x6c8   : > { %v3427_v35 = vadd.f32 %v5531_v15, %v3426_v60  ;;  %v3428_v5 = vpop.f32.mrb[75].mxu0 }
 0x6ca   : > { %3505 = vst [vmem:[%s5536_s22 + $0x10] sm:$0xff] %v3427_v35 }
 0x6cd   : > { %v3431_v59 = vpop.f32.mrb[76].mxu0 }
 0x6ce   : > { %v3432_v23 = vadd.f32 %v5531_v15, %v3431_v59  ;;  %v3433_v18 = vpop.f32.mrb[77].mxu0 }
 0x6cf   : > { %v3434_v51 = vpop.f32.mrb[78].mxu0 }
 0x6d0   : > { %3506 = vst [vmem:[%s5536_s22 + $0x18] sm:$0xff] %v3432_v23  ;;  %v3435_v19 = vpop.f32.mrb[79].mxu0 }
 0x6d5   : > { %v3438_v50 = vpop.f32.mrb[80].mxu0 }
 0x6d6   : > { %v3439_v25 = vadd.f32 %v5531_v15, %v3438_v50  ;;  %v3440_v17 = vpop.f32.mrb[81].mxu0 }
 0x6d7   : > { %v3441_v27 = vpop.f32.mrb[82].mxu0 }
 0x6d8   : > { %4228 = shalt.err (!%p4225_p10)
}
 0x6d9   : > { %s4229_s26 = scalar_lea.hbm %s5551_s15, 2048  ;;  %s4233_s4 = scalar_lea.hbm %s5644_s10, 8192 }
 0x6da   : > { %p4230_p11 = scmp.ne.s32.totalorder %s5551_s15, %s4229_s26  ;;  %p4234_p0 = scmp.lt.u32.totalorder %s5551_s15, %s5644_s10 }
 0x6db   : > { %p4235_p1 = scmp.lt.u32.totalorder %s4233_s4, %s4229_s26  ;;  %p4237_p4 = scmp.lt.u32.totalorder %s4229_s26, %s5551_s15 }
 0x6dc   : > { %p4231_p12 = pnand %p4230_p11, %p4427_p3 }
 0x6dd   : > { %p4236_p2 = por %p4235_p1, %p4234_p0 }
 0x6de   : > { %p4232_p13 = pneg %p4231_p12 }
 0x6df   : > { %p4238_p5 = por %p4237_p4, %p4236_p2 }
 0x6e1   : > { %p4239_p6 = pnand %p4238_p5, %p4232_p13 }
 0x6e3   : > { %4242 = shalt.err (!%p4239_p6)
}
 0x6e4   : > { %s4314_s21 = smov 128   ;;  %s4315_s0 = smov 8   ;;  %3507 = vst [vmem:[%s5536_s22 + $0x20] sm:$0xff] %v3439_v25  ;;  %v3442_v54 = vadd.f32 %v5531_v15, %v3441_v27  ;;  %v3443_v28 = vpop.f32.mrb[83].mxu0 }
 0x6e5   : > { %4008 = dma.vmem_to_hbm [thread:$0]  (%p4427_p3), %s5555_s2, 2048, %s5551_s15, %s5559_s29, %s4314_s21, %s4314_s21, %s4315_s0   ;;  %v3446_v29 = vpop.f32.mrb[84].mxu0 }
 0x6e6   : > { %3508 = vst [vmem:[%s5536_s22 + $0x28] sm:$0xff] %v3442_v54  ;;  %v3447_v55 = vpop.f32.mrb[85].mxu0 }
 0x6e7   : > { %v3448_v40 = vpop.f32.mrb[86].mxu0 }
 0x6e8   : > { %v3449_v30 = vadd.f32 %v5531_v15, %v3448_v40  ;;  %v3450_v20 = vpop.f32.mrb[87].mxu0 }
 0x6e9   : > { %v3453_v46 = vpop.f32.mrb[88].mxu0 }
 0x6ea   : > { %3509 = vst [vmem:[%s5536_s22 + $0x30] sm:$0xff] %v3449_v30  ;;  %v3454_v10 = vadd.f32 %v5531_v15, %v3453_v46  ;;  %v3455_v6 = vpop.f32.mrb[89].mxu0 }
 0x6eb   : > { %v3456_v7 = vpop.f32.mrb[90].mxu0 }
 0x6ec   : > { %3510 = vst [vmem:[%s5536_s22 + $0x38] sm:$0xff] %v3454_v10  ;;  %v3457_v36 = vpop.f32.mrb[91].mxu0 }
 0x6ed   : > { %v3460_v44 = vpop.f32.mrb[92].mxu0 }
 0x6ee   : > { %v3461_v45 = vadd.f32 %v5531_v15, %v3460_v44  ;;  %v3462_v62 = vpop.f32.mrb[93].mxu0 }
 0x6ef   : > { %v3463_v39 = vpop.f32.mrb[94].mxu0 }
 0x6f0   : > { %3511 = vst [vmem:[%s5536_s22 + $0x40] sm:$0xff] %v3461_v45  ;;  %v3464_v8 = vadd.f32 %v5531_v15, %v3463_v39  ;;  %v3465_v48 = vpop.f32.mrb[95].mxu0 }
 0x6f2   : > { %3512 = vst [vmem:[%s5536_s22 + $0x48] sm:$0xff] %v3464_v8 }
 0x6f5   : > { %v3468_v37 = vpop.f32.mrb[96].mxu0 }
 0x6f6   : > { %v3469_v14 = vpop.f32.mrb[97].mxu0 }
 0x6f7   : > { %v3470_v1 = vpop.f32.mrb[98].mxu0 }
 0x6f8   : > { %v3471_v58 = vadd.f32 %v5531_v15, %v3470_v1  ;;  %v3472_v57 = vpop.f32.mrb[99].mxu0 }
 0x6fa   : > { %3513 = vst [vmem:[%s5536_s22 + $0x50] sm:$0xff] %v3471_v58 }
 0x6fd   : > { %v3475_v11 = vpop.f32.mrb[100].mxu0 }
 0x6fe   : > { %v3476_v26 = vadd.f32 %v5531_v15, %v3475_v11  ;;  %v3477_v34 = vpop.f32.mrb[101].mxu0 }
 0x6ff   : > { %v3478_v42 = vpop.f32.mrb[102].mxu0 }
 0x700   : > { %3514 = vst [vmem:[%s5536_s22 + $0x58] sm:$0xff] %v3476_v26  ;;  %v3479_v22 = vpop.f32.mrb[103].mxu0 }
 0x73c   : > { %v3482_v13 = vpop.f32.mrb[104].mxu0 }
 0x73d   : > { %v3483_v21 = vadd.f32 %v5531_v15, %v3482_v13  ;;  %v3484_v43 = vpop.f32.mrb[105].mxu0 }
 0x73e   : > { %v3485_v16 = vpop.f32.mrb[106].mxu0 }
 0x73f   : > { %3515 = vst [vmem:[%s5536_s22 + $0x60] sm:$0xff] %v3483_v21  ;;  %v3486_v4 = vadd.f32 %v5531_v15, %v3485_v16  ;;  %v3487_v56 = vpop.f32.mrb[107].mxu0 }
 0x741   : > { %3516 = vst [vmem:[%s5536_s22 + $0x68] sm:$0xff] %v3486_v4 }
 0x749   : > { %v3490_v3 = vpop.f32.mrb[108].mxu0 }
 0x74a   : > { %v3491_v31 = vpop.f32.mrb[109].mxu0 }
 0x74b   : > { %v3492_v61 = vpop.f32.mrb[110].mxu0 }
 0x74c   : > { %v3493_v12 = vadd.f32 %v5531_v15, %v3492_v61  ;;  %v3494_v41 = vpop.f32.mrb[111].mxu0 }
 0x74e   : > { %3517 = vst [vmem:[%s5536_s22 + $0x70] sm:$0xff] %v3493_v12 }
 0x751   : > { %v3497_v32 = vpop.f32.mrb[112].mxu0 }
 0x752   : > { %v3498_v63 = vadd.f32 %v5531_v15, %v3497_v32  ;;  %v3499_v52 = vpop.f32.mrb[113].mxu0 }
 0x753   : > { %v3500_v38 = vpop.f32.mrb[114].mxu0 }
 0x754   : > { %3518 = vst [vmem:[%s5536_s22 + $0x78] sm:$0xff] %v3498_v63  ;;  %v3501_v49 = vpop.f32.mrb[115].mxu0 }
 0x755 PF: > { %p4014_p3 = scmp.ge.s32.totalorder %s4309_s24, 2  ;;  %s3563_s30 = sand.u32 1, %s4281_s17  }
 0x756   : > { %s3564_s15 = scalar_lea.sflag [#allocation5], %s3563_s30 }
 0x757   : > { %p4011_p7 = pnand %p4014_p3, %p4436_p8 }
 0x759   : > { %4276 = dma.done.wait (!%p4011_p7), %s3564_s15, 2048  }
 0x75a   : > { %4278 = vsyncadd (!%p4011_p7), %s3564_s15, 4294965248  ;;  %s25_s24 = sadd.s32 1, %s4309_s24   ;;  %s5668_s20 = sld [smem:[#allocation7_spill]] }
 0x75b   : > { %p22_p9 = scmp.ge.s32.totalorder %s25_s24, 6   ;;  %s5669_s21 = sld [smem:[#allocation8_spill]] }
 0x75c   : > { %s5670_s22 = sld [smem:[#allocation9_spill]]  ;;  %s5671_s23 = sld [smem:[#allocation10_spill]] }
 0x75d   : > { %s5672_s17 = smov %s4285_s18  ;;  %s5673_s18 = smov %s4289_s19 }
 0x75e   : > { %s5674_s19 = smov %s4445_s16  ;;  %24 = sbr.rel (!%p22_p9) target bundleno = 9 (0x9), region = 112 }
 0x765   :  { %3581 = vsyncpa [#allocation5], 1 }
 0x766   :  { %3583 = vsyncpa [#allocation5 + $0x1], 1 }

</bundles_post_ra>
